<compile_context>
chip_gen: v5e
topology: v5e:2x2
jax: 0.10.0
libtpu: 0.0.40
codegen_flags: <defaults>
</compile_context>

<pallas_src>
import functools

import jax
import jax.numpy as jnp
from jax import lax
from jax.experimental import pallas as pl
from jax.experimental.pallas import tpu as pltpu


def _round_up(x, m):
    return (x + m - 1) // m * m


def _unit_tcn_kernel(x_ref, w_ref, shift_ref, o_ref, *scratch,
                     kernel_size, stride, tile_t, v_pad, phase_len, fuse_taps):
    # x_ref     : (stride*phase_len*v_pad, C_in)  bf16  whole temporal slab (resident across t)
    # w_ref     : (K*C_in, C_out)                 bf16  (BN scale folded in, taps flattened)
    # shift_ref : (1, C_out)                      f32   (conv bias + BN shift folded)
    # o_ref     : (tile_t*v_pad, C_out)
    t = pl.program_id(1)
    rows = tile_t * v_pad
    c_in = x_ref.shape[-1]

    def tap_slice(k):
        phase = k % stride                    # de-interleaved phase holding this tap
        off = k // stride                     # offset inside that phase
        start = (phase * phase_len + t * tile_t + off) * v_pad
        start = pl.multiple_of(start, 8)      # v_pad is a multiple of 8
        return x_ref[pl.ds(start, rows), :]   # contiguous (rows, C_in) slice, no relayout

    if fuse_taps:
        # im2col in VMEM: one deep (rows, K*C_in) x (K*C_in, C_out) MXU contraction.
        # TODO(synk): when C_in < 128, pre-pack tap pairs in the wrapper so concat
        # boundaries stay 128-lane aligned (saves XLU lane shuffles).
        lhs = jnp.concatenate([tap_slice(k) for k in range(kernel_size)], axis=-1)
        acc = jnp.dot(lhs, w_ref[...], preferred_element_type=jnp.float32)
        o_ref[...] = (acc + shift_ref[...]).astype(o_ref.dtype)
    else:
        # Fallback: per-tap shallow dots accumulated in a VMEM scratch (bounded live range,
        # no vreg-file spill of a big register-carried accumulator).
        acc_ref = scratch[0]
        acc_ref[...] = jnp.dot(tap_slice(0), w_ref[pl.ds(0, c_in), :],
                               preferred_element_type=jnp.float32)
        for k in range(1, kernel_size):
            acc_ref[...] += jnp.dot(tap_slice(k), w_ref[pl.ds(k * c_in, c_in), :],
                                    preferred_element_type=jnp.float32)
        o_ref[...] = (acc_ref[...] + shift_ref[...]).astype(o_ref.dtype)


def unit_tcn_forward(x_nctv, w_kio, bias, gamma, beta, running_mean, running_var,
                     *, kernel_size=9, stride=1, eps=1e-5,
                     compute_dtype=jnp.bfloat16, out_dtype=jnp.bfloat16):
    """x_nctv: (N, C_in, T, V) as in PyTorch. Returns (N, C_out, T_out, V) in out_dtype."""
    n, c_in, t, v = x_nctv.shape
    k, _, c_out = w_kio.shape
    assert k == kernel_size
    assert kernel_size % 2 == 1, "unit_tcn 'same' padding assumes odd kernel_size"
    pad = (kernel_size - 1) // 2
    t_out = (t + 2 * pad - kernel_size) // stride + 1

    # ---- geometry -------------------------------------------------------------------
    v_pad = _round_up(v, 8)                         # sublane-aligned vertex axis
    tile_t = max(1, 1024 // v_pad)                  # ~1024 flattened rows per output tile
    tile_t = min(tile_t, t_out)
    t_out_pad = _round_up(t_out, tile_t)
    num_t_tiles = t_out_pad // tile_t
    phase_len = t_out_pad + (kernel_size - 1) // stride     # rows per stride-phase
    total_t = stride * phase_len
    back_pad = total_t - (t + pad)
    assert back_pad >= 0
    slab_rows = total_t * v_pad
    rows = tile_t * v_pad

    # ---- activations: NCHW -> channels-last, ONE merged zero-pad, flatten (T, V) -----
    x = jnp.transpose(x_nctv, (0, 2, 3, 1)).astype(compute_dtype)        # (N, T, V, C_in)
    x = jnp.pad(x, ((0, 0), (pad, back_pad), (0, v_pad - v), (0, 0)))    # single HBM pass
    if stride == 1:
        x = x.reshape(n, slab_rows, c_in)            # no copying transpose when stride == 1
    else:
        x = x.reshape(n, phase_len, stride, v_pad, c_in)
        x = jnp.transpose(x, (0, 2, 1, 3, 4))        # (N, stride, Lp, V_pad, C_in)
        x = x.reshape(n, slab_rows, c_in)
    # TODO(synk): keep NTVC/channels-last across network layers so the NCHW transposes on
    # entry/exit of this layer disappear; single-layer scope keeps the PyTorch layout here.

    # ---- params: fold BN scale into weights, conv bias + BN shift into one vector ----
    inv_std = 1.0 / jnp.sqrt(running_var.astype(jnp.float32) + eps)
    scale = gamma.astype(jnp.float32) * inv_std                           # (C_out,)
    shift = (beta.astype(jnp.float32)
             - running_mean.astype(jnp.float32) * scale
             + bias.astype(jnp.float32) * scale).reshape(1, c_out)
    w = (w_kio.astype(jnp.float32) * scale[None, None, :]).astype(compute_dtype)
    w = w.reshape(kernel_size * c_in, c_out)          # taps flattened for the fused dot

    # ---- VMEM budget: lane-padded block footprints, double buffers, headroom ---------
    lane = 128
    c_in_l = _round_up(c_in, lane)
    c_out_l = _round_up(c_out, lane)
    out_isz = jnp.dtype(out_dtype).itemsize
    vmem_est = (2 * slab_rows * c_in_l * 2                         # x slab, dbl-buffered bf16
                + 2 * _round_up(kernel_size * c_in, 16) * c_out_l * 2      # weights
                + 2 * 8 * c_out_l * 4                              # shift
                + 2 * rows * c_out_l * out_isz                     # output tile
                + rows * _round_up(kernel_size * c_in, lane) * 2   # im2col scratch
                + rows * c_out_l * 4                               # f32 accumulator
                + (4 << 20))                                       # headroom
    try:
        vmem_cap = int(pltpu.get_tpu_info().vmem_capacity_bytes)
    except Exception:
        vmem_cap = 64 << 20                                        # conservative (v7x)
    vmem_limit = max(vmem_est, 32 << 20)
    vmem_limit = min(vmem_limit, vmem_cap - (8 << 20))
    vmem_limit = int(max(vmem_limit, 16 << 20))
    # TODO(synk): very long T on v7x (64 MiB/TC) would need a tt-windowed x BlockSpec with a
    # (K-1)//stride halo instead of whole-slab VMEM residency.

    cost = pl.CostEstimate(
        flops=2 * n * t_out * v * c_in * c_out * kernel_size,
        transcendentals=0,
        bytes_accessed=int(x.size * x.dtype.itemsize + w.size * 2 + shift.size * 4
                           + n * t_out_pad * v_pad * c_out * out_isz))

    def run(fuse_taps):
        kernel = functools.partial(
            _unit_tcn_kernel, kernel_size=kernel_size, stride=stride,
            tile_t=tile_t, v_pad=v_pad, phase_len=phase_len, fuse_taps=fuse_taps)
        scratch = [] if fuse_taps else [pltpu.VMEM((rows, c_out), jnp.float32)]
        return pl.pallas_call(
            kernel,
            out_shape=jax.ShapeDtypeStruct((n, t_out_pad * v_pad, c_out), out_dtype),
            grid_spec=pltpu.PrefetchScalarGridSpec(
                num_scalar_prefetch=0,
                grid=(n, num_t_tiles),
                in_specs=[
                    # slab index independent of the T-tile axis -> VMEM-resident across tt
                    pl.BlockSpec((pl.Squeezed(), slab_rows, c_in),
                                 lambda i, tt: (i, 0, 0)),
                    pl.BlockSpec((kernel_size * c_in, c_out), lambda i, tt: (0, 0)),
                    pl.BlockSpec((1, c_out), lambda i, tt: (0, 0)),
                ],
                out_specs=pl.BlockSpec((pl.Squeezed(), rows, c_out),
                                       lambda i, tt: (i, tt, 0)),
                scratch_shapes=scratch,
            ),
            compiler_params=pltpu.CompilerParams(
                # batch axis "parallel": megacore shards distinct batches (no slab
                # duplication across TensorCores); T-tile axis sequential.
                dimension_semantics=("parallel", "arbitrary"),
                vmem_limit_bytes=vmem_limit),
            cost_estimate=cost,
        )(x, w, shift)

    try:
        out_flat = run(True)            # tap-fused single deep MXU contraction
    except Exception:
        out_flat = run(False)           # safe fallback: per-tap dots + VMEM accumulator

    out = out_flat.reshape(n, t_out_pad, v_pad, c_out)[:, :t_out, :v, :]
    return jnp.transpose(out, (0, 3, 1, 2))           # back to (N, C_out, T_out, V)


def _reference(x_nctv, w_kio, bias, gamma, beta, running_mean, running_var,
               *, kernel_size=9, stride=1, eps=1e-5, compute_dtype=jnp.bfloat16):
    # Pure-JAX reference mirroring the kernel's operand rounding (bf16 operands, folded BN,
    # f32 accumulation) so the comparison stays tight.
    c_out = w_kio.shape[2]
    pad = (kernel_size - 1) // 2
    inv_std = 1.0 / jnp.sqrt(running_var + eps)
    scale = gamma * inv_std
    shift = beta - running_mean * scale + bias * scale
    w = (w_kio * scale[None, None, :]).astype(compute_dtype).astype(jnp.float32)
    xr = x_nctv.astype(compute_dtype).astype(jnp.float32)
    w_oihw = jnp.transpose(w, (2, 1, 0))[:, :, :, None]                 # (C_out, C_in, K, 1)
    y = lax.conv_general_dilated(
        xr, w_oihw, window_strides=(stride, 1),
        padding=((pad, pad), (0, 0)),
        dimension_numbers=("NCHW", "OIHW", "NCHW"),
        preferred_element_type=jnp.float32)
    return y + shift.reshape(1, c_out, 1, 1)


if __name__ == "__main__":
    # Small shapes consistent with unit_tcn input (N, C_in, T, V)
    N, C_IN, C_OUT, T, V = 2, 4, 8, 16, 16
    K = 9

    key = jax.random.PRNGKey(0)
    kx, kw, kg, kb, km, kv = jax.random.split(key, 6)

    x = jax.random.normal(kx, (N, C_IN, T, V), dtype=jnp.float32)

    # conv: kaiming_normal_(mode='fan_out') -> std = sqrt(2 / (C_out*K*1)), bias = 0
    fan_out = C_OUT * K * 1
    std = (2.0 / fan_out) ** 0.5
    w_kio = jax.random.normal(kw, (K, C_IN, C_OUT), dtype=jnp.float32) * std
    bias = jnp.zeros((C_OUT,), jnp.float32)
    # bn_init(bn, 1): gamma=1, beta=0, running mean=0, var=1; mildly perturbed running stats
    # so the fused eval-mode BN affine path is actually exercised.
    gamma = 1.0 + 0.1 * jax.random.normal(kg, (C_OUT,), jnp.float32)
    beta = 0.1 * jax.random.normal(kb, (C_OUT,), jnp.float32)
    running_mean = 0.1 * jax.random.normal(km, (C_OUT,), jnp.float32)
    running_var = 1.0 + 0.1 * jax.random.uniform(kv, (C_OUT,), jnp.float32)
    # NOTE: BatchNorm is applied in eval/inference mode with running stats.
    # TODO(synk): training-mode BN (batch statistics + running-stat updates) not implemented.
    # (self.drop and self.relu exist on the module but are never used in forward -> omitted.)

    for stride in (1, 2):
        ref = _reference(x, w_kio, bias, gamma, beta, running_mean, running_var,
                         kernel_size=K, stride=stride)
        ref = jax.block_until_ready(ref)
        pad = (K - 1) // 2
        t_out = (T + 2 * pad - K) // stride + 1

        # Tight parity check with an f32 output epilogue.
        out32 = unit_tcn_forward(x, w_kio, bias, gamma, beta, running_mean, running_var,
                                 kernel_size=K, stride=stride, out_dtype=jnp.float32)
        out32 = jax.block_until_ready(out32)
        assert out32.shape == (N, C_OUT, t_out, V), out32.shape
        err32 = float(jnp.abs(out32 - ref).max())
        assert err32 < 2e-3, err32

        # Default perf path: bf16 output (half the writeback bytes).
        out16 = unit_tcn_forward(x, w_kio, bias, gamma, beta, running_mean, running_var,
                                 kernel_size=K, stride=stride)
        out16 = jax.block_until_ready(out16)
        assert out16.shape == (N, C_OUT, t_out, V), out16.shape
        assert out16.dtype == jnp.bfloat16
        err16 = float(jnp.abs(out16.astype(jnp.float32) - ref).max())
        assert err16 < 3e-2, err16

    print("KERNEL_OK")
</pallas_src>

<mosaic_0001>
module attributes {stable_mosaic.version = 11 : i64} {
  func.func @_unit_tcn_kernel(%arg0: i32, %arg1: i32, %arg2: memref<1x384x4xbf16, #tpu.memory_space<vmem>>, %arg3: memref<36x8xbf16, #tpu.memory_space<vmem>>, %arg4: memref<1x8xf32, #tpu.memory_space<vmem>>, %arg5: memref<1x256x8xf32, #tpu.memory_space<vmem>>) attributes {dimension_semantics = [#tpu.dimension_semantics<parallel>, #tpu.dimension_semantics<arbitrary>], iteration_bounds = array<i64: 2, 1>, scalar_prefetch = 0 : i64, scratch_operands = 0 : i64, tpu.core_type = #tpu.core_type<tc>, window_params = [{transform_indices = @transform_0, window_bounds = array<i64: 1, 384, 4>}, {pipeline_mode = #tpu.pipeline_mode<synchronous>, transform_indices = @transform_1, window_bounds = array<i64: 36, 8>}, {pipeline_mode = #tpu.pipeline_mode<synchronous>, transform_indices = @transform_2, window_bounds = array<i64: 1, 8>}, {transform_indices = @transform_3, window_bounds = array<i64: 1, 256, 8>}]} {
    %c16_i32 = arith.constant 16 : i32
    %0 = arith.muli %arg1, %c16_i32 : i32
    %c0_i32 = arith.constant 0 : i32
    %1 = arith.addi %c0_i32, %0 : i32
    %c0_i32_0 = arith.constant 0 : i32
    %2 = arith.addi %1, %c0_i32_0 : i32
    %c16_i32_1 = arith.constant 16 : i32
    %3 = arith.muli %2, %c16_i32_1 : i32
    %4 = tpu.assume_multiple %3, 8 : i32
    %c0 = arith.constant 0 : index
    %5 = arith.index_cast %4 : i32 to index
    %c0_2 = arith.constant 0 : index
    %6 = vector.load %arg2[%c0, %5, %c0_2] : memref<1x384x4xbf16, #tpu.memory_space<vmem>>, vector<1x256x4xbf16>
    %7 = vector.shape_cast %6 : vector<1x256x4xbf16> to vector<256x4xbf16>
    %c16_i32_3 = arith.constant 16 : i32
    %8 = arith.muli %arg1, %c16_i32_3 : i32
    %c0_i32_4 = arith.constant 0 : i32
    %9 = arith.addi %c0_i32_4, %8 : i32
    %c1_i32 = arith.constant 1 : i32
    %10 = arith.addi %9, %c1_i32 : i32
    %c16_i32_5 = arith.constant 16 : i32
    %11 = arith.muli %10, %c16_i32_5 : i32
    %12 = tpu.assume_multiple %11, 8 : i32
    %c0_6 = arith.constant 0 : index
    %13 = arith.index_cast %12 : i32 to index
    %c0_7 = arith.constant 0 : index
    %14 = vector.load %arg2[%c0_6, %13, %c0_7] : memref<1x384x4xbf16, #tpu.memory_space<vmem>>, vector<1x256x4xbf16>
    %15 = vector.shape_cast %14 : vector<1x256x4xbf16> to vector<256x4xbf16>
    %c16_i32_8 = arith.constant 16 : i32
    %16 = arith.muli %arg1, %c16_i32_8 : i32
    %c0_i32_9 = arith.constant 0 : i32
    %17 = arith.addi %c0_i32_9, %16 : i32
    %c2_i32 = arith.constant 2 : i32
    %18 = arith.addi %17, %c2_i32 : i32
    %c16_i32_10 = arith.constant 16 : i32
    %19 = arith.muli %18, %c16_i32_10 : i32
    %20 = tpu.assume_multiple %19, 8 : i32
    %c0_11 = arith.constant 0 : index
    %21 = arith.index_cast %20 : i32 to index
    %c0_12 = arith.constant 0 : index
    %22 = vector.load %arg2[%c0_11, %21, %c0_12] : memref<1x384x4xbf16, #tpu.memory_space<vmem>>, vector<1x256x4xbf16>
    %23 = vector.shape_cast %22 : vector<1x256x4xbf16> to vector<256x4xbf16>
    %c16_i32_13 = arith.constant 16 : i32
    %24 = arith.muli %arg1, %c16_i32_13 : i32
    %c0_i32_14 = arith.constant 0 : i32
    %25 = arith.addi %c0_i32_14, %24 : i32
    %c3_i32 = arith.constant 3 : i32
    %26 = arith.addi %25, %c3_i32 : i32
    %c16_i32_15 = arith.constant 16 : i32
    %27 = arith.muli %26, %c16_i32_15 : i32
    %28 = tpu.assume_multiple %27, 8 : i32
    %c0_16 = arith.constant 0 : index
    %29 = arith.index_cast %28 : i32 to index
    %c0_17 = arith.constant 0 : index
    %30 = vector.load %arg2[%c0_16, %29, %c0_17] : memref<1x384x4xbf16, #tpu.memory_space<vmem>>, vector<1x256x4xbf16>
    %31 = vector.shape_cast %30 : vector<1x256x4xbf16> to vector<256x4xbf16>
    %c16_i32_18 = arith.constant 16 : i32
    %32 = arith.muli %arg1, %c16_i32_18 : i32
    %c0_i32_19 = arith.constant 0 : i32
    %33 = arith.addi %c0_i32_19, %32 : i32
    %c4_i32 = arith.constant 4 : i32
    %34 = arith.addi %33, %c4_i32 : i32
    %c16_i32_20 = arith.constant 16 : i32
    %35 = arith.muli %34, %c16_i32_20 : i32
    %36 = tpu.assume_multiple %35, 8 : i32
    %c0_21 = arith.constant 0 : index
    %37 = arith.index_cast %36 : i32 to index
    %c0_22 = arith.constant 0 : index
    %38 = vector.load %arg2[%c0_21, %37, %c0_22] : memref<1x384x4xbf16, #tpu.memory_space<vmem>>, vector<1x256x4xbf16>
    %39 = vector.shape_cast %38 : vector<1x256x4xbf16> to vector<256x4xbf16>
    %c16_i32_23 = arith.constant 16 : i32
    %40 = arith.muli %arg1, %c16_i32_23 : i32
    %c0_i32_24 = arith.constant 0 : i32
    %41 = arith.addi %c0_i32_24, %40 : i32
    %c5_i32 = arith.constant 5 : i32
    %42 = arith.addi %41, %c5_i32 : i32
    %c16_i32_25 = arith.constant 16 : i32
    %43 = arith.muli %42, %c16_i32_25 : i32
    %44 = tpu.assume_multiple %43, 8 : i32
    %c0_26 = arith.constant 0 : index
    %45 = arith.index_cast %44 : i32 to index
    %c0_27 = arith.constant 0 : index
    %46 = vector.load %arg2[%c0_26, %45, %c0_27] : memref<1x384x4xbf16, #tpu.memory_space<vmem>>, vector<1x256x4xbf16>
    %47 = vector.shape_cast %46 : vector<1x256x4xbf16> to vector<256x4xbf16>
    %c16_i32_28 = arith.constant 16 : i32
    %48 = arith.muli %arg1, %c16_i32_28 : i32
    %c0_i32_29 = arith.constant 0 : i32
    %49 = arith.addi %c0_i32_29, %48 : i32
    %c6_i32 = arith.constant 6 : i32
    %50 = arith.addi %49, %c6_i32 : i32
    %c16_i32_30 = arith.constant 16 : i32
    %51 = arith.muli %50, %c16_i32_30 : i32
    %52 = tpu.assume_multiple %51, 8 : i32
    %c0_31 = arith.constant 0 : index
    %53 = arith.index_cast %52 : i32 to index
    %c0_32 = arith.constant 0 : index
    %54 = vector.load %arg2[%c0_31, %53, %c0_32] : memref<1x384x4xbf16, #tpu.memory_space<vmem>>, vector<1x256x4xbf16>
    %55 = vector.shape_cast %54 : vector<1x256x4xbf16> to vector<256x4xbf16>
    %c16_i32_33 = arith.constant 16 : i32
    %56 = arith.muli %arg1, %c16_i32_33 : i32
    %c0_i32_34 = arith.constant 0 : i32
    %57 = arith.addi %c0_i32_34, %56 : i32
    %c7_i32 = arith.constant 7 : i32
    %58 = arith.addi %57, %c7_i32 : i32
    %c16_i32_35 = arith.constant 16 : i32
    %59 = arith.muli %58, %c16_i32_35 : i32
    %60 = tpu.assume_multiple %59, 8 : i32
    %c0_36 = arith.constant 0 : index
    %61 = arith.index_cast %60 : i32 to index
    %c0_37 = arith.constant 0 : index
    %62 = vector.load %arg2[%c0_36, %61, %c0_37] : memref<1x384x4xbf16, #tpu.memory_space<vmem>>, vector<1x256x4xbf16>
    %63 = vector.shape_cast %62 : vector<1x256x4xbf16> to vector<256x4xbf16>
    %c16_i32_38 = arith.constant 16 : i32
    %64 = arith.muli %arg1, %c16_i32_38 : i32
    %c0_i32_39 = arith.constant 0 : i32
    %65 = arith.addi %c0_i32_39, %64 : i32
    %c8_i32 = arith.constant 8 : i32
    %66 = arith.addi %65, %c8_i32 : i32
    %c16_i32_40 = arith.constant 16 : i32
    %67 = arith.muli %66, %c16_i32_40 : i32
    %68 = tpu.assume_multiple %67, 8 : i32
    %c0_41 = arith.constant 0 : index
    %69 = arith.index_cast %68 : i32 to index
    %c0_42 = arith.constant 0 : index
    %70 = vector.load %arg2[%c0_41, %69, %c0_42] : memref<1x384x4xbf16, #tpu.memory_space<vmem>>, vector<1x256x4xbf16>
    %71 = vector.shape_cast %70 : vector<1x256x4xbf16> to vector<256x4xbf16>
    %72 = tpu.concatenate %7, %15, %23, %31, %39, %47, %55, %63, %71 in 1 : vector<256x4xbf16>, vector<256x4xbf16>, vector<256x4xbf16>, vector<256x4xbf16>, vector<256x4xbf16>, vector<256x4xbf16>, vector<256x4xbf16>, vector<256x4xbf16>, vector<256x4xbf16> -> vector<256x36xbf16>
    %c0_43 = arith.constant 0 : index
    %c0_44 = arith.constant 0 : index
    %73 = vector.load %arg3[%c0_43, %c0_44] : memref<36x8xbf16, #tpu.memory_space<vmem>>, vector<36x8xbf16>
    %cst = arith.constant dense<0.000000e+00> : vector<256x8xf32>
    %74 = tpu.matmul %72, %73, %cst {dimension_numbers = #tpu.dot_dimension_numbers<[1], [0], [0], [1], [0, 0, 1, 1], [], []>} : vector<256x36xbf16>, vector<36x8xbf16>, vector<256x8xf32> -> vector<256x8xf32>
    %c0_45 = arith.constant 0 : index
    %c0_46 = arith.constant 0 : index
    %75 = vector.load %arg4[%c0_45, %c0_46] : memref<1x8xf32, #tpu.memory_space<vmem>>, vector<1x8xf32>
    %76 = vector.broadcast %75 : vector<1x8xf32> to vector<256x8xf32>
    %77 = arith.addf %74, %76 : vector<256x8xf32>
    %c0_47 = arith.constant 0 : index
    %c0_48 = arith.constant 0 : index
    %c0_49 = arith.constant 0 : index
    %78 = vector.load %arg5[%c0_47, %c0_48, %c0_49] : memref<1x256x8xf32, #tpu.memory_space<vmem>>, vector<1x256x8xf32>
    %79 = vector.shape_cast %78 : vector<1x256x8xf32> to vector<256x8xf32>
    %80 = vector.shape_cast %77 : vector<256x8xf32> to vector<1x256x8xf32>
    tpu.vector_store %arg5[%c0_47, %c0_48, %c0_49], %80 {strides = array<i32>} : memref<1x256x8xf32, #tpu.memory_space<vmem>>, vector<1x256x8xf32>,
    return
  }
  func.func @transform_0(%arg0: i32, %arg1: i32) -> (i32, i32, i32) {
    %c0_i32 = arith.constant 0 : i32
    %c0_i32_0 = arith.constant 0 : i32
    %c0_i32_1 = arith.constant 0 : i32
    return %arg0, %c0_i32, %c0_i32_0 : i32, i32, i32
  }
  func.func @transform_1(%arg0: i32, %arg1: i32) -> (i32, i32) {
    %c0_i32 = arith.constant 0 : i32
    %c0_i32_0 = arith.constant 0 : i32
    %c0_i32_1 = arith.constant 0 : i32
    return %c0_i32, %c0_i32_0 : i32, i32
  }
  func.func @transform_2(%arg0: i32, %arg1: i32) -> (i32, i32) {
    %c0_i32 = arith.constant 0 : i32
    %c0_i32_0 = arith.constant 0 : i32
    %c0_i32_1 = arith.constant 0 : i32
    return %c0_i32, %c0_i32_0 : i32, i32
  }
  func.func @transform_3(%arg0: i32, %arg1: i32) -> (i32, i32, i32) {
    %c0_i32 = arith.constant 0 : i32
    %c0_i32_0 = arith.constant 0 : i32
    return %arg0, %arg1, %c0_i32 : i32, i32, i32
  }
}

module attributes {stable_mosaic.version = 11 : i64} {
  func.func @_unit_tcn_kernel(%arg0: i32, %arg1: i32, %arg2: memref<1x384x4xbf16, #tpu.memory_space<vmem>>, %arg3: memref<36x8xbf16, #tpu.memory_space<vmem>>, %arg4: memref<1x8xf32, #tpu.memory_space<vmem>>, %arg5: memref<1x256x8xf32, #tpu.memory_space<vmem>>, %arg6: memref<256x8xf32, #tpu.memory_space<vmem>>) attributes {dimension_semantics = [#tpu.dimension_semantics<parallel>, #tpu.dimension_semantics<arbitrary>], iteration_bounds = array<i64: 2, 1>, scalar_prefetch = 0 : i64, scratch_operands = 1 : i64, tpu.core_type = #tpu.core_type<tc>, window_params = [{transform_indices = @transform_0, window_bounds = array<i64: 1, 384, 4>}, {pipeline_mode = #tpu.pipeline_mode<synchronous>, transform_indices = @transform_1, window_bounds = array<i64: 36, 8>}, {pipeline_mode = #tpu.pipeline_mode<synchronous>, transform_indices = @transform_2, window_bounds = array<i64: 1, 8>}, {transform_indices = @transform_3, window_bounds = array<i64: 1, 256, 8>}]} {
    %c16_i32 = arith.constant 16 : i32
    %0 = arith.muli %arg1, %c16_i32 : i32
    %c0_i32 = arith.constant 0 : i32
    %1 = arith.addi %c0_i32, %0 : i32
    %c0_i32_0 = arith.constant 0 : i32
    %2 = arith.addi %1, %c0_i32_0 : i32
    %c16_i32_1 = arith.constant 16 : i32
    %3 = arith.muli %2, %c16_i32_1 : i32
    %4 = tpu.assume_multiple %3, 8 : i32
    %c0 = arith.constant 0 : index
    %5 = arith.index_cast %4 : i32 to index
    %c0_2 = arith.constant 0 : index
    %6 = vector.load %arg2[%c0, %5, %c0_2] : memref<1x384x4xbf16, #tpu.memory_space<vmem>>, vector<1x256x4xbf16>
    %7 = vector.shape_cast %6 : vector<1x256x4xbf16> to vector<256x4xbf16>
    %c0_3 = arith.constant 0 : index
    %c0_4 = arith.constant 0 : index
    %8 = vector.load %arg3[%c0_3, %c0_4] : memref<36x8xbf16, #tpu.memory_space<vmem>>, vector<4x8xbf16>
    %cst = arith.constant dense<0.000000e+00> : vector<256x8xf32>
    %9 = tpu.matmul %7, %8, %cst {dimension_numbers = #tpu.dot_dimension_numbers<[1], [0], [0], [1], [0, 0, 1, 1], [], []>} : vector<256x4xbf16>, vector<4x8xbf16>, vector<256x8xf32> -> vector<256x8xf32>
    %c0_5 = arith.constant 0 : index
    %c0_6 = arith.constant 0 : index
    %10 = vector.load %arg6[%c0_5, %c0_6] : memref<256x8xf32, #tpu.memory_space<vmem>>, vector<256x8xf32>
    tpu.vector_store %arg6[%c0_5, %c0_6], %9 {strides = array<i32>} : memref<256x8xf32, #tpu.memory_space<vmem>>, vector<256x8xf32>,
    %c0_7 = arith.constant 0 : index
    %c0_8 = arith.constant 0 : index
    %11 = vector.load %arg6[%c0_7, %c0_8] : memref<256x8xf32, #tpu.memory_space<vmem>>, vector<256x8xf32>
    %c16_i32_9 = arith.constant 16 : i32
    %12 = arith.muli %arg1, %c16_i32_9 : i32
    %c0_i32_10 = arith.constant 0 : i32
    %13 = arith.addi %c0_i32_10, %12 : i32
    %c1_i32 = arith.constant 1 : i32
    %14 = arith.addi %13, %c1_i32 : i32
    %c16_i32_11 = arith.constant 16 : i32
    %15 = arith.muli %14, %c16_i32_11 : i32
    %16 = tpu.assume_multiple %15, 8 : i32
    %c0_12 = arith.constant 0 : index
    %17 = arith.index_cast %16 : i32 to index
    %c0_13 = arith.constant 0 : index
    %18 = vector.load %arg2[%c0_12, %17, %c0_13] : memref<1x384x4xbf16, #tpu.memory_space<vmem>>, vector<1x256x4xbf16>
    %19 = vector.shape_cast %18 : vector<1x256x4xbf16> to vector<256x4xbf16>
    %c4 = arith.constant 4 : index
    %c0_14 = arith.constant 0 : index
    %20 = vector.load %arg3[%c4, %c0_14] : memref<36x8xbf16, #tpu.memory_space<vmem>>, vector<4x8xbf16>
    %cst_15 = arith.constant dense<0.000000e+00> : vector<256x8xf32>
    %21 = tpu.matmul %19, %20, %cst_15 {dimension_numbers = #tpu.dot_dimension_numbers<[1], [0], [0], [1], [0, 0, 1, 1], [], []>} : vector<256x4xbf16>, vector<4x8xbf16>, vector<256x8xf32> -> vector<256x8xf32>
    %22 = arith.addf %11, %21 : vector<256x8xf32>
    %c0_16 = arith.constant 0 : index
    %c0_17 = arith.constant 0 : index
    %23 = vector.load %arg6[%c0_16, %c0_17] : memref<256x8xf32, #tpu.memory_space<vmem>>, vector<256x8xf32>
    tpu.vector_store %arg6[%c0_16, %c0_17], %22 {strides = array<i32>} : memref<256x8xf32, #tpu.memory_space<vmem>>, vector<256x8xf32>,
    %c0_18 = arith.constant 0 : index
    %c0_19 = arith.constant 0 : index
    %24 = vector.load %arg6[%c0_18, %c0_19] : memref<256x8xf32, #tpu.memory_space<vmem>>, vector<256x8xf32>
    %c16_i32_20 = arith.constant 16 : i32
    %25 = arith.muli %arg1, %c16_i32_20 : i32
    %c0_i32_21 = arith.constant 0 : i32
    %26 = arith.addi %c0_i32_21, %25 : i32
    %c2_i32 = arith.constant 2 : i32
    %27 = arith.addi %26, %c2_i32 : i32
    %c16_i32_22 = arith.constant 16 : i32
    %28 = arith.muli %27, %c16_i32_22 : i32
    %29 = tpu.assume_multiple %28, 8 : i32
    %c0_23 = arith.constant 0 : index
    %30 = arith.index_cast %29 : i32 to index
    %c0_24 = arith.constant 0 : index
    %31 = vector.load %arg2[%c0_23, %30, %c0_24] : memref<1x384x4xbf16, #tpu.memory_space<vmem>>, vector<1x256x4xbf16>
    %32 = vector.shape_cast %31 : vector<1x256x4xbf16> to vector<256x4xbf16>
    %c8 = arith.constant 8 : index
    %c0_25 = arith.constant 0 : index
    %33 = vector.load %arg3[%c8, %c0_25] : memref<36x8xbf16, #tpu.memory_space<vmem>>, vector<4x8xbf16>
    %cst_26 = arith.constant dense<0.000000e+00> : vector<256x8xf32>
    %34 = tpu.matmul %32, %33, %cst_26 {dimension_numbers = #tpu.dot_dimension_numbers<[1], [0], [0], [1], [0, 0, 1, 1], [], []>} : vector<256x4xbf16>, vector<4x8xbf16>, vector<256x8xf32> -> vector<256x8xf32>
    %35 = arith.addf %24, %34 : vector<256x8xf32>
    %c0_27 = arith.constant 0 : index
    %c0_28 = arith.constant 0 : index
    %36 = vector.load %arg6[%c0_27, %c0_28] : memref<256x8xf32, #tpu.memory_space<vmem>>, vector<256x8xf32>
    tpu.vector_store %arg6[%c0_27, %c0_28], %35 {strides = array<i32>} : memref<256x8xf32, #tpu.memory_space<vmem>>, vector<256x8xf32>,
    %c0_29 = arith.constant 0 : index
    %c0_30 = arith.constant 0 : index
    %37 = vector.load %arg6[%c0_29, %c0_30] : memref<256x8xf32, #tpu.memory_space<vmem>>, vector<256x8xf32>
    %c16_i32_31 = arith.constant 16 : i32
    %38 = arith.muli %arg1, %c16_i32_31 : i32
    %c0_i32_32 = arith.constant 0 : i32
    %39 = arith.addi %c0_i32_32, %38 : i32
    %c3_i32 = arith.constant 3 : i32
    %40 = arith.addi %39, %c3_i32 : i32
    %c16_i32_33 = arith.constant 16 : i32
    %41 = arith.muli %40, %c16_i32_33 : i32
    %42 = tpu.assume_multiple %41, 8 : i32
    %c0_34 = arith.constant 0 : index
    %43 = arith.index_cast %42 : i32 to index
    %c0_35 = arith.constant 0 : index
    %44 = vector.load %arg2[%c0_34, %43, %c0_35] : memref<1x384x4xbf16, #tpu.memory_space<vmem>>, vector<1x256x4xbf16>
    %45 = vector.shape_cast %44 : vector<1x256x4xbf16> to vector<256x4xbf16>
    %c12 = arith.constant 12 : index
    %c0_36 = arith.constant 0 : index
    %46 = vector.load %arg3[%c12, %c0_36] : memref<36x8xbf16, #tpu.memory_space<vmem>>, vector<4x8xbf16>
    %cst_37 = arith.constant dense<0.000000e+00> : vector<256x8xf32>
    %47 = tpu.matmul %45, %46, %cst_37 {dimension_numbers = #tpu.dot_dimension_numbers<[1], [0], [0], [1], [0, 0, 1, 1], [], []>} : vector<256x4xbf16>, vector<4x8xbf16>, vector<256x8xf32> -> vector<256x8xf32>
    %48 = arith.addf %37, %47 : vector<256x8xf32>
    %c0_38 = arith.constant 0 : index
    %c0_39 = arith.constant 0 : index
    %49 = vector.load %arg6[%c0_38, %c0_39] : memref<256x8xf32, #tpu.memory_space<vmem>>, vector<256x8xf32>
    tpu.vector_store %arg6[%c0_38, %c0_39], %48 {strides = array<i32>} : memref<256x8xf32, #tpu.memory_space<vmem>>, vector<256x8xf32>,
    %c0_40 = arith.constant 0 : index
    %c0_41 = arith.constant 0 : index
    %50 = vector.load %arg6[%c0_40, %c0_41] : memref<256x8xf32, #tpu.memory_space<vmem>>, vector<256x8xf32>
    %c16_i32_42 = arith.constant 16 : i32
    %51 = arith.muli %arg1, %c16_i32_42 : i32
    %c0_i32_43 = arith.constant 0 : i32
    %52 = arith.addi %c0_i32_43, %51 : i32
    %c4_i32 = arith.constant 4 : i32
    %53 = arith.addi %52, %c4_i32 : i32
    %c16_i32_44 = arith.constant 16 : i32
    %54 = arith.muli %53, %c16_i32_44 : i32
    %55 = tpu.assume_multiple %54, 8 : i32
    %c0_45 = arith.constant 0 : index
    %56 = arith.index_cast %55 : i32 to index
    %c0_46 = arith.constant 0 : index
    %57 = vector.load %arg2[%c0_45, %56, %c0_46] : memref<1x384x4xbf16, #tpu.memory_space<vmem>>, vector<1x256x4xbf16>
    %58 = vector.shape_cast %57 : vector<1x256x4xbf16> to vector<256x4xbf16>
    %c16 = arith.constant 16 : index
    %c0_47 = arith.constant 0 : index
    %59 = vector.load %arg3[%c16, %c0_47] : memref<36x8xbf16, #tpu.memory_space<vmem>>, vector<4x8xbf16>
    %cst_48 = arith.constant dense<0.000000e+00> : vector<256x8xf32>
    %60 = tpu.matmul %58, %59, %cst_48 {dimension_numbers = #tpu.dot_dimension_numbers<[1], [0], [0], [1], [0, 0, 1, 1], [], []>} : vector<256x4xbf16>, vector<4x8xbf16>, vector<256x8xf32> -> vector<256x8xf32>
    %61 = arith.addf %50, %60 : vector<256x8xf32>
    %c0_49 = arith.constant 0 : index
    %c0_50 = arith.constant 0 : index
    %62 = vector.load %arg6[%c0_49, %c0_50] : memref<256x8xf32, #tpu.memory_space<vmem>>, vector<256x8xf32>
    tpu.vector_store %arg6[%c0_49, %c0_50], %61 {strides = array<i32>} : memref<256x8xf32, #tpu.memory_space<vmem>>, vector<256x8xf32>,
    %c0_51 = arith.constant 0 : index
    %c0_52 = arith.constant 0 : index
    %63 = vector.load %arg6[%c0_51, %c0_52] : memref<256x8xf32, #tpu.memory_space<vmem>>, vector<256x8xf32>
    %c16_i32_53 = arith.constant 16 : i32
    %64 = arith.muli %arg1, %c16_i32_53 : i32
    %c0_i32_54 = arith.constant 0 : i32
    %65 = arith.addi %c0_i32_54, %64 : i32
    %c5_i32 = arith.constant 5 : i32
    %66 = arith.addi %65, %c5_i32 : i32
    %c16_i32_55 = arith.constant 16 : i32
    %67 = arith.muli %66, %c16_i32_55 : i32
    %68 = tpu.assume_multiple %67, 8 : i32
    %c0_56 = arith.constant 0 : index
    %69 = arith.index_cast %68 : i32 to index
    %c0_57 = arith.constant 0 : index
    %70 = vector.load %arg2[%c0_56, %69, %c0_57] : memref<1x384x4xbf16, #tpu.memory_space<vmem>>, vector<1x256x4xbf16>
    %71 = vector.shape_cast %70 : vector<1x256x4xbf16> to vector<256x4xbf16>
    %c20 = arith.constant 20 : index
    %c0_58 = arith.constant 0 : index
    %72 = vector.load %arg3[%c20, %c0_58] : memref<36x8xbf16, #tpu.memory_space<vmem>>, vector<4x8xbf16>
    %cst_59 = arith.constant dense<0.000000e+00> : vector<256x8xf32>
    %73 = tpu.matmul %71, %72, %cst_59 {dimension_numbers = #tpu.dot_dimension_numbers<[1], [0], [0], [1], [0, 0, 1, 1], [], []>} : vector<256x4xbf16>, vector<4x8xbf16>, vector<256x8xf32> -> vector<256x8xf32>
    %74 = arith.addf %63, %73 : vector<256x8xf32>
    %c0_60 = arith.constant 0 : index
    %c0_61 = arith.constant 0 : index
    %75 = vector.load %arg6[%c0_60, %c0_61] : memref<256x8xf32, #tpu.memory_space<vmem>>, vector<256x8xf32>
    tpu.vector_store %arg6[%c0_60, %c0_61], %74 {strides = array<i32>} : memref<256x8xf32, #tpu.memory_space<vmem>>, vector<256x8xf32>,
    %c0_62 = arith.constant 0 : index
    %c0_63 = arith.constant 0 : index
    %76 = vector.load %arg6[%c0_62, %c0_63] : memref<256x8xf32, #tpu.memory_space<vmem>>, vector<256x8xf32>
    %c16_i32_64 = arith.constant 16 : i32
    %77 = arith.muli %arg1, %c16_i32_64 : i32
    %c0_i32_65 = arith.constant 0 : i32
    %78 = arith.addi %c0_i32_65, %77 : i32
    %c6_i32 = arith.constant 6 : i32
    %79 = arith.addi %78, %c6_i32 : i32
    %c16_i32_66 = arith.constant 16 : i32
    %80 = arith.muli %79, %c16_i32_66 : i32
    %81 = tpu.assume_multiple %80, 8 : i32
    %c0_67 = arith.constant 0 : index
    %82 = arith.index_cast %81 : i32 to index
    %c0_68 = arith.constant 0 : index
    %83 = vector.load %arg2[%c0_67, %82, %c0_68] : memref<1x384x4xbf16, #tpu.memory_space<vmem>>, vector<1x256x4xbf16>
    %84 = vector.shape_cast %83 : vector<1x256x4xbf16> to vector<256x4xbf16>
    %c24 = arith.constant 24 : index
    %c0_69 = arith.constant 0 : index
    %85 = vector.load %arg3[%c24, %c0_69] : memref<36x8xbf16, #tpu.memory_space<vmem>>, vector<4x8xbf16>
    %cst_70 = arith.constant dense<0.000000e+00> : vector<256x8xf32>
    %86 = tpu.matmul %84, %85, %cst_70 {dimension_numbers = #tpu.dot_dimension_numbers<[1], [0], [0], [1], [0, 0, 1, 1], [], []>} : vector<256x4xbf16>, vector<4x8xbf16>, vector<256x8xf32> -> vector<256x8xf32>
    %87 = arith.addf %76, %86 : vector<256x8xf32>
    %c0_71 = arith.constant 0 : index
    %c0_72 = arith.constant 0 : index
    %88 = vector.load %arg6[%c0_71, %c0_72] : memref<256x8xf32, #tpu.memory_space<vmem>>, vector<256x8xf32>
    tpu.vector_store %arg6[%c0_71, %c0_72], %87 {strides = array<i32>} : memref<256x8xf32, #tpu.memory_space<vmem>>, vector<256x8xf32>,
    %c0_73 = arith.constant 0 : index
    %c0_74 = arith.constant 0 : index
    %89 = vector.load %arg6[%c0_73, %c0_74] : memref<256x8xf32, #tpu.memory_space<vmem>>, vector<256x8xf32>
    %c16_i32_75 = arith.constant 16 : i32
    %90 = arith.muli %arg1, %c16_i32_75 : i32
    %c0_i32_76 = arith.constant 0 : i32
    %91 = arith.addi %c0_i32_76, %90 : i32
    %c7_i32 = arith.constant 7 : i32
    %92 = arith.addi %91, %c7_i32 : i32
    %c16_i32_77 = arith.constant 16 : i32
    %93 = arith.muli %92, %c16_i32_77 : i32
    %94 = tpu.assume_multiple %93, 8 : i32
    %c0_78 = arith.constant 0 : index
    %95 = arith.index_cast %94 : i32 to index
    %c0_79 = arith.constant 0 : index
    %96 = vector.load %arg2[%c0_78, %95, %c0_79] : memref<1x384x4xbf16, #tpu.memory_space<vmem>>, vector<1x256x4xbf16>
    %97 = vector.shape_cast %96 : vector<1x256x4xbf16> to vector<256x4xbf16>
    %c28 = arith.constant 28 : index
    %c0_80 = arith.constant 0 : index
    %98 = vector.load %arg3[%c28, %c0_80] : memref<36x8xbf16, #tpu.memory_space<vmem>>, vector<4x8xbf16>
    %cst_81 = arith.constant dense<0.000000e+00> : vector<256x8xf32>
    %99 = tpu.matmul %97, %98, %cst_81 {dimension_numbers = #tpu.dot_dimension_numbers<[1], [0], [0], [1], [0, 0, 1, 1], [], []>} : vector<256x4xbf16>, vector<4x8xbf16>, vector<256x8xf32> -> vector<256x8xf32>
    %100 = arith.addf %89, %99 : vector<256x8xf32>
    %c0_82 = arith.constant 0 : index
    %c0_83 = arith.constant 0 : index
    %101 = vector.load %arg6[%c0_82, %c0_83] : memref<256x8xf32, #tpu.memory_space<vmem>>, vector<256x8xf32>
    tpu.vector_store %arg6[%c0_82, %c0_83], %100 {strides = array<i32>} : memref<256x8xf32, #tpu.memory_space<vmem>>, vector<256x8xf32>,
    %c0_84 = arith.constant 0 : index
    %c0_85 = arith.constant 0 : index
    %102 = vector.load %arg6[%c0_84, %c0_85] : memref<256x8xf32, #tpu.memory_space<vmem>>, vector<256x8xf32>
    %c16_i32_86 = arith.constant 16 : i32
    %103 = arith.muli %arg1, %c16_i32_86 : i32
    %c0_i32_87 = arith.constant 0 : i32
    %104 = arith.addi %c0_i32_87, %103 : i32
    %c8_i32 = arith.constant 8 : i32
    %105 = arith.addi %104, %c8_i32 : i32
    %c16_i32_88 = arith.constant 16 : i32
    %106 = arith.muli %105, %c16_i32_88 : i32
    %107 = tpu.assume_multiple %106, 8 : i32
    %c0_89 = arith.constant 0 : index
    %108 = arith.index_cast %107 : i32 to index
    %c0_90 = arith.constant 0 : index
    %109 = vector.load %arg2[%c0_89, %108, %c0_90] : memref<1x384x4xbf16, #tpu.memory_space<vmem>>, vector<1x256x4xbf16>
    %110 = vector.shape_cast %109 : vector<1x256x4xbf16> to vector<256x4xbf16>
    %c32 = arith.constant 32 : index
    %c0_91 = arith.constant 0 : index
    %111 = vector.load %arg3[%c32, %c0_91] : memref<36x8xbf16, #tpu.memory_space<vmem>>, vector<4x8xbf16>
    %cst_92 = arith.constant dense<0.000000e+00> : vector<256x8xf32>
    %112 = tpu.matmul %110, %111, %cst_92 {dimension_numbers = #tpu.dot_dimension_numbers<[1], [0], [0], [1], [0, 0, 1, 1], [], []>} : vector<256x4xbf16>, vector<4x8xbf16>, vector<256x8xf32> -> vector<256x8xf32>
    %113 = arith.addf %102, %112 : vector<256x8xf32>
    %c0_93 = arith.constant 0 : index
    %c0_94 = arith.constant 0 : index
    %114 = vector.load %arg6[%c0_93, %c0_94] : memref<256x8xf32, #tpu.memory_space<vmem>>, vector<256x8xf32>
    tpu.vector_store %arg6[%c0_93, %c0_94], %113 {strides = array<i32>} : memref<256x8xf32, #tpu.memory_space<vmem>>, vector<256x8xf32>,
    %c0_95 = arith.constant 0 : index
    %c0_96 = arith.constant 0 : index
    %115 = vector.load %arg6[%c0_95, %c0_96] : memref<256x8xf32, #tpu.memory_space<vmem>>, vector<256x8xf32>
    %c0_97 = arith.constant 0 : index
    %c0_98 = arith.constant 0 : index
    %116 = vector.load %arg4[%c0_97, %c0_98] : memref<1x8xf32, #tpu.memory_space<vmem>>, vector<1x8xf32>
    %117 = vector.broadcast %116 : vector<1x8xf32> to vector<256x8xf32>
    %118 = arith.addf %115, %117 : vector<256x8xf32>
    %c0_99 = arith.constant 0 : index
    %c0_100 = arith.constant 0 : index
    %c0_101 = arith.constant 0 : index
    %119 = vector.load %arg5[%c0_99, %c0_100, %c0_101] : memref<1x256x8xf32, #tpu.memory_space<vmem>>, vector<1x256x8xf32>
    %120 = vector.shape_cast %119 : vector<1x256x8xf32> to vector<256x8xf32>
    %121 = vector.shape_cast %118 : vector<256x8xf32> to vector<1x256x8xf32>
    tpu.vector_store %arg5[%c0_99, %c0_100, %c0_101], %121 {strides = array<i32>} : memref<1x256x8xf32, #tpu.memory_space<vmem>>, vector<1x256x8xf32>,
    return
  }
  func.func @transform_0(%arg0: i32, %arg1: i32) -> (i32, i32, i32) {
    %c0_i32 = arith.constant 0 : i32
    %c0_i32_0 = arith.constant 0 : i32
    %c0_i32_1 = arith.constant 0 : i32
    return %arg0, %c0_i32, %c0_i32_0 : i32, i32, i32
  }
  func.func @transform_1(%arg0: i32, %arg1: i32) -> (i32, i32) {
    %c0_i32 = arith.constant 0 : i32
    %c0_i32_0 = arith.constant 0 : i32
    %c0_i32_1 = arith.constant 0 : i32
    return %c0_i32, %c0_i32_0 : i32, i32
  }
  func.func @transform_2(%arg0: i32, %arg1: i32) -> (i32, i32) {
    %c0_i32 = arith.constant 0 : i32
    %c0_i32_0 = arith.constant 0 : i32
    %c0_i32_1 = arith.constant 0 : i32
    return %c0_i32, %c0_i32_0 : i32, i32
  }
  func.func @transform_3(%arg0: i32, %arg1: i32) -> (i32, i32, i32) {
    %c0_i32 = arith.constant 0 : i32
    %c0_i32_0 = arith.constant 0 : i32
    return %arg0, %arg1, %c0_i32 : i32, i32, i32
  }
}

</mosaic_0001>

<bundles_post_ra>
// kernel: tpu_custom_call.1
= control target key start
LH: loop header
LB: loop body
LE: loop exit
PB: predicated region body
PF: predicated region fallthrough
CT: control target
= control target key end

     0   :  { %s3182_s12 = smov 0   ;;  %s3184_s13 = smov 0   ;;  %s3878_s0 = inlined_call_operand.vmem [shape: bf16[2,384,4], index: 0, kind: input, shape index: {}]   ;;  %s3879_s1 = inlined_call_operand.vmem [shape: bf16[36,8], index: 1, kind: input, shape index: {}]   ;;  %s3880_s2 = inlined_call_operand.vmem [shape: f32[1,8], index: 2, kind: input, shape index: {}]   ;;  %s3881_s3 = inlined_call_operand.vmem [shape: f32[2,256,8], index: 3, kind: output, shape index: {}]  }
   0x1   :  { %s3186_s14 = smov 0  }
   0x2 LB: > { %s25_s15 = sadd.s32 1, %s3148_s13  ;;  %p2078_p0 = scmp.ge.s32.totalorder %s3152_s14, 1  ;;  %s3152_s14 = sphi %s3186_s14, %s13_s14   ;;  %s3148_s13 = sphi %s3184_s13, %s3883_s13   ;;  %s3144_s12 = sphi %s3182_s12, %s3882_s12  }
   0x3   : > { %p27_p1 = scmp.ge.s32.totalorder %s25_s15, 2  ;;  %p151_p2 = scmp.lt.s32.totalorder %s3152_s14, 3 }
   0x5   : > { %s3885_s15 = smov (%p27_p1, %s25_s15), 0  ;;  %p152_p3 = pnand %p2078_p0, %p151_p2 }
   0x6   : > { %p179_p4 = scmp.lt.s32.totalorder (!%p152_p3), %s3144_s12, 1  ;;  %s3154_s20 = smov (!%p152_p3), 4  }
   0x7   : > { %155 = sbr.rel (%p152_p3) target bundleno = 607 (0x25f), region = 32  ;;  %s3155_s21 = smov (!%p152_p3), 8  }
   0x8   : > { %s3156_s22 = smov (!%p152_p3), 12   ;;  %s3157_s23 = smov (!%p152_p3), 16  }
   0x9   : > { %s3158_s24 = smov (!%p152_p3), 20   ;;  %s3159_s25 = smov (!%p152_p3), 28  }
   0xa   : > { %s3160_s26 = smov (!%p152_p3), 24   ;;  %s3161_s27 = smov (!%p152_p3), 32  }
   0xc   : > { %s3887_s12 = smov (!%p179_p4, %s3144_s12), 1  ;;  %vm1562_vm0 = vcmask 64512   ;;  %vm1513_vm1 = vcmask 31744   ;;  %vm1595_vm2 = vcmask 97280   ;;  %vm1850_vm3 = vcmask 1041408  }
   0xd   : > { %s3096_s16 = smul.u32 192, %s3887_s12  ;;  %vm1628_vm4 = vcmask 130048   ;;  %vm1661_vm5 = vcmask 162816   ;;  %vm1694_vm6 = vcmask 195584   ;;  %vm1727_vm7 = vcmask 228352   ;;  %s2940_s7 = sshll.u32 %s3887_s12, 8 }
   0xe   : > { %vm1760_vm8 = vcmask 261120   ;;  %vm1817_vm9 = vcmask 293888  }
   0xf   : > { %s3206_s19 = scalar_lea.vmem %s3878_s0, %s3096_s16  ;;  %s3743_s16 = scalar_lea.vmem %s3881_s3, %s2940_s7 }
  0x10   : > { %v2961_v0 = vld [vmem:[%s3206_s19 + $0x28] sm:$0xff]  ;;  %v2959_v1 = vld [vmem:[%s3206_s19 + $0x18] sm:$0xff]  ;;  %v2962_v3 = vld [vmem:[%s3206_s19 + $0x30] sm:$0xff] }
  0x11   : > { %v2957_v2 = vld [vmem:[%s3206_s19 + $0x8] sm:$0xff]  ;;  %705 = vrot.lane.b32.xlu2 %v2961_v0, %s3154_s20  ;;  %701 = vrot.lane.b32.xlu1 %v2959_v1, %s3154_s20  ;;  %v2960_v4 = vld [vmem:[%s3206_s19 + $0x20] sm:$0xff] }
  0x12   : > { %697 = vrot.lane.b32.xlu0 %v2957_v2, %s3154_s20  ;;  %v2958_v5 = vld [vmem:[%s3206_s19 + $0x10] sm:$0xff]  ;;  %v2965_v6 = vld [vmem:[%s3206_s19 + $0x48] sm:$0xff]  ;;  %v2964_v7 = vld [vmem:[%s3206_s19 + $0x40] sm:$0xff] }
  0x13   : > { %v2963_v8 = vld [vmem:[%s3206_s19 + $0x38] sm:$0xff]  ;;  %v2968_v9 = vld [vmem:[%s3206_s19 + $0x60] sm:$0xff]  ;;  %v2966_v11 = vld [vmem:[%s3206_s19 + $0x50] sm:$0xff] }
  0x14   : > { %v2967_v10 = vld [vmem:[%s3206_s19 + $0x58] sm:$0xff]  ;;  %v2970_v13 = vld [vmem:[%s3206_s19 + $0x70] sm:$0xff]  ;;  %v2969_v14 = vld [vmem:[%s3206_s19 + $0x68] sm:$0xff] }
  0x15   : > { %v2971_v12 = vld [vmem:[%s3206_s19 + $0x78] sm:$0xff]  ;;  %v2973_v16 = vld [vmem:[%s3206_s19 + $0x10] sm:$0xff]  ;;  %v2972_v17 = vld [vmem:[%s3206_s19 + $0x80] sm:$0xff] }
  0x16   : > { %v2974_v15 = vld [vmem:[%s3206_s19 + $0x18] sm:$0xff]  ;;  %v2977_v18 = vld [vmem:[%s3206_s19 + $0x30] sm:$0xff]  ;;  %v2976_v19 = vld [vmem:[%s3206_s19 + $0x28] sm:$0xff] }
  0x17   : > { %v2975_v20 = vld [vmem:[%s3206_s19 + $0x20] sm:$0xff]  ;;  %v2980_v21 = vld [vmem:[%s3206_s19 + $0x48] sm:$0xff]  ;;  %v2978_v23 = vld [vmem:[%s3206_s19 + $0x38] sm:$0xff] }
  0x18   : > { %v2979_v22 = vld [vmem:[%s3206_s19 + $0x40] sm:$0xff]  ;;  %v2982_v25 = vld [vmem:[%s3206_s19 + $0x58] sm:$0xff]  ;;  %v2981_v26 = vld [vmem:[%s3206_s19 + $0x50] sm:$0xff] }
  0x19   : > { %707 = vrot.lane.b32.xlu2 %v2962_v3, %s3154_s20  ;;  %703 = vrot.lane.b32.xlu1 %v2960_v4, %s3154_s20  ;;  %v2983_v24 = vld [vmem:[%s3206_s19 + $0x60] sm:$0xff]  ;;  %v2986_v27 = vld [vmem:[%s3206_s19 + $0x78] sm:$0xff] }
  0x1a   : > { %699 = vrot.lane.b32.xlu0 %v2958_v5, %s3154_s20  ;;  %v2985_v28 = vld [vmem:[%s3206_s19 + $0x70] sm:$0xff]  ;;  %v2984_v29 = vld [vmem:[%s3206_s19 + $0x68] sm:$0xff]  ;;  %v2989_v30 = vld [vmem:[%s3206_s19 + $0x18] sm:$0xff] }
  0x1b   : > { %v2988_v31 = vld [vmem:[%s3206_s19 + $0x88] sm:$0xff]  ;;  %v2987_v32 = vld [vmem:[%s3206_s19 + $0x80] sm:$0xff]  ;;  %v2992_v33 = vld [vmem:[%s3206_s19 + $0x30] sm:$0xff] }
  0x1c   : > { %v2991_v34 = vld [vmem:[%s3206_s19 + $0x28] sm:$0xff]  ;;  %v2990_v35 = vld [vmem:[%s3206_s19 + $0x20] sm:$0xff]  ;;  %v2993_v39 = vld [vmem:[%s3206_s19 + $0x38] sm:$0xff] }
  0x1d   : > { %v2995_v37 = vld [vmem:[%s3206_s19 + $0x48] sm:$0xff]  ;;  %v2994_v38 = vld [vmem:[%s3206_s19 + $0x40] sm:$0xff]  ;;  %v2997_v42 = vld [vmem:[%s3206_s19 + $0x58] sm:$0xff] }
  0x1e   : > { %v2998_v41 = vld [vmem:[%s3206_s19 + $0x60] sm:$0xff]  ;;  %v2996_v43 = vld [vmem:[%s3206_s19 + $0x50] sm:$0xff]  ;;  %v3001_v45 = vld [vmem:[%s3206_s19 + $0x78] sm:$0xff] }
  0x1f   : > { %v3000_v46 = vld [vmem:[%s3206_s19 + $0x70] sm:$0xff]  ;;  %v2999_v47 = vld [vmem:[%s3206_s19 + $0x68] sm:$0xff]  ;;  %v3002_v53 = vld [vmem:[%s3206_s19 + $0x80] sm:$0xff] }
  0x20   : > { %v3004_v51 = vld [vmem:[%s3206_s19 + $0x90] sm:$0xff]  ;;  %v3003_v52 = vld [vmem:[%s3206_s19 + $0x88] sm:$0xff]  ;;  %v3013_v57 = vld [vmem:[%s3206_s19 + $0x60] sm:$0xff] }
  0x21   : > { %713 = vrot.lane.b32.xlu2 %v2965_v6, %s3154_s20  ;;  %711 = vrot.lane.b32.xlu1 %v2964_v7, %s3154_s20  ;;  %v3006_v58 = vld [vmem:[%s3206_s19 + $0x28] sm:$0xff]  ;;  %v3005_v59 = vld [vmem:[%s3206_s19 + $0x20] sm:$0xff] }
  0x22   : > { %709 = vrot.lane.b32.xlu0 %v2963_v8, %s3154_s20  ;;  %v2942_v60 = vld [vmem:[%s3206_s19 + $0x8] sm:$0xff]  ;;  %v3017_v4 = vld [vmem:[%s3206_s19 + $0x80] sm:$0xff] }
  0x23   : > { %v3033_v2 = vld [vmem:[%s3206_s19 + $0x88] sm:$0xff]  ;;  %v2945_v5 = vld [vmem:[%s3206_s19 + $0x20] sm:$0xff] }
  0x24   : > { %v3029_v3 = vld [vmem:[%s3206_s19 + $0x68] sm:$0xff] }
  0x29   : > { %719 = vrot.lane.b32.xlu2 %v2968_v9, %s3154_s20  ;;  %717 = vrot.lane.b32.xlu1 %v2967_v10, %s3154_s20 }
  0x2a   : > { %715 = vrot.lane.b32.xlu0 %v2966_v11, %s3154_s20  ;;  %v3061_v11 = vld [vmem:[%s3206_s19 + $0x78] sm:$0xff] }
  0x31   : > { %725 = vrot.lane.b32.xlu2 %v2971_v12, %s3154_s20  ;;  %723 = vrot.lane.b32.xlu1 %v2970_v13, %s3154_s20  ;;  %v3049_v12 = vld [vmem:[%s3206_s19 + $0x90] sm:$0xff] }
  0x32   : > { %721 = vrot.lane.b32.xlu0 %v2969_v14, %s3154_s20  ;;  %v3045_v13 = vld [vmem:[%s3206_s19 + $0x70] sm:$0xff]  ;;  %v2948_v14 = vld [vmem:[%s3206_s19 + $0x38] sm:$0xff] }
  0x39   : > { %811 = vrot.lane.b32.xlu2 %v2974_v15, %s3155_s21  ;;  %809 = vrot.lane.b32.xlu1 %v2973_v16, %s3155_s21 }
  0x3a   : > { %727 = vrot.lane.b32.xlu0 %v2972_v17, %s3154_s20 }
  0x41   : > { %817 = vrot.lane.b32.xlu2 %v2977_v18, %s3155_s21  ;;  %815 = vrot.lane.b32.xlu1 %v2976_v19, %s3155_s21 }
  0x42   : > { %813 = vrot.lane.b32.xlu0 %v2975_v20, %s3155_s21  ;;  %v3081_v20 = vld [vmem:[%s3206_s19 + $0xa0] sm:$0xff] }
  0x49   : > { %823 = vrot.lane.b32.xlu2 %v2980_v21, %s3155_s21  ;;  %821 = vrot.lane.b32.xlu1 %v2979_v22, %s3155_s21  ;;  %v3077_v21 = vld [vmem:[%s3206_s19 + $0x80] sm:$0xff]  ;;  %v3065_v22 = vld [vmem:[%s3206_s19 + $0x98] sm:$0xff] }
  0x4a   : > { %819 = vrot.lane.b32.xlu0 %v2978_v23, %s3155_s21  ;;  %v2941_v23 = vld [vmem:[%s3206_s19] sm:$0xff] }
  0x51   : > { %829 = vrot.lane.b32.xlu2 %v2983_v24, %s3155_s21  ;;  %827 = vrot.lane.b32.xlu1 %v2982_v25, %s3155_s21  ;;  %v2951_v24 = vld [vmem:[%s3206_s19 + $0x50] sm:$0xff] }
  0x52   : > { %825 = vrot.lane.b32.xlu0 %v2981_v26, %s3155_s21 }
  0x59   : > { %835 = vrot.lane.b32.xlu2 %v2986_v27, %s3155_s21  ;;  %833 = vrot.lane.b32.xlu1 %v2985_v28, %s3155_s21 }
  0x5a   : > { %831 = vrot.lane.b32.xlu0 %v2984_v29, %s3155_s21 }
  0x61   : > { %921 = vrot.lane.b32.xlu2 %v2989_v30, %s3156_s22  ;;  %839 = vrot.lane.b32.xlu1 %v2988_v31, %s3155_s21 }
  0x62   : > { %837 = vrot.lane.b32.xlu0 %v2987_v32, %s3155_s21  ;;  %v3025_v32 = vld [vmem:[%s3206_s19 + $0x48] sm:$0xff] }
  0x69   : > { %927 = vrot.lane.b32.xlu2 %v2992_v33, %s3156_s22  ;;  %925 = vrot.lane.b32.xlu1 %v2991_v34, %s3156_s22  ;;  %v3021_v33 = vld [vmem:[%s3206_s19 + $0x28] sm:$0xff]  ;;  %v3009_v34 = vld [vmem:[%s3206_s19 + $0x40] sm:$0xff] }
  0x6a   : > { %923 = vrot.lane.b32.xlu0 %v2990_v35, %s3156_s22  ;;  %v2944_v35 = vld [vmem:[%s3206_s19 + $0x18] sm:$0xff] }
  0x6b   : > { %v706_v36 = vpop.permute.xlu2 %705 }
  0x6c   : > { %v1528_v6 = vsel %vm1513_vm1, %v2945_v5, %v706_v36  ;;  %v2954_v36 = vld [vmem:[%s3206_s19 + $0x68] sm:$0xff]  ;;  %v2949_v5 = vld [vmem:[%s3206_s19 + $0x40] sm:$0xff] }
  0x71   : > { %933 = vrot.lane.b32.xlu2 %v2995_v37, %s3156_s22  ;;  %931 = vrot.lane.b32.xlu1 %v2994_v38, %s3156_s22  ;;  %v2943_v37 = vld [vmem:[%s3206_s19 + $0x10] sm:$0xff] }
  0x72   : > { %929 = vrot.lane.b32.xlu0 %v2993_v39, %s3156_s22 }
  0x73   : > { %v3286_v40 = vpop.permute.xlu2 %707 }
  0x79   : > { %939 = vrot.lane.b32.xlu2 %v2998_v41, %s3156_s22  ;;  %937 = vrot.lane.b32.xlu1 %v2997_v42, %s3156_s22 }
  0x7a   : > { %935 = vrot.lane.b32.xlu0 %v2996_v43, %s3156_s22 }
  0x7b   : > { %v3294_v44 = vpop.permute.xlu2 %713 }
  0x81   : > { %945 = vrot.lane.b32.xlu2 %v3001_v45, %s3156_s22  ;;  %943 = vrot.lane.b32.xlu1 %v3000_v46, %s3156_s22 }
  0x82   : > { %941 = vrot.lane.b32.xlu0 %v2999_v47, %s3156_s22 }
  0x83   : > { %v3302_v48 = vpop.permute.xlu2 %719  ;;  %v3304_v49 = vpop.permute.xlu1 %701 }
  0x84   : > { %v698_v50 = vpop.permute.xlu0 %697  ;;  %v1522_v43 = vsel %vm1513_vm1, %v2943_v37, %v3304_v49 }
  0x85   : > { %v1516_v25 = vsel %vm1513_vm1, %v2941_v23, %v698_v50 }
  0x89   : > { %951 = vrot.lane.b32.xlu2 %v3004_v51, %s3156_s22  ;;  %949 = vrot.lane.b32.xlu1 %v3003_v52, %s3156_s22  ;;  %v3053_v51 = vld [vmem:[%s3206_s19 + $0x38] sm:$0xff]  ;;  %v3041_v52 = vld [vmem:[%s3206_s19 + $0x50] sm:$0xff] }
  0x8a   : > { %947 = vrot.lane.b32.xlu0 %v3002_v53, %s3156_s22  ;;  %v3037_v53 = vld [vmem:[%s3206_s19 + $0x30] sm:$0xff] }
  0x8b   : > { %v3312_v54 = vpop.permute.xlu2 %725  ;;  %v3314_v55 = vpop.permute.xlu1 %703 }
  0x8c   : > { %v700_v56 = vpop.permute.xlu0 %699  ;;  %v1525_v38 = vsel %vm1513_vm1, %v2944_v35, %v3314_v55  ;;  %v2947_v55 = vld [vmem:[%s3206_s19 + $0x30] sm:$0xff] }
  0x8d   : > { %v1519_v61 = vsel %vm1513_vm1, %v2942_v60, %v700_v56  ;;  %v2946_v56 = vld [vmem:[%s3206_s19 + $0x28] sm:$0xff] }
  0x91   : > { %1049 = vrot.lane.b32.xlu2 %v3013_v57, %s3157_s23  ;;  %1035 = vrot.lane.b32.xlu1 %v3006_v58, %s3157_s23 }
  0x92   : > { %1033 = vrot.lane.b32.xlu0 %v3005_v59, %s3157_s23  ;;  %v1531_v59 = vsel %vm1513_vm1, %v2946_v56, %v3286_v40  ;;  %v3082_v56 = vld [vmem:[%s3206_s19 + $0xa8] sm:$0xff] }
  0x93   : > { %v812_v62 = vpop.permute.xlu2 %811  ;;  %v712_v63 = vpop.permute.xlu1 %711 }
  0x94   : > { %v3325_v0 = vsel %vm1562_vm0, %v1519_v61, %v812_v62  ;;  %v3327_v1 = vpop.permute.xlu0 %709  ;;  %v1537_v15 = vsel %vm1513_vm1, %v2948_v14, %v712_v63 }
  0x95   : > { %v1534_v49 = vsel %vm1513_vm1, %v2947_v55, %v3327_v1  ;;  %v2950_v1 = vld [vmem:[%s3206_s19 + $0x48] sm:$0xff] }
  0x96   : > { %v3010_v55 = vld [vmem:[%s3206_s19 + $0x48] sm:$0xff] }
  0x99   : > { %1169 = vrot.lane.b32.xlu2 %v3033_v2, %s3158_s24  ;;  %1161 = vrot.lane.b32.xlu1 %v3029_v3, %s3158_s24  ;;  %v3073_v2 = vld [vmem:[%s3206_s19 + $0x60] sm:$0xff] }
  0x9a   : > { %1057 = vrot.lane.b32.xlu0 %v3017_v4, %s3157_s23  ;;  %v3069_v3 = vld [vmem:[%s3206_s19 + $0x40] sm:$0xff]  ;;  %v3057_v4 = vld [vmem:[%s3206_s19 + $0x58] sm:$0xff] }
  0x9b   : > { %v818_v7 = vpop.permute.xlu2 %817  ;;  %v718_v8 = vpop.permute.xlu1 %717 }
  0x9c   : > { %v3338_v9 = vsel %vm1562_vm0, %v1528_v6, %v818_v7  ;;  %v3340_v10 = vpop.permute.xlu0 %715  ;;  %v1546_v26 = vsel %vm1513_vm1, %v2951_v24, %v718_v8  ;;  %v1540_v8 = vsel %vm1513_vm1, %v2949_v5, %v3294_v44  ;;  %v3058_v5 = vld [vmem:[%s3206_s19 + $0x60] sm:$0xff] }
  0x9d   : > { %v1543_v40 = vsel %vm1513_vm1, %v2950_v1, %v3340_v10  ;;  %v2953_v10 = vld [vmem:[%s3206_s19 + $0x60] sm:$0xff] }
  0xa1   : > { %1385 = vrot.lane.b32.xlu2 %v3061_v11, %s3159_s25  ;;  %1281 = vrot.lane.b32.xlu1 %v3049_v12, %s3160_s26 }
  0xa2   : > { %1273 = vrot.lane.b32.xlu0 %v3045_v13, %s3160_s26 }
  0xa3   : > { %v824_v16 = vpop.permute.xlu2 %823  ;;  %v724_v17 = vpop.permute.xlu1 %723 }
  0xa4   : > { %v3351_v18 = vsel %vm1562_vm0, %v1537_v15, %v824_v16  ;;  %v3353_v19 = vpop.permute.xlu0 %721  ;;  %v1555_v39 = vsel %vm1513_vm1, %v2954_v36, %v724_v17  ;;  %v3030_v15 = vld [vmem:[%s3206_s19 + $0x70] sm:$0xff]  ;;  %v3018_v16 = vld [vmem:[%s3206_s19 + $0x88] sm:$0xff] }
  0xa5   : > { %v3014_v17 = vld [vmem:[%s3206_s19 + $0x68] sm:$0xff]  ;;  %v1552_v44 = vsel %vm1513_vm1, %v2953_v10, %v3353_v19  ;;  %v3034_v19 = vld [vmem:[%s3206_s19 + $0x90] sm:$0xff] }
  0xa6   : > { %v3019_v10 = vld [vmem:[%s3206_s19 + $0x90] sm:$0xff] }
  0xa9   : > { %1505 = vrot.lane.b32.xlu2 %v3081_v20, %s3161_s27  ;;  %1497 = vrot.lane.b32.xlu1 %v3077_v21, %s3161_s27  ;;  %v2952_v20 = vld [vmem:[%s3206_s19 + $0x58] sm:$0xff] }
  0xaa   : > { %1393 = vrot.lane.b32.xlu0 %v3065_v22, %s3159_s25  ;;  %v1549_v23 = vsel %vm1513_vm1, %v2952_v20, %v3302_v48  ;;  %v3015_v20 = vld [vmem:[%s3206_s19 + $0x70] sm:$0xff] }
  0xab   : > { %v830_v27 = vpop.permute.xlu2 %829  ;;  %v810_v28 = vpop.permute.xlu1 %809 }
  0xac   : > { %v3366_v29 = vsel %vm1562_vm0, %v1546_v26, %v830_v27  ;;  %v1564_v30 = vsel %vm1562_vm0, %v1516_v25, %v810_v28  ;;  %v3369_v31 = vpop.permute.xlu0 %727  ;;  %v3050_v28 = vld [vmem:[%s3206_s19 + $0x98] sm:$0xff] }
  0xb1   : > { %1153 = vrot.lane.b32.xlu2 %v3025_v32, %s3158_s24  ;;  %1145 = vrot.lane.b32.xlu1 %v3021_v33, %s3158_s24  ;;  %v2956_v32 = vld [vmem:[%s3206_s19 + $0x78] sm:$0xff]  ;;  %v2955_v33 = vld [vmem:[%s3206_s19 + $0x70] sm:$0xff] }
  0xb2   : > { %1041 = vrot.lane.b32.xlu0 %v3009_v34, %s3157_s23  ;;  %v1561_v48 = vsel %vm1513_vm1, %v2956_v32, %v3369_v31  ;;  %v1558_v36 = vsel %vm1513_vm1, %v2955_v33, %v3312_v54  ;;  %v3062_v31 = vld [vmem:[%s3206_s19 + $0x80] sm:$0xff]  ;;  %v3031_v32 = vld [vmem:[%s3206_s19 + $0x78] sm:$0xff] }
  0xb3   : > { %v836_v41 = vpop.permute.xlu2 %835  ;;  %v816_v42 = vpop.permute.xlu1 %815 }
  0xb4   : > { %v3386_v45 = vsel %vm1562_vm0, %v1555_v39, %v836_v41  ;;  %v1570_v46 = vsel %vm1562_vm0, %v1525_v38, %v816_v42  ;;  %v814_v47 = vpop.permute.xlu0 %813  ;;  %v3078_v42 = vld [vmem:[%s3206_s19 + $0x88] sm:$0xff] }
  0xb5   : > { %v3390_v50 = vsel %vm1562_vm0, %v1522_v43, %v814_v47  ;;  %v3066_v43 = vld [vmem:[%s3206_s19 + $0xa0] sm:$0xff] }
  0xb9   : > { %1369 = vrot.lane.b32.xlu2 %v3053_v51, %s3159_s25  ;;  %1265 = vrot.lane.b32.xlu1 %v3041_v52, %s3160_s26 }
  0xba   : > { %1257 = vrot.lane.b32.xlu0 %v3037_v53, %s3160_s26  ;;  %v3022_v53 = vld [vmem:[%s3206_s19 + $0x30] sm:$0xff] }
  0xbb   : > { %v922_v57 = vpop.permute.xlu2 %921  ;;  %v822_v58 = vpop.permute.xlu1 %821 }
  0xbc   : > { %v3405_v60 = vsel %vm1595_vm2, %v1564_v30, %v922_v57  ;;  %v1576_v61 = vsel %vm1562_vm0, %v1534_v49, %v822_v58  ;;  %v820_v62 = vpop.permute.xlu0 %819  ;;  %v3046_v30 = vld [vmem:[%s3206_s19 + $0x78] sm:$0xff] }
  0xbd   : > { %v3409_v63 = vsel %vm1562_vm0, %v1531_v59, %v820_v62  ;;  %v3038_v62 = vld [vmem:[%s3206_s19 + $0x38] sm:$0xff] }
  0xc1   : > { %1489 = vrot.lane.b32.xlu2 %v3073_v2, %s3161_s27  ;;  %1481 = vrot.lane.b32.xlu1 %v3069_v3, %s3161_s27  ;;  %v3026_v2 = vld [vmem:[%s3206_s19 + $0x50] sm:$0xff] }
  0xc2   : > { %1377 = vrot.lane.b32.xlu0 %v3057_v4, %s3159_s25 }
  0xc3   : > { %v928_v6 = vpop.permute.xlu2 %927  ;;  %v828_v7 = vpop.permute.xlu1 %827 }
  0xc4   : > { %v3424_v11 = vsel %vm1595_vm2, %v1570_v46, %v928_v6  ;;  %v1582_v12 = vsel %vm1562_vm0, %v1543_v40, %v828_v7  ;;  %v826_v13 = vpop.permute.xlu0 %825  ;;  %v1797_v40 = vld [vmem:[%s3879_s1 + $0x10] sm:$0x3]  ;;  %v3054_v6 = vld [vmem:[%s3206_s19 + $0x40] sm:$0xff] }
  0xc5   : > { %v3428_v14 = vsel %vm1562_vm0, %v1540_v8, %v826_v13  ;;  %v1811_v7 = vunpack.c.l.b16 %v1797_v40 }
  0xc7   : > { %v1814_v8 = vpack.c.b16 %v1811_v7, %v1811_v7  ;;  %v3043_v7 = vld [vmem:[%s3206_s19 + $0x60] sm:$0xff] }
  0xc9   : > { %1163 = vrot.lane.b32.xlu2 %v3030_v15, %s3158_s24  ;;  %1059 = vrot.lane.b32.xlu1 %v3018_v16, %s3157_s23 }
  0xca   : > { %1051 = vrot.lane.b32.xlu0 %v3014_v17, %s3157_s23 }
  0xcb   : > { %v934_v21 = vpop.permute.xlu2 %933  ;;  %v834_v22 = vpop.permute.xlu1 %833 }
  0xcc   : > { %v3443_v24 = vsel %vm1595_vm2, %v1576_v61, %v934_v21  ;;  %v3446_v25 = vsel %vm1562_vm0, %v1552_v44, %v834_v22  ;;  %v832_v26 = vpop.permute.xlu0 %831  ;;  %v3042_v61 = vld [vmem:[%s3206_s19 + $0x58] sm:$0xff]  ;;  %v3086_v44 = vld [vmem:[%s3879_s1 + $0x8] sm:$0xff] }
  0xcd   : > { %v3449_v27 = vsel %vm1562_vm0, %v1549_v23, %v832_v26  ;;  %v3074_v21 = vld [vmem:[%s3206_s19 + $0x68] sm:$0xff] }
  0xd1   : > { %1283 = vrot.lane.b32.xlu2 %v3050_v28, %s3160_s26  ;;  %1275 = vrot.lane.b32.xlu1 %v3046_v30, %s3160_s26  ;;  %v3047_v30 = vld [vmem:[%s3206_s19 + $0x80] sm:$0xff] }
  0xd2   : > { %1171 = vrot.lane.b32.xlu0 %v3034_v19, %s3158_s24  ;;  %v3035_v19 = vld [vmem:[%s3206_s19 + $0x98] sm:$0xff] }
  0xd3   : > { %v940_v34 = vpop.permute.xlu2 %939  ;;  %v840_v35 = vpop.permute.xlu1 %839 }
  0xd4   : > { %v3464_v37 = vsel %vm1595_vm2, %v1582_v12, %v940_v34  ;;  %v1594_v38 = vsel %vm1562_vm0, %v1561_v48, %v840_v35  ;;  %v838_v39 = vpop.permute.xlu0 %837  ;;  %v3067_v35 = vld [vmem:[%s3206_s19 + $0xa8] sm:$0xff] }
  0xd5   : > { %v3468_v41 = vsel %vm1562_vm0, %v1558_v36, %v838_v39  ;;  %v3063_v36 = vld [vmem:[%s3206_s19 + $0x88] sm:$0xff] }
  0xd9   : > { %1499 = vrot.lane.b32.xlu2 %v3078_v42, %s3161_s27  ;;  %1395 = vrot.lane.b32.xlu1 %v3066_v43, %s3159_s25  ;;  %v3007_v43 = vld [vmem:[%s3206_s19 + $0x30] sm:$0xff] }
  0xda   : > { %1387 = vrot.lane.b32.xlu0 %v3062_v31, %s3159_s25  ;;  %v3083_v31 = vld [vmem:[%s3206_s19 + $0xb0] sm:$0xff] }
  0xdb   : > { %v3476_v54 = vpop.permute.xlu2 %945  ;;  %v926_v46 = vpop.permute.xlu1 %925 }
  0xdc   : > { %v3480_v47 = vsel %vm1595_vm2, %v3390_v50, %v926_v46  ;;  %v924_v51 = vpop.permute.xlu0 %923  ;;  %v3079_v46 = vld [vmem:[%s3206_s19 + $0x90] sm:$0xff] }
  0xdd   : > { %v3484_v52 = vsel %vm1595_vm2, %v3325_v0, %v924_v51 }
  0xe1   : > { %1147 = vrot.lane.b32.xlu2 %v3022_v53, %s3158_s24  ;;  %1043 = vrot.lane.b32.xlu1 %v3010_v55, %s3157_s23 }
  0xe2   : > { %1507 = vrot.lane.b32.xlu0 %v3082_v56, %s3161_s27  ;;  %v3027_v56 = vld [vmem:[%s3206_s19 + $0x58] sm:$0xff] }
  0xe3   : > { %v952_v49 = vpop.permute.xlu2 %951  ;;  %v932_v50 = vpop.permute.xlu1 %931 }
  0xe4   : > { %v3493_v57 = vsel %vm1595_vm2, %v1594_v38, %v952_v49  ;;  %v3497_v0 = vsel %vm1595_vm2, %v3409_v63, %v932_v50  ;;  %v930_v58 = vpop.permute.xlu0 %929  ;;  %v3051_v38 = vld [vmem:[%s3206_s19 + $0xa0] sm:$0xff]  ;;  %v3023_v49 = vld [vmem:[%s3206_s19 + $0x38] sm:$0xff] }
  0xe5   : > { %v3501_v59 = vsel %vm1595_vm2, %v3338_v9, %v930_v58  ;;  %v3070_v9 = vld [vmem:[%s3206_s19 + $0x48] sm:$0xff]  ;;  %v3011_v58 = vld [vmem:[%s3206_s19 + $0x50] sm:$0xff] }
  0xe9   : > { %1267 = vrot.lane.b32.xlu2 %v3042_v61, %s3160_s26  ;;  %1259 = vrot.lane.b32.xlu1 %v3038_v62, %s3160_s26  ;;  %v1621_v61 = vsel %vm1595_vm2, %v3446_v25, %v3476_v54 }
  0xea   : > { %1155 = vrot.lane.b32.xlu0 %v3026_v2, %s3158_s24 }
  0xeb   : > { %v3509_v3 = vpop.permute.xlu2 %1049  ;;  %v3511_v4 = vpop.permute.xlu1 %937 }
  0xec   : > { %v936_v63 = vpop.permute.xlu0 %935  ;;  %v1613_v51 = vsel %vm1595_vm2, %v3428_v14, %v3511_v4 }
  0xed   : > { %v3515_v1 = vsel %vm1595_vm2, %v3351_v18, %v936_v63  ;;  %v1852_v18 = vsel %vm1850_vm3, %v1814_v8, 0  ;;  %v1646_v50 = vsel %vm1628_vm4, %v1613_v51, %v3509_v3 }
  0xee   : > { %3088 = vmatpush.bf16.msra.mxu2 %v1852_v18  ;;  %3089 = vmatpush.bf16.msra.mxu3 %v1852_v18 }
  0xef   : > { %1859 = vmatpush.bf16.msra.mxu0 %v1852_v18  ;;  %3087 = vmatpush.bf16.msra.mxu1 %v1852_v18  ;;  %v3039_v18 = vld [vmem:[%s3206_s19 + $0x40] sm:$0xff] }
  0xf1   : > { %1483 = vrot.lane.b32.xlu2 %v3070_v9, %s3161_s27  ;;  %1379 = vrot.lane.b32.xlu1 %v3058_v5, %s3159_s25 }
  0xf2   : > { %1371 = vrot.lane.b32.xlu0 %v3054_v6, %s3159_s25  ;;  %3091 = vmatpush.bf16.msra.mxu2 %v3086_v44  ;;  %v3055_v6 = vld [vmem:[%s3206_s19 + $0x48] sm:$0xff] }
  0xf3   : > { %v3526_v12 = vpop.permute.xlu2 %1169  ;;  %v944_v13 = vpop.permute.xlu1 %943  ;;  %3092 = vmatpush.bf16.msra.mxu3 %v3086_v44  ;;  %1860 = vmatpush.bf16.msra.mxu0 %v3086_v44 }
  0xf4   : > { %v3530_v15 = vsel %vm1595_vm2, %v3449_v27, %v944_v13  ;;  %v942_v16 = vpop.permute.xlu0 %941  ;;  %3090 = vmatpush.bf16.msra.mxu1 %v3086_v44  ;;  %v3059_v44 = vld [vmem:[%s3206_s19 + $0x68] sm:$0xff] }
  0xf5   : > { %v3534_v17 = vsel %vm1595_vm2, %v3366_v29, %v942_v16  ;;  %v3085_v29 = vld [vmem:[%s3879_s1] sm:$0xff] }
  0xf6   : > { %3094 = vmatpush.bf16.msra.mxu2 %v3085_v29 }
  0xf7   : > { %3095 = vmatpush.bf16.msra.mxu3 %v3085_v29  ;;  %1861 = vmatpush.bf16.msra.mxu0 %v3085_v29 }
  0xf8   : > { %3093 = vmatpush.bf16.msra.mxu1 %v3085_v29 }
  0xf9   : > { %1061 = vrot.lane.b32.xlu2 %v3019_v10, %s3157_s23  ;;  %1053 = vrot.lane.b32.xlu1 %v3015_v20, %s3157_s23  ;;  %v3075_v10 = vld [vmem:[%s3206_s19 + $0x70] sm:$0xff] }
  0xfa   : > { %1491 = vrot.lane.b32.xlu0 %v3074_v21, %s3161_s27  ;;  %v3071_v20 = vld [vmem:[%s3206_s19 + $0x50] sm:$0xff] }
  0xfb   : > { %v1386_v22 = vpop.permute.xlu2 %1385  ;;  %v950_v23 = vpop.permute.xlu1 %949 }
  0xfc   : > { %v3550_v26 = vsel %vm1595_vm2, %v3468_v41, %v950_v23  ;;  %v948_v27 = vpop.permute.xlu0 %947  ;;  %v3032_v23 = vld [vmem:[%s3206_s19 + $0x80] sm:$0xff] }
  0xfd   : > { %v3554_v28 = vsel %vm1595_vm2, %v3386_v45, %v948_v27  ;;  %v3020_v27 = vld [vmem:[%s3206_s19 + $0x98] sm:$0xff] }
 0x101   : > { %1277 = vrot.lane.b32.xlu2 %v3047_v30, %s3160_s26  ;;  %1173 = vrot.lane.b32.xlu1 %v3035_v19, %s3158_s24  ;;  %v3016_v19 = vld [vmem:[%s3206_s19 + $0x78] sm:$0xff] }
 0x102   : > { %1165 = vrot.lane.b32.xlu0 %v3031_v32, %s3158_s24 }
 0x103   : > { %v1506_v33 = vpop.permute.xlu2 %1505  ;;  %v1036_v48 = vpop.permute.xlu1 %1035 }
 0x104   : > { %v3564_v34 = vsel %vm1628_vm4, %v3484_v52, %v1036_v48  ;;  %v3566_v45 = vpop.permute.xlu0 %1033 }
 0x105   : > { %v1630_v30 = vsel %vm1628_vm4, %v3405_v60, %v3566_v45 }
 0x109   : > { %1397 = vrot.lane.b32.xlu2 %v3067_v35, %s3159_s25  ;;  %1389 = vrot.lane.b32.xlu1 %v3063_v36, %s3159_s25 }
 0x10a   : > { %1285 = vrot.lane.b32.xlu0 %v3051_v38, %s3160_s26 }
 0x10b   : > { %v3574_v39 = vpop.permute.xlu2 %1153  ;;  %v1162_v41 = vpop.permute.xlu1 %1161 }
 0x10c   : > { %v1058_v42 = vpop.permute.xlu0 %1057  ;;  %v1679_v62 = vsel %vm1661_vm5, %v1646_v50, %v1162_v41 }
 0x10d   : > { %v1654_v2 = vsel %vm1628_vm4, %v1621_v61, %v1058_v42 }
 0x10e   : > { %v1687_v25 = vsel %vm1661_vm5, %v1654_v2, %v3526_v12  ;;  %v3008_v2 = vld [vmem:[%s3206_s19 + $0x38] sm:$0xff] }
 0x111   : > { %1037 = vrot.lane.b32.xlu2 %v3007_v43, %s3157_s23  ;;  %1509 = vrot.lane.b32.xlu1 %v3083_v31, %s3161_s27  ;;  %v3052_v43 = vld [vmem:[%s3206_s19 + $0xa8] sm:$0xff] }
 0x112   : > { %1501 = vrot.lane.b32.xlu0 %v3079_v46, %s3161_s27  ;;  %v3048_v31 = vld [vmem:[%s3206_s19 + $0x88] sm:$0xff]  ;;  %v3036_v46 = vld [vmem:[%s3206_s19 + $0xa0] sm:$0xff] }
 0x113   : > { %v1370_v52 = vpop.permute.xlu2 %1369  ;;  %v1282_v53 = vpop.permute.xlu1 %1281 }
 0x114   : > { %v1274_v55 = vpop.permute.xlu0 %1273  ;;  %v1720_v63 = vsel %vm1694_vm6, %v1687_v25, %v1282_v53 }
 0x115   : > { %v1712_v14 = vsel %vm1694_vm6, %v1679_v62, %v1274_v55  ;;  %v3080_v55 = vld [vmem:[%s3206_s19 + $0x98] sm:$0xff] }
 0x116   : > { %v1745_v4 = vsel %vm1727_vm7, %v1712_v14, %v1386_v22  ;;  %v3012_v62 = vld [vmem:[%s3206_s19 + $0x58] sm:$0xff] }
 0x117   : > { %v3084_v14 = vld [vmem:[%s3206_s19 + $0xb8] sm:$0xff] }
 0x119   : > { %1157 = vrot.lane.b32.xlu2 %v3027_v56, %s3158_s24  ;;  %1149 = vrot.lane.b32.xlu1 %v3023_v49, %s3158_s24  ;;  %v3068_v56 = vld [vmem:[%s3206_s19 + $0xb0] sm:$0xff] }
 0x11a   : > { %1045 = vrot.lane.b32.xlu0 %v3011_v58, %s3157_s23  ;;  %v3064_v49 = vld [vmem:[%s3206_s19 + $0x90] sm:$0xff] }
 0x11b   : > { %v1490_v54 = vpop.permute.xlu2 %1489  ;;  %v1498_v3 = vpop.permute.xlu1 %1497 }
 0x11c   : > { %v1394_v9 = vpop.permute.xlu0 %1393  ;;  %v1778_v5 = vsel %vm1760_vm8, %v1745_v4, %v1498_v3 }
 0x11d   : > { %v1753_v40 = vsel %vm1727_vm7, %v1720_v63, %v1394_v9  ;;  %2930 = vmatmul.msk.bf16.vlgmr.msra.gmra.mxu2 %vm1817_vm9, %v1778_v5  ;;  %v3028_v5 = vld [vmem:[%s3206_s19 + $0x60] sm:$0xff] }
 0x11e   : > { %v1786_v8 = vsel %vm1760_vm8, %v1753_v40, %v1506_v33  ;;  %v3040_v40 = vld [vmem:[%s3206_s19 + $0x48] sm:$0xff] }
 0x11f   : > { %2934 = vmatmul.msk.bf16.vlgmr.msra.gmra.mxu3 %vm1817_vm9, %v1786_v8 }
 0x121   : > { %1373 = vrot.lane.b32.xlu2 %v3055_v6, %s3159_s25  ;;  %1269 = vrot.lane.b32.xlu1 %v3043_v7, %s3160_s26  ;;  %v3024_v6 = vld [vmem:[%s3206_s19 + $0x40] sm:$0xff] }
 0x122   : > { %1261 = vrot.lane.b32.xlu0 %v3039_v18, %s3160_s26 }
 0x123   : > { %v1164_v12 = vpop.permute.xlu2 %1163  ;;  %v1146_v13 = vpop.permute.xlu1 %1145 }
 0x124   : > { %v1042_v16 = vpop.permute.xlu0 %1041  ;;  %v1663_v32 = vsel %vm1661_vm5, %v1630_v30, %v1146_v13  ;;  %v3072_v30 = vld [vmem:[%s3206_s19 + $0x58] sm:$0xff] }
 0x125   : > { %v1638_v33 = vsel %vm1628_vm4, %v3501_v59, %v1042_v16 }
 0x126   : > { %v1671_v60 = vsel %vm1661_vm5, %v1638_v33, %v3574_v39 }
 0x129   : > { %1493 = vrot.lane.b32.xlu2 %v3075_v10, %s3161_s27  ;;  %1485 = vrot.lane.b32.xlu1 %v3071_v20, %s3161_s27  ;;  %v3056_v20 = vld [vmem:[%s3206_s19 + $0x50] sm:$0xff] }
 0x12a   : > { %1381 = vrot.lane.b32.xlu0 %v3059_v44, %s3159_s25  ;;  %v3060_v44 = vld [vmem:[%s3206_s19 + $0x70] sm:$0xff] }
 0x12b   : > { %v3620_v21 = vpop.permute.xlu2 %1283  ;;  %v1266_v29 = vpop.permute.xlu1 %1265 }
 0x12c   : > { %v1258_v22 = vpop.permute.xlu0 %1257  ;;  %v1704_v38 = vsel %vm1694_vm6, %v1671_v60, %v1266_v29  ;;  %v3044_v29 = vld [vmem:[%s3206_s19 + $0x68] sm:$0xff] }
 0x12d   : > { %v1696_v48 = vsel %vm1694_vm6, %v1663_v32, %v1258_v22 }
 0x12e   : > { %v1729_v36 = vsel %vm1727_vm7, %v1696_v48, %v1370_v52 }
 0x131   : > { %1167 = vrot.lane.b32.xlu2 %v3032_v23, %s3158_s24  ;;  %1063 = vrot.lane.b32.xlu1 %v3020_v27, %s3157_s23  ;;  %v3076_v27 = vld [vmem:[%s3206_s19 + $0x78] sm:$0xff] }
 0x132   : > { %1055 = vrot.lane.b32.xlu0 %v3016_v19, %s3157_s23 }
 0x133   : > { %v1500_v45 = vpop.permute.xlu2 %1499  ;;  %v1482_v35 = vpop.permute.xlu1 %1481 }
 0x134   : > { %v1378_v59 = vpop.permute.xlu0 %1377  ;;  %v1762_v41 = vsel %vm1760_vm8, %v1729_v36, %v1482_v35 }
 0x135   : > { %v1737_v42 = vsel %vm1727_vm7, %v1704_v38, %v1378_v59  ;;  %2922 = vmatmul.msk.bf16.vlgmr.msra.gmra.mxu0 %vm1817_vm9, %v1762_v41 }
 0x136   : > { %v1770_v39 = vsel %vm1760_vm8, %v1737_v42, %v1490_v54 }
 0x137   : > { %2926 = vmatmul.msk.bf16.vlgmr.msra.gmra.mxu1 %vm1817_vm9, %v1770_v39 }
 0x139   : > { %1287 = vrot.lane.b32.xlu2 %v3052_v43, %s3160_s26  ;;  %1279 = vrot.lane.b32.xlu1 %v3048_v31, %s3160_s26 }
 0x13a   : > { %1175 = vrot.lane.b32.xlu0 %v3036_v46, %s3158_s24 }
 0x13b   : > { %v1148_v51 = vpop.permute.xlu2 %1147  ;;  %v1060_v52 = vpop.permute.xlu1 %1059 }
 0x13c   : > { %v1052_v53 = vpop.permute.xlu0 %1051  ;;  %v1656_v7 = vsel %vm1628_vm4, %v3554_v28, %v1060_v52  ;;  %v1665_v19 = vsel %vm1661_vm5, %v3564_v34, %v1148_v51 }
 0x13d   : > { %v1648_v25 = vsel %vm1628_vm4, %v3464_v37, %v1052_v53 }
 0x13e   : > { %v1681_v54 = vsel %vm1661_vm5, %v1648_v25, %v1164_v12 }
 0x141   : > { %1503 = vrot.lane.b32.xlu2 %v3080_v55, %s3161_s27  ;;  %1399 = vrot.lane.b32.xlu1 %v3068_v56, %s3159_s25 }
 0x142   : > { %1391 = vrot.lane.b32.xlu0 %v3064_v49, %s3159_s25 }
 0x143   : > { %v1276_v50 = vpop.permute.xlu1 %1275  ;;  %v1268_v61 = vpop.permute.xlu2 %1267 }
 0x144   : > { %v1172_v58 = vpop.permute.xlu0 %1171  ;;  %v1714_v4 = vsel %vm1694_vm6, %v1681_v54, %v1276_v50 }
 0x145   : > { %v1689_v18 = vsel %vm1661_vm5, %v1656_v7, %v1172_v58 }
 0x146   : > { %v1722_v12 = vsel %vm1694_vm6, %v1689_v18, %v3620_v21 }
 0x149   : > { %1047 = vrot.lane.b32.xlu2 %v3012_v62, %s3157_s23  ;;  %1039 = vrot.lane.b32.xlu1 %v3008_v2, %s3157_s23 }
 0x14a   : > { %1511 = vrot.lane.b32.xlu0 %v3084_v14, %s3161_s27 }
 0x14b   : > { %v1396_v3 = vpop.permute.xlu1 %1395  ;;  %v1484_v8 = vpop.permute.xlu2 %1483 }
 0x14c   : > { %v1388_v63 = vpop.permute.xlu0 %1387  ;;  %v1755_v16 = vsel %vm1727_vm7, %v1722_v12, %v1396_v3 }
 0x14d   : > { %v1747_v9 = vsel %vm1727_vm7, %v1714_v4, %v1388_v63 }
 0x14e   : > { %v1780_v37 = vsel %vm1760_vm8, %v1747_v9, %v1500_v45 }
 0x14f   : > { %2931 = vmatmul.msk.bf16.gmra.mxu2 %vm1817_vm9, %v1780_v37 }
 0x151   : > { %1159 = vrot.lane.b32.xlu1 %v3028_v5, %s3158_s24  ;;  %1263 = vrot.lane.b32.xlu2 %v3040_v40, %s3160_s26 }
 0x152   : > { %1151 = vrot.lane.b32.xlu0 %v3024_v6, %s3158_s24 }
 0x153   : > { %v1044_v13 = vpop.permute.xlu1 %1043  ;;  %v1062_v22 = vpop.permute.xlu2 %1061 }
 0x154   : > { %v1508_v28 = vpop.permute.xlu0 %1507  ;;  %v1640_v36 = vsel %vm1628_vm4, %v3497_v0, %v1044_v13  ;;  %v1658_v53 = vsel %vm1628_vm4, %v3550_v26, %v1062_v22 }
 0x155   : > { %v1788_v10 = vsel %vm1760_vm8, %v1755_v16, %v1508_v28 }
 0x156   : > { %2935 = vmatmul.msk.bf16.gmra.mxu3 %vm1817_vm9, %v1788_v10 }
 0x159   : > { %1375 = vrot.lane.b32.xlu1 %v3056_v20, %s3159_s25  ;;  %1383 = vrot.lane.b32.xlu2 %v3060_v44, %s3159_s25 }
 0x15a   : > { %1271 = vrot.lane.b32.xlu0 %v3044_v29, %s3160_s26 }
 0x15b   : > { %v1260_v21 = vpop.permute.xlu1 %1259  ;;  %v1278_v32 = vpop.permute.xlu2 %1277 }
 0x15c   : > { %v1156_v23 = vpop.permute.xlu0 %1155  ;;  %v1698_v48 = vsel %vm1694_vm6, %v1665_v19, %v1260_v21 }
 0x15d   : > { %v1673_v38 = vsel %vm1661_vm5, %v1640_v36, %v1156_v23 }
 0x15e   : > { %v1706_v59 = vsel %vm1694_vm6, %v1673_v38, %v1268_v61 }
 0x161   : > { %1495 = vrot.lane.b32.xlu1 %v3076_v27, %s3161_s27 }
 0x162   : > { %1487 = vrot.lane.b32.xlu0 %v3072_v30, %s3161_s27 }
 0x163   : > { %v1380_v33 = vpop.permute.xlu1 %1379  ;;  %v1398_v43 = vpop.permute.xlu2 %1397 }
 0x164   : > { %v1372_v60 = vpop.permute.xlu0 %1371  ;;  %v1739_v34 = vsel %vm1727_vm7, %v1706_v59, %v1380_v33 }
 0x165   : > { %v1731_v45 = vsel %vm1727_vm7, %v1698_v48, %v1372_v60 }
 0x166   : > { %v1764_v35 = vsel %vm1760_vm8, %v1731_v45, %v1484_v8 }
 0x167   : > { %2923 = vmatmul.msk.bf16.gmra.mxu0 %vm1817_vm9, %v1764_v35 }
 0x16b   : > { %v1054_v41 = vpop.permute.xlu1 %1053  ;;  %v1038_v51 = vpop.permute.xlu2 %1037 }
 0x16c   : > { %v1492_v42 = vpop.permute.xlu0 %1491  ;;  %v1650_v55 = vsel %vm1628_vm4, %v3534_v17, %v1054_v41  ;;  %v1634_v40 = vsel %vm1628_vm4, %v3480_v47, %v1038_v51 }
 0x16d   : > { %v1772_v31 = vsel %vm1760_vm8, %v1739_v34, %v1492_v42 }
 0x16e   : > { %2927 = vmatmul.msk.bf16.gmra.mxu1 %vm1817_vm9, %v1772_v31 }
 0x173   : > { %v1174_v39 = vpop.permute.xlu1 %1173  ;;  %v1158_v58 = vpop.permute.xlu2 %1157 }
 0x174   : > { %v1166_v46 = vpop.permute.xlu0 %1165  ;;  %v1691_v56 = vsel %vm1661_vm5, %v1658_v53, %v1174_v39 }
 0x175   : > { %v1683_v49 = vsel %vm1661_vm5, %v1650_v55, %v1166_v46 }
 0x176   : > { %v1716_v61 = vsel %vm1694_vm6, %v1683_v49, %v1278_v32 }
 0x17b   : > { %v1390_v52 = vpop.permute.xlu1 %1389  ;;  %v1374_v17 = vpop.permute.xlu2 %1373 }
 0x17c   : > { %v1286_v0 = vpop.permute.xlu0 %1285  ;;  %v1749_v14 = vsel %vm1727_vm7, %v1716_v61, %v1390_v52 }
 0x17d   : > { %v1724_v50 = vsel %vm1694_vm6, %v1691_v56, %v1286_v0 }
 0x17e   : > { %v1757_v2 = vsel %vm1727_vm7, %v1724_v50, %v1398_v43 }
 0x183   : > { %v1510_v62 = vpop.permute.xlu1 %1509  ;;  %v1494_v5 = vpop.permute.xlu2 %1493 }
 0x184   : > { %v1502_v25 = vpop.permute.xlu0 %1501  ;;  %v1790_v26 = vsel %vm1760_vm8, %v1757_v2, %v1510_v62 }
 0x185   : > { %v1782_v54 = vsel %vm1760_vm8, %v1749_v14, %v1502_v25  ;;  %2936 = vmatmul.msk.bf16.gmra.mxu3 %vm1817_vm9, %v1790_v26 }
 0x186   : > { %2932 = vmatmul.msk.bf16.gmra.mxu2 %vm1817_vm9, %v1782_v54 }
 0x18b   : > { %v1150_v3 = vpop.permute.xlu1 %1149  ;;  %v1168_v20 = vpop.permute.xlu2 %1167 }
 0x18c   : > { %v1046_v4 = vpop.permute.xlu0 %1045  ;;  %v1667_v37 = vsel %vm1661_vm5, %v1634_v40, %v1150_v3 }
 0x18d   : > { %v1642_v6 = vsel %vm1628_vm4, %v3443_v24, %v1046_v4  ;;  %v3736_v24 = vld [vmem:[%s3880_s2] ss:$0 sm:$0xff] }
 0x18e   : > { %v1675_v8 = vsel %vm1661_vm5, %v1642_v6, %v1158_v58 }
 0x193   : > { %v1270_v63 = vpop.permute.xlu1 %1269  ;;  %v1288_v19 = vpop.permute.xlu2 %1287 }
 0x194   : > { %v1262_v9 = vpop.permute.xlu0 %1261  ;;  %v1708_v13 = vsel %vm1694_vm6, %v1675_v8, %v1270_v63 }
 0x195   : > { %v1700_v7 = vsel %vm1694_vm6, %v1667_v37, %v1262_v9 }
 0x196   : > { %v1733_v12 = vsel %vm1727_vm7, %v1700_v7, %v1374_v17 }
 0x19b   : > { %v1486_v18 = vpop.permute.xlu1 %1485  ;;  %v1504_v38 = vpop.permute.xlu2 %1503 }
 0x19c   : > { %v1382_v16 = vpop.permute.xlu0 %1381  ;;  %v1766_v28 = vsel %vm1760_vm8, %v1733_v12, %v1486_v18 }
 0x19d   : > { %v1741_v10 = vsel %vm1727_vm7, %v1708_v13, %v1382_v16  ;;  %2924 = vmatmul.msk.bf16.gmra.mxu0 %vm1817_vm9, %v1766_v28 }
 0x19e   : > { %v1774_v47 = vsel %vm1760_vm8, %v1741_v10, %v1494_v5 }
 0x19f   : > { %2928 = vmatmul.msk.bf16.gmra.mxu1 %vm1817_vm9, %v1774_v47 }
 0x1a0   : > { %v1903_v44 = vpop.f32.mrf.mxu2 }
 0x1a1   : > { %v1904_v29 = vadd.f32 %v3736_v24, %v1903_v44 }
 0x1a2   : > { %v1923_v22 = vpop.f32.mrf.mxu3 }
 0x1a3   : > { %1959 = vst.msk [vmem:[%s3743_s16 + $0x80] sm:$0xff] %vm1562_vm0, %v1904_v29  ;;  %v1924_v21 = vadd.f32 %v3736_v24, %v1923_v22  ;;  %v1064_v23 = vpop.permute.xlu1 %1063  ;;  %v1048_v62 = vpop.permute.xlu2 %1047 }
 0x1a4   : > { %v1056_v27 = vpop.permute.xlu0 %1055  ;;  %v1660_v51 = vsel %vm1628_vm4, %v3493_v57, %v1064_v23  ;;  %v1644_v17 = vsel %vm1628_vm4, %v3515_v1, %v1048_v62 }
 0x1a5   : > { %1967 = vst.msk [vmem:[%s3743_s16 + $0xc0] sm:$0xff] %vm1562_vm0, %v1924_v21  ;;  %v1652_v35 = vsel %vm1628_vm4, %v3530_v15, %v1056_v27 }
 0x1a6   : > { %v1685_v59 = vsel %vm1661_vm5, %v1652_v35, %v1168_v20 }
 0x1a8   : > { %v1905_v30 = vpop.f32.mrf.mxu2 }
 0x1a9   : > { %v1906_v32 = vadd.f32 %v3736_v24, %v1905_v30 }
 0x1aa   : > { %v1925_v33 = vpop.f32.mrf.mxu3 }
 0x1ab   : > { %1960 = vst.msk [vmem:[%s3743_s16 + $0x88] sm:$0xff] %vm1562_vm0, %v1906_v32  ;;  %v1926_v48 = vadd.f32 %v3736_v24, %v1925_v33  ;;  %v1280_v60 = vpop.permute.xlu1 %1279  ;;  %v1264_v25 = vpop.permute.xlu2 %1263 }
 0x1ac   : > { %v1176_v45 = vpop.permute.xlu0 %1175  ;;  %v1718_v42 = vsel %vm1694_vm6, %v1685_v59, %v1280_v60 }
 0x1ad   : > { %1968 = vst.msk [vmem:[%s3743_s16 + $0xc8] sm:$0xff] %vm1562_vm0, %v1926_v48  ;;  %v1693_v52 = vsel %vm1661_vm5, %v1660_v51, %v1176_v45 }
 0x1ae   : > { %v1726_v53 = vsel %vm1694_vm6, %v1693_v52, %v1288_v19 }
 0x1b2   : > { %v1863_v36 = vpop.f32.mrf.mxu0 }
 0x1b3   : > { %v1864_v41 = vadd.f32 %v3736_v24, %v1863_v36  ;;  %v1400_v34 = vpop.permute.xlu1 %1399  ;;  %v1384_v5 = vpop.permute.xlu2 %1383 }
 0x1b4   : > { %v1392_v43 = vpop.permute.xlu0 %1391  ;;  %v1883_v31 = vpop.f32.mrf.mxu1  ;;  %v1759_v49 = vsel %vm1727_vm7, %v1726_v53, %v1400_v34 }
 0x1b5   : > { %1943 = vst.msk [vmem:[%s3743_s16] sm:$0xff] %vm1562_vm0, %v1864_v41  ;;  %v1751_v39 = vsel %vm1727_vm7, %v1718_v42, %v1392_v43  ;;  %v1884_v46 = vadd.f32 %v3736_v24, %v1883_v31 }
 0x1b6   : > { %v1784_v15 = vsel %vm1760_vm8, %v1751_v39, %v1504_v38 }
 0x1b7   : > { %1951 = vst.msk [vmem:[%s3743_s16 + $0x40] sm:$0xff] %vm1562_vm0, %v1884_v46  ;;  %2933 = vmatmul.msk.bf16.gmra.mxu2 %vm1817_vm9, %v1784_v15 }
 0x1ba   : > { %v1865_v0 = vpop.f32.mrf.mxu0 }
 0x1bb   : > { %v1866_v55 = vadd.f32 %v3736_v24, %v1865_v0  ;;  %v1040_v56 = vpop.permute.xlu1 %1039 }
 0x1bc   : > { %v1512_v50 = vpop.permute.xlu0 %1511  ;;  %v1885_v58 = vpop.f32.mrf.mxu1  ;;  %v1636_v3 = vsel %vm1628_vm4, %v3424_v11, %v1040_v56 }
 0x1bd   : > { %1944 = vst.msk [vmem:[%s3743_s16 + $0x8] sm:$0xff] %vm1562_vm0, %v1866_v55  ;;  %v1886_v57 = vadd.f32 %v3736_v24, %v1885_v58  ;;  %v1792_v61 = vsel %vm1760_vm8, %v1759_v49, %v1512_v50 }
 0x1be   : > { %2937 = vmatmul.msk.bf16.gmra.mxu3 %vm1817_vm9, %v1792_v61 }
 0x1bf   : > { %1952 = vst.msk [vmem:[%s3743_s16 + $0x48] sm:$0xff] %vm1562_vm0, %v1886_v57 }
 0x1c3   : > { %v1160_v2 = vpop.permute.xlu1 %1159 }
 0x1c4   : > { %v1152_v14 = vpop.permute.xlu0 %1151  ;;  %v1677_v4 = vsel %vm1661_vm5, %v1644_v17, %v1160_v2 }
 0x1c5   : > { %v1669_v63 = vsel %vm1661_vm5, %v1636_v3, %v1152_v14 }
 0x1c6   : > { %v1702_v37 = vsel %vm1694_vm6, %v1669_v63, %v1264_v25 }
 0x1cb   : > { %v1376_v26 = vpop.permute.xlu1 %1375 }
 0x1cc   : > { %v1272_v54 = vpop.permute.xlu0 %1271  ;;  %v1735_v11 = vsel %vm1727_vm7, %v1702_v37, %v1376_v26 }
 0x1cd   : > { %v1710_v9 = vsel %vm1694_vm6, %v1677_v4, %v1272_v54 }
 0x1ce   : > { %v1743_v6 = vsel %vm1727_vm7, %v1710_v9, %v1384_v5 }
 0x1d2   : > { %v1908_v40 = vpop.f32.mrf.mxu2 }
 0x1d3   : > { %v1909_v7 = vadd.f32 %v3736_v24, %v1908_v40  ;;  %v1496_v1 = vpop.permute.xlu1 %1495 }
 0x1d4   : > { %v1488_v8 = vpop.permute.xlu0 %1487  ;;  %v1776_v18 = vsel %vm1760_vm8, %v1743_v6, %v1496_v1 }
 0x1d5   : > { %1961 = vst.msk [vmem:[%s3743_s16 + $0x90] sm:$0xff] %vm1562_vm0, %v1909_v7  ;;  %v1768_v12 = vsel %vm1760_vm8, %v1735_v11, %v1488_v8  ;;  %2929 = vmatmul.msk.bf16.gmra.mxu1 %vm1817_vm9, %v1776_v18 }
 0x1d6   : > { %2925 = vmatmul.msk.bf16.gmra.mxu0 %vm1817_vm9, %v1768_v12 }
 0x1d9   : > { %v1928_v13 = vpop.f32.mrf.mxu3 }
 0x1da   : > { %v1929_v16 = vadd.f32 %v3736_v24, %v1928_v13  ;;  %v1910_v28 = vpop.f32.mrf.mxu2 }
 0x1db   : > { %v1911_v10 = vadd.f32 %v3736_v24, %v1910_v28 }
 0x1dc   : > { %1969 = vst.msk [vmem:[%s3743_s16 + $0xd0] sm:$0xff] %vm1562_vm0, %v1929_v16 }
 0x1dd   : > { %1962 = vst.msk [vmem:[%s3743_s16 + $0x98] sm:$0xff] %vm1562_vm0, %v1911_v10 }
 0x1e1   : > { %v1930_v47 = vpop.f32.mrf.mxu3 }
 0x1e2   : > { %v1931_v20 = vadd.f32 %v3736_v24, %v1930_v47 }
 0x1e4   : > { %1970 = vst.msk [vmem:[%s3743_s16 + $0xd8] sm:$0xff] %vm1562_vm0, %v1931_v20  ;;  %v1868_v44 = vpop.f32.mrf.mxu0 }
 0x1e5   : > { %v1869_v29 = vadd.f32 %v3736_v24, %v1868_v44 }
 0x1e7   : > { %1945 = vst.msk [vmem:[%s3743_s16 + $0x10] sm:$0xff] %vm1562_vm0, %v1869_v29 }
 0x1eb   : > { %v1888_v22 = vpop.f32.mrf.mxu1 }
 0x1ec   : > { %v1889_v21 = vadd.f32 %v3736_v24, %v1888_v22  ;;  %v1870_v23 = vpop.f32.mrf.mxu0 }
 0x1ed   : > { %v1871_v27 = vadd.f32 %v3736_v24, %v1870_v23 }
 0x1ee   : > { %1953 = vst.msk [vmem:[%s3743_s16 + $0x50] sm:$0xff] %vm1562_vm0, %v1889_v21 }
 0x1ef   : > { %1946 = vst.msk [vmem:[%s3743_s16 + $0x18] sm:$0xff] %vm1562_vm0, %v1871_v27 }
 0x1f3   : > { %v1890_v30 = vpop.f32.mrf.mxu1 }
 0x1f4   : > { %v1891_v19 = vadd.f32 %v3736_v24, %v1890_v30 }
 0x1f6   : > { %1954 = vst.msk [vmem:[%s3743_s16 + $0x58] sm:$0xff] %vm1562_vm0, %v1891_v19 }
 0x208   : > { %v1933_v32 = vpop.f32.mrf.mxu3 }
 0x209   : > { %v1913_v33 = vpop.f32.mrf.mxu2  ;;  %v1934_v48 = vadd.f32 %v3736_v24, %v1933_v32 }
 0x20a   : > { %v1914_v60 = vadd.f32 %v3736_v24, %v1913_v33 }
 0x20b   : > { %1971 = vst.msk [vmem:[%s3743_s16 + $0xe0] sm:$0xff] %vm1562_vm0, %v1934_v48 }
 0x20c   : > { %1963 = vst.msk [vmem:[%s3743_s16 + $0xa0] sm:$0xff] %vm1562_vm0, %v1914_v60 }
 0x210   : > { %v1935_v45 = vpop.f32.mrf.mxu3 }
 0x211   : > { %v1915_v35 = vpop.f32.mrf.mxu2  ;;  %v1936_v36 = vadd.f32 %v3736_v24, %v1935_v45 }
 0x212   : > { %v1916_v38 = vadd.f32 %v3736_v24, %v1915_v35 }
 0x213   : > { %1972 = vst.msk [vmem:[%s3743_s16 + $0xe8] sm:$0xff] %vm1562_vm0, %v1936_v36 }
 0x214   : > { %1964 = vst.msk [vmem:[%s3743_s16 + $0xa8] sm:$0xff] %vm1562_vm0, %v1916_v38 }
 0x21a   : > { %v1873_v59 = vpop.f32.mrf.mxu0 }
 0x21b   : > { %v1874_v41 = vadd.f32 %v3736_v24, %v1873_v59 }
 0x21c   : > { %v1893_v34 = vpop.f32.mrf.mxu1 }
 0x21d   : > { %1947 = vst.msk [vmem:[%s3743_s16 + $0x20] sm:$0xff] %vm1562_vm0, %v1874_v41  ;;  %v1894_v42 = vadd.f32 %v3736_v24, %v1893_v34 }
 0x21f   : > { %1955 = vst.msk [vmem:[%s3743_s16 + $0x60] sm:$0xff] %vm1562_vm0, %v1894_v42 }
 0x222   : > { %v1875_v43 = vpop.f32.mrf.mxu0 }
 0x223   : > { %v1876_v31 = vadd.f32 %v3736_v24, %v1875_v43 }
 0x224   : > { %v1895_v39 = vpop.f32.mrf.mxu1 }
 0x225   : > { %1948 = vst.msk [vmem:[%s3743_s16 + $0x28] sm:$0xff] %vm1562_vm0, %v1876_v31  ;;  %v1896_v46 = vadd.f32 %v3736_v24, %v1895_v39 }
 0x227   : > { %1956 = vst.msk [vmem:[%s3743_s16 + $0x68] sm:$0xff] %vm1562_vm0, %v1896_v46 }
 0x23a   : > { %v1918_v15 = vpop.f32.mrf.mxu2 }
 0x23b   : > { %v1919_v51 = vadd.f32 %v3736_v24, %v1918_v15 }
 0x23d   : > { %1965 = vst.msk [vmem:[%s3743_s16 + $0xb0] sm:$0xff] %vm1562_vm0, %v1919_v51 }
 0x241   : > { %v1938_v52 = vpop.f32.mrf.mxu3 }
 0x242   : > { %v1939_v0 = vadd.f32 %v3736_v24, %v1938_v52  ;;  %v1920_v53 = vpop.f32.mrf.mxu2 }
 0x243   : > { %v1921_v55 = vadd.f32 %v3736_v24, %v1920_v53 }
 0x244   : > { %1973 = vst.msk [vmem:[%s3743_s16 + $0xf0] sm:$0xff] %vm1562_vm0, %v1939_v0 }
 0x245   : > { %1966 = vst.msk [vmem:[%s3743_s16 + $0xb8] sm:$0xff] %vm1562_vm0, %v1921_v55 }
 0x249   : > { %v1940_v56 = vpop.f32.mrf.mxu3 }
 0x24a   : > { %v1941_v49 = vadd.f32 %v3736_v24, %v1940_v56 }
 0x24c   : > { %1974 = vst.msk [vmem:[%s3743_s16 + $0xf8] sm:$0xff] %vm1562_vm0, %v1941_v49 }
 0x252   : > { %v1898_v50 = vpop.f32.mrf.mxu1 }
 0x253   : > { %v1878_v58 = vpop.f32.mrf.mxu0  ;;  %v1899_v57 = vadd.f32 %v3736_v24, %v1898_v50 }
 0x254   : > { %v1879_v61 = vadd.f32 %v3736_v24, %v1878_v58 }
 0x255   : > { %1957 = vst.msk [vmem:[%s3743_s16 + $0x70] sm:$0xff] %vm1562_vm0, %v1899_v57 }
 0x256   : > { %1949 = vst.msk [vmem:[%s3743_s16 + $0x30] sm:$0xff] %vm1562_vm0, %v1879_v61 }
 0x25a   : > { %v1900_v62 = vpop.f32.mrf.mxu1 }
 0x25b   : > { %v1880_v2 = vpop.f32.mrf.mxu0  ;;  %v1901_v14 = vadd.f32 %v3736_v24, %v1900_v62 }
 0x25c   : > { %v1881_v25 = vadd.f32 %v3736_v24, %v1880_v2 }
 0x25d   : > { %1958 = vst.msk [vmem:[%s3743_s16 + $0x78] sm:$0xff] %vm1562_vm0, %v1901_v14 }
 0x25e   : > { %1950 = vst.msk [vmem:[%s3743_s16 + $0x38] sm:$0xff] %vm1562_vm0, %v1881_v25 }
 0x25f PF: > { %s13_s14 = sadd.s32 1, %s3152_s14   ;;  %s3882_s12 = smov %s3148_s13 }
 0x260   : > { %p10_p5 = scmp.ge.s32.totalorder %s13_s14, 4   ;;  %s3883_s13 = smov %s3885_s15 }
 0x262   :  { %12 = sbr.rel (!%p10_p5) target bundleno = 2 (0x2), region = 71 }

// kernel: tpu_custom_call.1
= control target key start
LH: loop header
LB: loop body
LE: loop exit
PB: predicated region body
PF: predicated region fallthrough
CT: control target
= control target key end

     0   :  { %s4749_s12 = smov 0   ;;  %s4751_s13 = smov 0   ;;  %s5661_s0 = inlined_call_operand.vmem [shape: bf16[2,384,4], index: 0, kind: input, shape index: {}]   ;;  %s5662_s1 = inlined_call_operand.vmem [shape: bf16[36,8], index: 1, kind: input, shape index: {}]   ;;  %s5663_s2 = inlined_call_operand.vmem [shape: f32[1,8], index: 2, kind: input, shape index: {}]   ;;  %s5664_s3 = inlined_call_operand.vmem [shape: f32[2,256,8], index: 3, kind: output, shape index: {}]  }
   0x1   :  { %s4753_s14 = smov 0  }
   0x2 LB: > { %s25_s15 = sadd.s32 1, %s4723_s13  ;;  %p3548_p0 = scmp.ge.s32.totalorder %s4727_s14, 1  ;;  %s4727_s14 = sphi %s4753_s14, %s13_s14   ;;  %s4723_s13 = sphi %s4751_s13, %s5666_s13   ;;  %s4719_s12 = sphi %s4749_s12, %s5665_s12  }
   0x3   : > { %p27_p1 = scmp.ge.s32.totalorder %s25_s15, 2  ;;  %p151_p2 = scmp.lt.s32.totalorder %s4727_s14, 3 }
   0x5   : > { %s5668_s15 = smov (%p27_p1, %s25_s15), 0  ;;  %p152_p3 = pnand %p3548_p0, %p151_p2 }
   0x6   : > { %p179_p4 = scmp.lt.s32.totalorder (!%p152_p3), %s4719_s12, 1 }
   0x7   : > { %155 = sbr.rel (%p152_p3) target bundleno = 754 (0x2f2), region = 32 }
   0xc   : > { %v232_v0 = vld [vmem:[%s5662_s1] sm:$0x3]  ;;  %vm362_vm0 = vcmask 1041408   ;;  %v559_v2 = vld [vmem:[%s5662_s1] sm:$0xc]  ;;  %s5670_s12 = smov (!%p179_p4, %s4719_s12), 1 }
   0xd   : > { %v364_v1 = vsel %vm362_vm0, %v232_v0, 0  ;;  %v918_v3 = vld [vmem:[%s5662_s1 + $0x4] sm:$0x3]  ;;  %v641_v4 = vunpack.c.l.b16 %v559_v2  ;;  %v1273_v6 = vld [vmem:[%s5662_s1 + $0x4] sm:$0xc]  ;;  %s4678_s26 = smul.u32 192, %s5670_s12 }
   0xe   : > { %4675 = vmatpush.bf16.msra.mxu1 %v364_v1  ;;  %4676 = vmatpush.bf16.msra.mxu2 %v364_v1  ;;  %v1048_v5 = vsel %vm362_vm0, %v918_v3, 0  ;;  %v1632_v7 = vld [vmem:[%s5662_s1 + $0x8] sm:$0x3]  ;;  %v1355_v8 = vunpack.c.l.b16 %v1273_v6  ;;  %vm313_vm1 = vcmask 31744   ;;  %v1987_v28 = vld [vmem:[%s5662_s1 + $0x8] sm:$0xc] }
   0xf   : > { %4677 = vmatpush.bf16.msra.mxu3 %v364_v1  ;;  %v1762_v9 = vsel %vm362_vm0, %v1632_v7, 0  ;;  %v642_v10 = vpack.c.b16 %v641_v4, %v641_v4  ;;  %373 = vmatpush.bf16.msra.mxu0 %v364_v1  ;;  %s4791_s29 = scalar_lea.vmem %s5661_s0, %s4678_s26  ;;  %v2346_v29 = vld [vmem:[%s5662_s1 + $0xc] sm:$0x3]  ;;  %v2069_v30 = vunpack.c.l.b16 %v1987_v28  ;;  %v2701_v32 = vld [vmem:[%s5662_s1 + $0xc] sm:$0xc]  ;;  %vm455_vm2 = vcmask 64512  }
  0x10   : > { %v1356_v11 = vpack.c.b16 %v1355_v8, %v1355_v8  ;;  %v4535_v13 = vld [vmem:[%s4791_s29 + $0x20] sm:$0xff]  ;;  %v4536_v20 = vld [vmem:[%s4791_s29 + $0x28] sm:$0xff]  ;;  %v4537_v24 = vld [vmem:[%s4791_s29 + $0x30] sm:$0xff]  ;;  %v2476_v31 = vsel %vm362_vm0, %v2346_v29, 0  ;;  %v2783_v33 = vunpack.c.l.b16 %v2701_v32  ;;  %s4530_s11 = sshll.u32 %s5670_s12, 8 }
  0x11   : > { %v643_v12 = vrot.slane %v642_v10, 2  ;;  %v4539_v14 = vld [vmem:[%s4791_s29 + $0x40] sm:$0xff]  ;;  %3620 = vmatmul.msk.bf16.vlgmr.msra.gmra.mxu1 %vm313_vm1, %v4535_v13  ;;  %v4540_v21 = vld [vmem:[%s4791_s29 + $0x48] sm:$0xff]  ;;  %v4541_v25 = vld [vmem:[%s4791_s29 + $0x50] sm:$0xff]  ;;  %v2070_v34 = vpack.c.b16 %v2069_v30, %v2069_v30  ;;  %s5346_s12 = scalar_lea.vmem %s5664_s3, %s4530_s11 }
  0x12   : > { %1057 = vmatpush.bf16.msrb.mxu2 %v1048_v5  ;;  %v4543_v15 = vld [vmem:[%s4791_s29 + $0x60] sm:$0xff]  ;;  %v1357_v16 = vrot.slane %v1356_v11, 2  ;;  %v4544_v22 = vld [vmem:[%s4791_s29 + $0x68] sm:$0xff]  ;;  %v4545_v26 = vld [vmem:[%s4791_s29 + $0x70] sm:$0xff]  ;;  %v2784_v35 = vpack.c.b16 %v2783_v33, %v2783_v33 }
  0x13   : > { %1771 = vmatpush.bf16.msrb.mxu0 %v1762_v9  ;;  %v693_v17 = vsel %vm362_vm0, %v643_v12, 0  ;;  %v4531_v18 = vld [vmem:[%s4791_s29] sm:$0xff]  ;;  %3624 = vmatmul.msk.bf16.vlgmr.msra.gmra.mxu2 %vm313_vm1, %v4539_v14  ;;  %v4532_v23 = vld [vmem:[%s4791_s29 + $0x8] sm:$0xff]  ;;  %v4533_v27 = vld [vmem:[%s4791_s29 + $0x10] sm:$0xff]  ;;  %v2071_v36 = vrot.slane %v2070_v34, 2 }
  0x14   : > { %v1407_v19 = vsel %vm362_vm0, %v1357_v16, 0  ;;  %702 = vmatpush.bf16.msrb.mxu1 %v693_v17  ;;  %3628 = vmatmul.msk.bf16.vlgmr.msra.gmra.mxu3 %vm313_vm1, %v4543_v15  ;;  %v2785_v37 = vrot.slane %v2784_v35, 2  ;;  %v4538_v40 = vld [vmem:[%s4791_s29 + $0x38] sm:$0xff]  ;;  %v3060_v44 = vld [vmem:[%s5662_s1 + $0x10] sm:$0x3]  ;;  %v4547_v46 = vld [vmem:[%s4791_s29 + $0x8] sm:$0xff] }
  0x15   : > { %1416 = vmatpush.bf16.msrb.mxu3 %v1407_v19  ;;  %3616 = vmatmul.msk.bf16.vlgmr.msra.gmra.mxu0 %vm313_vm1, %v4531_v18  ;;  %v2121_v38 = vsel %vm362_vm0, %v2071_v36, 0  ;;  %v4542_v41 = vld [vmem:[%s4791_s29 + $0x58] sm:$0xff]  ;;  %v3190_v45 = vsel %vm362_vm0, %v3060_v44, 0  ;;  %v4563_v47 = vld [vmem:[%s4791_s29 + $0x10] sm:$0xff]  ;;  %v4595_v49 = vld [vmem:[%s4791_s29 + $0x20] sm:$0xff] }
  0x16   : > { %2485 = vmatpush.bf16.msra.mxu2 %v2476_v31  ;;  %v2835_v39 = vsel %vm362_vm0, %v2785_v37, 0  ;;  %v4546_v42 = vld [vmem:[%s4791_s29 + $0x78] sm:$0xff]  ;;  %v4548_v50 = vld [vmem:[%s4791_s29 + $0x10] sm:$0xff]  ;;  %v4580_v52 = vld [vmem:[%s4791_s29 + $0x20] sm:$0xff] }
  0x17   : > { %v4534_v43 = vld [vmem:[%s4791_s29 + $0x18] sm:$0xff]  ;;  %3199 = vmatpush.bf16.msra.mxu0 %v3190_v45  ;;  %v4596_v53 = vld [vmem:[%s4791_s29 + $0x28] sm:$0xff]  ;;  %v4565_v55 = vld [vmem:[%s4791_s29 + $0x20] sm:$0xff] }
  0x18   : > { %2130 = vmatpush.bf16.msra.mxu1 %v2121_v38  ;;  %v4579_v48 = vld [vmem:[%s4791_s29 + $0x18] sm:$0xff]  ;;  %v4581_v56 = vld [vmem:[%s4791_s29 + $0x28] sm:$0xff]  ;;  %v4597_v57 = vld [vmem:[%s4791_s29 + $0x30] sm:$0xff] }
  0x19   : > { %2844 = vmatpush.bf16.msra.mxu3 %v2835_v39  ;;  %v4564_v51 = vld [vmem:[%s4791_s29 + $0x18] sm:$0xff]  ;;  %v4550_v58 = vld [vmem:[%s4791_s29 + $0x20] sm:$0xff]  ;;  %v4566_v59 = vld [vmem:[%s4791_s29 + $0x28] sm:$0xff] }
  0x1a   : > { %v4549_v54 = vld [vmem:[%s4791_s29 + $0x18] sm:$0xff]  ;;  %v4582_v60 = vld [vmem:[%s4791_s29 + $0x30] sm:$0xff]  ;;  %v4551_v62 = vld [vmem:[%s4791_s29 + $0x28] sm:$0xff] }
  0x1b   : > { %v4598_v61 = vld [vmem:[%s4791_s29 + $0x38] sm:$0xff]  ;;  %v4567_v63 = vld [vmem:[%s4791_s29 + $0x30] sm:$0xff]  ;;  %v4599_v2 = vld [vmem:[%s4791_s29 + $0x40] sm:$0xff] }
  0x1c   : > { %v4583_v1 = vld [vmem:[%s4791_s29 + $0x38] sm:$0xff]  ;;  %v4552_v9 = vld [vmem:[%s4791_s29 + $0x30] sm:$0xff]  ;;  %v4584_v13 = vld [vmem:[%s4791_s29 + $0x40] sm:$0xff] }
  0x1d   : > { %v4568_v10 = vld [vmem:[%s4791_s29 + $0x38] sm:$0xff]  ;;  %v4600_v14 = vld [vmem:[%s4791_s29 + $0x48] sm:$0xff]  ;;  %v4554_v33 = vld [vmem:[%s4791_s29 + $0x40] sm:$0xff] }
  0x1e   : > { %v4570_v34 = vld [vmem:[%s4791_s29 + $0x48] sm:$0xff]  ;;  %v4586_v37 = vld [vmem:[%s4791_s29 + $0x50] sm:$0xff]  ;;  %v4602_v38 = vld [vmem:[%s4791_s29 + $0x58] sm:$0xff] }
  0x1f   : > { %v4555_v45 = vld [vmem:[%s4791_s29 + $0x48] sm:$0xff] }
  0x21   : > { %3621 = vmatmul.msk.bf16.gmra.mxu1 %vm313_vm1, %v4536_v20 }
  0x23   : > { %3625 = vmatmul.msk.bf16.gmra.mxu2 %vm313_vm1, %v4540_v21  ;;  %v4553_v21 = vld [vmem:[%s4791_s29 + $0x38] sm:$0xff] }
  0x24   : > { %3629 = vmatmul.msk.bf16.gmra.mxu3 %vm313_vm1, %v4544_v22  ;;  %v4569_v22 = vld [vmem:[%s4791_s29 + $0x40] sm:$0xff] }
  0x25   : > { %3617 = vmatmul.msk.bf16.gmra.mxu0 %vm313_vm1, %v4532_v23 }
  0x31   : > { %3622 = vmatmul.msk.bf16.gmra.mxu1 %vm313_vm1, %v4537_v24 }
  0x33   : > { %3626 = vmatmul.msk.bf16.gmra.mxu2 %vm313_vm1, %v4541_v25  ;;  %v4585_v25 = vld [vmem:[%s4791_s29 + $0x48] sm:$0xff] }
  0x34   : > { %3630 = vmatmul.msk.bf16.gmra.mxu3 %vm313_vm1, %v4545_v26  ;;  %v4601_v26 = vld [vmem:[%s4791_s29 + $0x50] sm:$0xff] }
  0x35   : > { %3618 = vmatmul.msk.bf16.gmra.mxu0 %vm313_vm1, %v4533_v27 }
  0x41   : > { %3623 = vmatmul.msk.bf16.gmra.mxu1 %vm313_vm1, %v4538_v40 }
  0x43   : > { %3627 = vmatmul.msk.bf16.gmra.mxu2 %vm313_vm1, %v4542_v41 }
  0x44   : > { %3631 = vmatmul.msk.bf16.gmra.mxu3 %vm313_vm1, %v4546_v42 }
  0x45   : > { %3619 = vmatmul.msk.bf16.gmra.mxu0 %vm313_vm1, %v4534_v43 }
  0x51   : > { %3728 = vmatmul.msk.bf16.vlgmr.msrb.gmra.mxu1 %vm313_vm1, %v4547_v46  ;;  %v4571_v46 = vld [vmem:[%s4791_s29 + $0x50] sm:$0xff] }
  0x53   : > { %3840 = vmatmul.msk.bf16.vlgmr.msrb.gmra.mxu2 %vm313_vm1, %v4563_v47 }
  0x54   : > { %3952 = vmatmul.msk.bf16.vlgmr.msrb.gmra.mxu3 %vm313_vm1, %v4579_v48 }
  0x55   : > { %4064 = vmatmul.msk.bf16.vlgmr.msrb.gmra.mxu0 %vm313_vm1, %v4595_v49 }
  0x61   : > { %3729 = vmatmul.msk.bf16.gmra.mxu1 %vm313_vm1, %v4548_v50  ;;  %v4587_v50 = vld [vmem:[%s4791_s29 + $0x58] sm:$0xff] }
  0x63   : > { %3841 = vmatmul.msk.bf16.gmra.mxu2 %vm313_vm1, %v4564_v51 }
  0x64   : > { %3953 = vmatmul.msk.bf16.gmra.mxu3 %vm313_vm1, %v4580_v52  ;;  %v4603_v52 = vld [vmem:[%s4791_s29 + $0x60] sm:$0xff] }
  0x65   : > { %4065 = vmatmul.msk.bf16.gmra.mxu0 %vm313_vm1, %v4596_v53 }
  0x71   : > { %3730 = vmatmul.msk.bf16.gmra.mxu1 %vm313_vm1, %v4549_v54 }
  0x73   : > { %3842 = vmatmul.msk.bf16.gmra.mxu2 %vm313_vm1, %v4565_v55 }
  0x74   : > { %3954 = vmatmul.msk.bf16.gmra.mxu3 %vm313_vm1, %v4581_v56 }
  0x75   : > { %4066 = vmatmul.msk.bf16.gmra.mxu0 %vm313_vm1, %v4597_v57 }
  0x81   : > { %3731 = vmatmul.msk.bf16.gmra.mxu1 %vm313_vm1, %v4550_v58 }
  0x83   : > { %3843 = vmatmul.msk.bf16.gmra.mxu2 %vm313_vm1, %v4566_v59 }
  0x84   : > { %3955 = vmatmul.msk.bf16.gmra.mxu3 %vm313_vm1, %v4582_v60 }
  0x85   : > { %4067 = vmatmul.msk.bf16.gmra.mxu0 %vm313_vm1, %v4598_v61 }
  0x8e   : > { %v395_v0 = vpop.f32.mrf.mxu1 }
  0x8f   : > { %464 = vst.msk [vmem:[#allocation2 + $0x40] sm:$0xff] %vm455_vm2, %v395_v0  ;;  %v4572_v0 = vld [vmem:[%s4791_s29 + $0x58] sm:$0xff] }
  0x91   : > { %3732 = vmatmul.msk.bf16.gmra.mxu1 %vm313_vm1, %v4551_v62 }
  0x92   : > { %v375_v3 = vpop.f32.mrf.mxu0 }
  0x93   : > { %3844 = vmatmul.msk.bf16.gmra.mxu2 %vm313_vm1, %v4567_v63  ;;  %456 = vst.msk [vmem:[#allocation2] sm:$0xff] %vm455_vm2, %v375_v3  ;;  %v4556_v63 = vld [vmem:[%s4791_s29 + $0x50] sm:$0xff] }
  0x94   : > { %3956 = vmatmul.msk.bf16.gmra.mxu3 %vm313_vm1, %v4583_v1 }
  0x95   : > { %4068 = vmatmul.msk.bf16.gmra.mxu0 %vm313_vm1, %v4599_v2 }
  0x96   : > { %v415_v4 = vpop.f32.mrf.mxu2  ;;  %v397_v6 = vpop.f32.mrf.mxu1 }
  0x97   : > { %472 = vst.msk [vmem:[#allocation2 + $0x80] sm:$0xff] %vm455_vm2, %v415_v4  ;;  %v435_v5 = vpop.f32.mrf.mxu3  ;;  %v4588_v4 = vld [vmem:[%s4791_s29 + $0x60] sm:$0xff] }
  0x98   : > { %480 = vst.msk [vmem:[#allocation2 + $0xc0] sm:$0xff] %vm455_vm2, %v435_v5 }
  0x99   : > { %465 = vst.msk [vmem:[#allocation2 + $0x48] sm:$0xff] %vm455_vm2, %v397_v6  ;;  %v4604_v6 = vld [vmem:[%s4791_s29 + $0x68] sm:$0xff] }
  0x9a   : > { %v377_v7 = vpop.f32.mrf.mxu0  ;;  %v488_v48 = vld [vmem:[#allocation2] sm:$0xff] }
  0x9b   : > { %457 = vst.msk [vmem:[#allocation2 + $0x8] sm:$0xff] %vm455_vm2, %v377_v7 }
  0x9e   : > { %v417_v8 = vpop.f32.mrf.mxu2  ;;  %v400_v12 = vpop.f32.mrf.mxu1 }
  0x9f   : > { %473 = vst.msk [vmem:[#allocation2 + $0x88] sm:$0xff] %vm455_vm2, %v417_v8  ;;  %v437_v11 = vpop.f32.mrf.mxu3 }
  0xa0   : > { %481 = vst.msk [vmem:[#allocation2 + $0xc8] sm:$0xff] %vm455_vm2, %v437_v11 }
  0xa1   : > { %466 = vst.msk [vmem:[#allocation2 + $0x50] sm:$0xff] %vm455_vm2, %v400_v12  ;;  %3733 = vmatmul.msk.bf16.gmra.mxu1 %vm313_vm1, %v4552_v9 }
  0xa2   : > { %v380_v15 = vpop.f32.mrf.mxu0  ;;  %v489_v56 = vld [vmem:[#allocation2 + $0x8] sm:$0xff] }
  0xa3   : > { %3845 = vmatmul.msk.bf16.gmra.mxu2 %vm313_vm1, %v4568_v10  ;;  %458 = vst.msk [vmem:[#allocation2 + $0x10] sm:$0xff] %vm455_vm2, %v380_v15 }
  0xa4   : > { %3957 = vmatmul.msk.bf16.gmra.mxu3 %vm313_vm1, %v4584_v13 }
  0xa5   : > { %4069 = vmatmul.msk.bf16.gmra.mxu0 %vm313_vm1, %v4600_v14 }
  0xa6   : > { %v420_v16 = vpop.f32.mrf.mxu2  ;;  %v402_v18 = vpop.f32.mrf.mxu1 }
  0xa7   : > { %474 = vst.msk [vmem:[#allocation2 + $0x90] sm:$0xff] %vm455_vm2, %v420_v16  ;;  %v440_v17 = vpop.f32.mrf.mxu3 }
  0xa8   : > { %482 = vst.msk [vmem:[#allocation2 + $0xd0] sm:$0xff] %vm455_vm2, %v440_v17 }
  0xa9   : > { %467 = vst.msk [vmem:[#allocation2 + $0x58] sm:$0xff] %vm455_vm2, %v402_v18 }
  0xaa   : > { %v382_v19 = vpop.f32.mrf.mxu0  ;;  %v490_v2 = vld [vmem:[#allocation2 + $0x10] sm:$0xff] }
  0xab   : > { %459 = vst.msk [vmem:[#allocation2 + $0x18] sm:$0xff] %vm455_vm2, %v382_v19 }
  0xae   : > { %v422_v20 = vpop.f32.mrf.mxu2  ;;  %v405_v24 = vpop.f32.mrf.mxu1 }
  0xaf   : > { %475 = vst.msk [vmem:[#allocation2 + $0x98] sm:$0xff] %vm455_vm2, %v422_v20  ;;  %v442_v23 = vpop.f32.mrf.mxu3 }
  0xb0   : > { %483 = vst.msk [vmem:[#allocation2 + $0xd8] sm:$0xff] %vm455_vm2, %v442_v23 }
  0xb1   : > { %468 = vst.msk [vmem:[#allocation2 + $0x60] sm:$0xff] %vm455_vm2, %v405_v24  ;;  %3734 = vmatmul.msk.bf16.gmra.mxu1 %vm313_vm1, %v4553_v21 }
  0xb2   : > { %v385_v27 = vpop.f32.mrf.mxu0  ;;  %v491_v14 = vld [vmem:[#allocation2 + $0x18] sm:$0xff] }
  0xb3   : > { %3846 = vmatmul.msk.bf16.gmra.mxu2 %vm313_vm1, %v4569_v22  ;;  %460 = vst.msk [vmem:[#allocation2 + $0x20] sm:$0xff] %vm455_vm2, %v385_v27 }
  0xb4   : > { %3958 = vmatmul.msk.bf16.gmra.mxu3 %vm313_vm1, %v4585_v25  ;;  %v4557_v25 = vld [vmem:[%s4791_s29 + $0x58] sm:$0xff] }
  0xb5   : > { %4070 = vmatmul.msk.bf16.gmra.mxu0 %vm313_vm1, %v4601_v26  ;;  %v4573_v26 = vld [vmem:[%s4791_s29 + $0x60] sm:$0xff] }
  0xb6   : > { %v425_v28 = vpop.f32.mrf.mxu2  ;;  %v407_v30 = vpop.f32.mrf.mxu1 }
  0xb7   : > { %476 = vst.msk [vmem:[#allocation2 + $0xa0] sm:$0xff] %vm455_vm2, %v425_v28  ;;  %v445_v29 = vpop.f32.mrf.mxu3 }
  0xb8   : > { %484 = vst.msk [vmem:[#allocation2 + $0xe0] sm:$0xff] %vm455_vm2, %v445_v29 }
  0xb9   : > { %469 = vst.msk [vmem:[#allocation2 + $0x68] sm:$0xff] %vm455_vm2, %v407_v30  ;;  %v4589_v30 = vld [vmem:[%s4791_s29 + $0x68] sm:$0xff] }
  0xba   : > { %v387_v31 = vpop.f32.mrf.mxu0  ;;  %v492_v28 = vld [vmem:[#allocation2 + $0x20] sm:$0xff] }
  0xbb   : > { %461 = vst.msk [vmem:[#allocation2 + $0x28] sm:$0xff] %vm455_vm2, %v387_v31 }
  0xbe   : > { %v427_v32 = vpop.f32.mrf.mxu2  ;;  %v410_v36 = vpop.f32.mrf.mxu1 }
  0xbf   : > { %477 = vst.msk [vmem:[#allocation2 + $0xa8] sm:$0xff] %vm455_vm2, %v427_v32  ;;  %v447_v35 = vpop.f32.mrf.mxu3  ;;  %v4605_v32 = vld [vmem:[%s4791_s29 + $0x70] sm:$0xff] }
  0xc0   : > { %485 = vst.msk [vmem:[#allocation2 + $0xe8] sm:$0xff] %vm455_vm2, %v447_v35 }
  0xc1   : > { %470 = vst.msk [vmem:[#allocation2 + $0x70] sm:$0xff] %vm455_vm2, %v410_v36  ;;  %3735 = vmatmul.msk.bf16.gmra.mxu1 %vm313_vm1, %v4554_v33 }
  0xc2   : > { %v390_v39 = vpop.f32.mrf.mxu0 }
  0xc3   : > { %3847 = vmatmul.msk.bf16.gmra.mxu2 %vm313_vm1, %v4570_v34  ;;  %462 = vst.msk [vmem:[#allocation2 + $0x30] sm:$0xff] %vm455_vm2, %v390_v39 }
  0xc4   : > { %3959 = vmatmul.msk.bf16.gmra.mxu3 %vm313_vm1, %v4586_v37 }
  0xc5   : > { %4071 = vmatmul.msk.bf16.gmra.mxu0 %vm313_vm1, %v4602_v38 }
  0xc6   : > { %v430_v40 = vpop.f32.mrf.mxu2  ;;  %v412_v42 = vpop.f32.mrf.mxu1 }
  0xc7   : > { %478 = vst.msk [vmem:[#allocation2 + $0xb0] sm:$0xff] %vm455_vm2, %v430_v40  ;;  %v450_v41 = vpop.f32.mrf.mxu3 }
  0xc8   : > { %486 = vst.msk [vmem:[#allocation2 + $0xf0] sm:$0xff] %vm455_vm2, %v450_v41 }
  0xc9   : > { %471 = vst.msk [vmem:[#allocation2 + $0x78] sm:$0xff] %vm455_vm2, %v412_v42  ;;  %v493_v42 = vld [vmem:[#allocation2 + $0x28] sm:$0xff] }
  0xca   : > { %v392_v43 = vpop.f32.mrf.mxu0 }
  0xcb   : > { %463 = vst.msk [vmem:[#allocation2 + $0x38] sm:$0xff] %vm455_vm2, %v392_v43 }
  0xce   : > { %v432_v44 = vpop.f32.mrf.mxu2  ;;  %v704_v49 = vpop.f32.mrf.mxu1 }
  0xcf   : > { %479 = vst.msk [vmem:[#allocation2 + $0xb8] sm:$0xff] %vm455_vm2, %v432_v44  ;;  %v452_v47 = vpop.f32.mrf.mxu3  ;;  %v784_v51 = vadd.f32 %v704_v49, %v488_v48 }
  0xd0   : > { %487 = vst.msk [vmem:[#allocation2 + $0xf8] sm:$0xff] %vm455_vm2, %v452_v47 }
  0xd1   : > { %816 = vst.msk [vmem:[#allocation2] sm:$0xff] %vm455_vm2, %v784_v51  ;;  %3736 = vmatmul.msk.bf16.gmra.mxu1 %vm313_vm1, %v4555_v45 }
  0xd2   : > { %v1773_v53 = vpop.f32.mrf.mxu0 }
  0xd3   : > { %3848 = vmatmul.msk.bf16.gmra.mxu2 %vm313_vm1, %v4571_v46 }
  0xd4   : > { %3960 = vmatmul.msk.bf16.gmra.mxu3 %vm313_vm1, %v4587_v50 }
  0xd5   : > { %4072 = vmatmul.msk.bf16.gmra.mxu0 %vm313_vm1, %v4603_v52 }
  0xd6   : > { %v1059_v54 = vpop.f32.mrf.mxu2  ;;  %v706_v57 = vpop.f32.mrf.mxu1 }
  0xd7   : > { %v1418_v55 = vpop.f32.mrf.mxu3  ;;  %v785_v58 = vadd.f32 %v706_v57, %v489_v56  ;;  %v494_v56 = vld [vmem:[#allocation2 + $0x30] sm:$0xff] }
  0xd8   : > { %v848_v59 = vld [vmem:[#allocation2] sm:$0xff] }
  0xd9   : > { %v1139_v61 = vadd.f32 %v1059_v54, %v848_v59  ;;  %817 = vst.msk [vmem:[#allocation2 + $0x8] sm:$0xff] %vm455_vm2, %v785_v58  ;;  %v4574_v54 = vld [vmem:[%s4791_s29 + $0x68] sm:$0xff]  ;;  %v4590_v58 = vld [vmem:[%s4791_s29 + $0x70] sm:$0xff] }
  0xda   : > { %v4948_v60 = vpop.f32.mrf.mxu0 }
  0xdb   : > { %1171 = vst.msk [vmem:[#allocation2] sm:$0xff] %vm455_vm2, %v1139_v61 }
  0xde   : > { %v1061_v62 = vpop.f32.mrf.mxu2  ;;  %v709_v3 = vpop.f32.mrf.mxu1 }
  0xdf   : > { %v1420_v1 = vpop.f32.mrf.mxu3  ;;  %v786_v5 = vadd.f32 %v709_v3, %v490_v2 }
  0xe0   : > { %v849_v7 = vld [vmem:[#allocation2 + $0x8] sm:$0xff] }
  0xe1   : > { %v1140_v9 = vadd.f32 %v1061_v62, %v849_v7  ;;  %818 = vst.msk [vmem:[#allocation2 + $0x10] sm:$0xff] %vm455_vm2, %v786_v5  ;;  %3737 = vmatmul.msk.bf16.gmra.mxu1 %vm313_vm1, %v4556_v63 }
  0xe2   : > { %v4956_v8 = vpop.f32.mrf.mxu0  ;;  %v1203_v10 = vld [vmem:[#allocation2] sm:$0xff] }
  0xe3   : > { %3849 = vmatmul.msk.bf16.gmra.mxu2 %vm313_vm1, %v4572_v0  ;;  %v1498_v11 = vadd.f32 %v1418_v55, %v1203_v10  ;;  %1172 = vst.msk [vmem:[#allocation2 + $0x8] sm:$0xff] %vm455_vm2, %v1140_v9 }
  0xe4   : > { %3961 = vmatmul.msk.bf16.gmra.mxu3 %vm313_vm1, %v4588_v4 }
  0xe5   : > { %4073 = vmatmul.msk.bf16.gmra.mxu0 %vm313_vm1, %v4604_v6  ;;  %1530 = vst.msk [vmem:[#allocation2] sm:$0xff] %vm455_vm2, %v1498_v11  ;;  %v495_v6 = vld [vmem:[#allocation2 + $0x38] sm:$0xff] }
  0xe6   : > { %v1064_v12 = vpop.f32.mrf.mxu2  ;;  %v711_v15 = vpop.f32.mrf.mxu1 }
  0xe7   : > { %v1423_v13 = vpop.f32.mrf.mxu3  ;;  %v787_v16 = vadd.f32 %v711_v15, %v491_v14 }
  0xe8   : > { %v850_v17 = vld [vmem:[#allocation2 + $0x10] sm:$0xff] }
  0xe9   : > { %v1141_v19 = vadd.f32 %v1064_v12, %v850_v17  ;;  %819 = vst.msk [vmem:[#allocation2 + $0x18] sm:$0xff] %vm455_vm2, %v787_v16  ;;  %v4559_v17 = vld [vmem:[%s4791_s29 + $0x68] sm:$0xff] }
  0xea   : > { %v4965_v18 = vpop.f32.mrf.mxu0  ;;  %v1204_v20 = vld [vmem:[#allocation2 + $0x8] sm:$0xff] }
  0xeb   : > { %v1499_v21 = vadd.f32 %v1420_v1, %v1204_v20  ;;  %1173 = vst.msk [vmem:[#allocation2 + $0x10] sm:$0xff] %vm455_vm2, %v1141_v19  ;;  %v496_v20 = vld [vmem:[#allocation2 + $0x40] sm:$0xff] }
  0xec   : > { %v1562_v22 = vld [vmem:[#allocation2] sm:$0xff] }
  0xed   : > { %1531 = vst.msk [vmem:[#allocation2 + $0x8] sm:$0xff] %vm455_vm2, %v1499_v21  ;;  %v1853_v24 = vadd.f32 %v1773_v53, %v1562_v22  ;;  %v4558_v53 = vld [vmem:[%s4791_s29 + $0x60] sm:$0xff]  ;;  %v4591_v22 = vld [vmem:[%s4791_s29 + $0x78] sm:$0xff] }
  0xee   : > { %v1066_v23 = vpop.f32.mrf.mxu2  ;;  %v714_v29 = vpop.f32.mrf.mxu1 }
  0xef   : > { %v1425_v27 = vpop.f32.mrf.mxu3  ;;  %1885 = vst.msk [vmem:[#allocation2] sm:$0xff] %vm455_vm2, %v1853_v24  ;;  %v788_v31 = vadd.f32 %v714_v29, %v492_v28  ;;  %v4607_v24 = vld [vmem:[%s4791_s29 + $0x80] sm:$0xff] }
  0xf0   : > { %v851_v33 = vld [vmem:[#allocation2 + $0x18] sm:$0xff] }
  0xf1   : > { %v1142_v35 = vadd.f32 %v1066_v23, %v851_v33  ;;  %820 = vst.msk [vmem:[#allocation2 + $0x20] sm:$0xff] %vm455_vm2, %v788_v31  ;;  %3738 = vmatmul.msk.bf16.gmra.mxu1 %vm313_vm1, %v4557_v25 }
  0xf2   : > { %v4975_v34 = vpop.f32.mrf.mxu0  ;;  %v1205_v36 = vld [vmem:[#allocation2 + $0x10] sm:$0xff] }
  0xf3   : > { %3850 = vmatmul.msk.bf16.gmra.mxu2 %vm313_vm1, %v4573_v26  ;;  %v1500_v37 = vadd.f32 %v1423_v13, %v1205_v36  ;;  %1174 = vst.msk [vmem:[#allocation2 + $0x18] sm:$0xff] %vm455_vm2, %v1142_v35 }
  0xf4   : > { %3962 = vmatmul.msk.bf16.gmra.mxu3 %vm313_vm1, %v4589_v30  ;;  %v1563_v38 = vld [vmem:[#allocation2 + $0x8] sm:$0xff] }
  0xf5   : > { %4074 = vmatmul.msk.bf16.gmra.mxu0 %vm313_vm1, %v4605_v32  ;;  %1532 = vst.msk [vmem:[#allocation2 + $0x10] sm:$0xff] %vm455_vm2, %v1500_v37  ;;  %v1854_v40 = vadd.f32 %v4948_v60, %v1563_v38  ;;  %v4606_v60 = vld [vmem:[%s4791_s29 + $0x78] sm:$0xff] }
  0xf6   : > { %v1069_v39 = vpop.f32.mrf.mxu2  ;;  %v716_v43 = vpop.f32.mrf.mxu1 }
  0xf7   : > { %v1428_v41 = vpop.f32.mrf.mxu3  ;;  %1886 = vst.msk [vmem:[#allocation2 + $0x8] sm:$0xff] %vm455_vm2, %v1854_v40  ;;  %v789_v44 = vadd.f32 %v716_v43, %v493_v42 }
  0xf8   : > { %v852_v45 = vld [vmem:[#allocation2 + $0x20] sm:$0xff] }
  0xf9   : > { %v1143_v47 = vadd.f32 %v1069_v39, %v852_v45  ;;  %821 = vst.msk [vmem:[#allocation2 + $0x28] sm:$0xff] %vm455_vm2, %v789_v44  ;;  %v4560_v45 = vld [vmem:[%s4791_s29 + $0x70] sm:$0xff] }
  0xfa   : > { %v4986_v46 = vpop.f32.mrf.mxu0  ;;  %v1206_v48 = vld [vmem:[#allocation2 + $0x18] sm:$0xff] }
  0xfb   : > { %v1501_v49 = vadd.f32 %v1425_v27, %v1206_v48  ;;  %1175 = vst.msk [vmem:[#allocation2 + $0x20] sm:$0xff] %vm455_vm2, %v1143_v47  ;;  %v498_v48 = vld [vmem:[#allocation2 + $0x50] sm:$0xff] }
  0xfc   : > { %v1564_v50 = vld [vmem:[#allocation2 + $0x10] sm:$0xff] }
  0xfd   : > { %1533 = vst.msk [vmem:[#allocation2 + $0x18] sm:$0xff] %vm455_vm2, %v1501_v49  ;;  %v1855_v52 = vadd.f32 %v4956_v8, %v1564_v50  ;;  %v4592_v50 = vld [vmem:[%s4791_s29 + $0x80] sm:$0xff] }
  0xfe   : > { %v1071_v51 = vpop.f32.mrf.mxu2  ;;  %v719_v57 = vpop.f32.mrf.mxu1 }
  0xff   : > { %v1430_v55 = vpop.f32.mrf.mxu3  ;;  %1887 = vst.msk [vmem:[#allocation2 + $0x10] sm:$0xff] %vm455_vm2, %v1855_v52  ;;  %v790_v59 = vadd.f32 %v719_v57, %v494_v56  ;;  %v4608_v52 = vld [vmem:[%s4791_s29 + $0x88] sm:$0xff] }
 0x100   : > { %v853_v61 = vld [vmem:[#allocation2 + $0x28] sm:$0xff] }
 0x101   : > { %v1144_v63 = vadd.f32 %v1071_v51, %v853_v61  ;;  %822 = vst.msk [vmem:[#allocation2 + $0x30] sm:$0xff] %vm455_vm2, %v790_v59  ;;  %3739 = vmatmul.msk.bf16.gmra.mxu1 %vm313_vm1, %v4558_v53 }
 0x102   : > { %v4997_v62 = vpop.f32.mrf.mxu0  ;;  %v1207_v0 = vld [vmem:[#allocation2 + $0x20] sm:$0xff] }
 0x103   : > { %3851 = vmatmul.msk.bf16.gmra.mxu2 %vm313_vm1, %v4574_v54  ;;  %v1502_v1 = vadd.f32 %v1428_v41, %v1207_v0  ;;  %1176 = vst.msk [vmem:[#allocation2 + $0x28] sm:$0xff] %vm455_vm2, %v1144_v63 }
 0x104   : > { %3963 = vmatmul.msk.bf16.gmra.mxu3 %vm313_vm1, %v4590_v58  ;;  %v1565_v2 = vld [vmem:[#allocation2 + $0x18] sm:$0xff] }
 0x105   : > { %4075 = vmatmul.msk.bf16.gmra.mxu0 %vm313_vm1, %v4606_v60  ;;  %1534 = vst.msk [vmem:[#allocation2 + $0x20] sm:$0xff] %vm455_vm2, %v1502_v1  ;;  %v1856_v4 = vadd.f32 %v4965_v18, %v1565_v2  ;;  %v4575_v18 = vld [vmem:[%s4791_s29 + $0x70] sm:$0xff] }
 0x106   : > { %v1074_v3 = vpop.f32.mrf.mxu2  ;;  %v721_v7 = vpop.f32.mrf.mxu1 }
 0x107   : > { %v1433_v5 = vpop.f32.mrf.mxu3  ;;  %1888 = vst.msk [vmem:[#allocation2 + $0x18] sm:$0xff] %vm455_vm2, %v1856_v4  ;;  %v791_v8 = vadd.f32 %v721_v7, %v495_v6 }
 0x108   : > { %v854_v9 = vld [vmem:[#allocation2 + $0x30] sm:$0xff] }
 0x109   : > { %v1145_v11 = vadd.f32 %v1074_v3, %v854_v9  ;;  %823 = vst.msk [vmem:[#allocation2 + $0x38] sm:$0xff] %vm455_vm2, %v791_v8  ;;  %v4561_v9 = vld [vmem:[%s4791_s29 + $0x78] sm:$0xff] }
 0x10a   : > { %v5008_v10 = vpop.f32.mrf.mxu0  ;;  %v1208_v12 = vld [vmem:[#allocation2 + $0x28] sm:$0xff] }
 0x10b   : > { %v1503_v13 = vadd.f32 %v1430_v55, %v1208_v12  ;;  %1177 = vst.msk [vmem:[#allocation2 + $0x30] sm:$0xff] %vm455_vm2, %v1145_v11  ;;  %v500_v12 = vld [vmem:[#allocation2 + $0x60] sm:$0xff] }
 0x10c   : > { %v1566_v14 = vld [vmem:[#allocation2 + $0x20] sm:$0xff] }
 0x10d   : > { %1535 = vst.msk [vmem:[#allocation2 + $0x28] sm:$0xff] %vm455_vm2, %v1503_v13  ;;  %v1857_v16 = vadd.f32 %v4975_v34, %v1566_v14  ;;  %v497_v34 = vld [vmem:[#allocation2 + $0x48] sm:$0xff] }
 0x10e   : > { %v1076_v15 = vpop.f32.mrf.mxu2  ;;  %v724_v21 = vpop.f32.mrf.mxu1  ;;  %v4593_v14 = vld [vmem:[%s4791_s29 + $0x88] sm:$0xff] }
 0x10f   : > { %v1435_v19 = vpop.f32.mrf.mxu3  ;;  %1889 = vst.msk [vmem:[#allocation2 + $0x20] sm:$0xff] %vm455_vm2, %v1857_v16  ;;  %v792_v23 = vadd.f32 %v724_v21, %v496_v20  ;;  %v4609_v16 = vld [vmem:[%s4791_s29 + $0x90] sm:$0xff] }
 0x110   : > { %v855_v25 = vld [vmem:[#allocation2 + $0x38] sm:$0xff] }
 0x111   : > { %v1146_v27 = vadd.f32 %v1076_v15, %v855_v25  ;;  %824 = vst.msk [vmem:[#allocation2 + $0x40] sm:$0xff] %vm455_vm2, %v792_v23  ;;  %3740 = vmatmul.msk.bf16.gmra.mxu1 %vm313_vm1, %v4559_v17 }
 0x112   : > { %v5019_v26 = vpop.f32.mrf.mxu0  ;;  %v1209_v28 = vld [vmem:[#allocation2 + $0x30] sm:$0xff] }
 0x113   : > { %3852 = vmatmul.msk.bf16.gmra.mxu2 %vm313_vm1, %v4575_v18  ;;  %v1504_v29 = vadd.f32 %v1433_v5, %v1209_v28  ;;  %1178 = vst.msk [vmem:[#allocation2 + $0x38] sm:$0xff] %vm455_vm2, %v1146_v27 }
 0x114   : > { %3964 = vmatmul.msk.bf16.gmra.mxu3 %vm313_vm1, %v4591_v22  ;;  %v1567_v30 = vld [vmem:[#allocation2 + $0x28] sm:$0xff] }
 0x115   : > { %4076 = vmatmul.msk.bf16.gmra.mxu0 %vm313_vm1, %v4607_v24  ;;  %1536 = vst.msk [vmem:[#allocation2 + $0x30] sm:$0xff] %vm455_vm2, %v1504_v29  ;;  %v1858_v32 = vadd.f32 %v4986_v46, %v1567_v30  ;;  %v4576_v46 = vld [vmem:[%s4791_s29 + $0x78] sm:$0xff] }
 0x116   : > { %v1079_v31 = vpop.f32.mrf.mxu2  ;;  %v726_v35 = vpop.f32.mrf.mxu1 }
 0x117   : > { %v1438_v33 = vpop.f32.mrf.mxu3  ;;  %1890 = vst.msk [vmem:[#allocation2 + $0x28] sm:$0xff] %vm455_vm2, %v1858_v32  ;;  %v793_v36 = vadd.f32 %v726_v35, %v497_v34 }
 0x118   : > { %v856_v37 = vld [vmem:[#allocation2 + $0x40] sm:$0xff] }
 0x119   : > { %v1147_v39 = vadd.f32 %v1079_v31, %v856_v37  ;;  %825 = vst.msk [vmem:[#allocation2 + $0x48] sm:$0xff] %vm455_vm2, %v793_v36  ;;  %v4562_v37 = vld [vmem:[%s4791_s29 + $0x80] sm:$0xff] }
 0x11a   : > { %v5030_v38 = vpop.f32.mrf.mxu0  ;;  %v1210_v40 = vld [vmem:[#allocation2 + $0x38] sm:$0xff] }
 0x11b   : > { %v1505_v41 = vadd.f32 %v1435_v19, %v1210_v40  ;;  %1179 = vst.msk [vmem:[#allocation2 + $0x40] sm:$0xff] %vm455_vm2, %v1147_v39  ;;  %v502_v40 = vld [vmem:[#allocation2 + $0x70] sm:$0xff] }
 0x11c   : > { %v1568_v42 = vld [vmem:[#allocation2 + $0x30] sm:$0xff] }
 0x11d   : > { %1537 = vst.msk [vmem:[#allocation2 + $0x38] sm:$0xff] %vm455_vm2, %v1505_v41  ;;  %v1859_v44 = vadd.f32 %v4997_v62, %v1568_v42  ;;  %v499_v62 = vld [vmem:[#allocation2 + $0x58] sm:$0xff]  ;;  %v4594_v42 = vld [vmem:[%s4791_s29 + $0x90] sm:$0xff] }
 0x11e   : > { %v1081_v43 = vpop.f32.mrf.mxu2  ;;  %v729_v49 = vpop.f32.mrf.mxu1 }
 0x11f   : > { %v1440_v47 = vpop.f32.mrf.mxu3  ;;  %1891 = vst.msk [vmem:[#allocation2 + $0x30] sm:$0xff] %vm455_vm2, %v1859_v44  ;;  %v794_v51 = vadd.f32 %v729_v49, %v498_v48  ;;  %v4610_v44 = vld [vmem:[%s4791_s29 + $0x98] sm:$0xff] }
 0x120   : > { %v857_v53 = vld [vmem:[#allocation2 + $0x48] sm:$0xff] }
 0x121   : > { %v1148_v55 = vadd.f32 %v1081_v43, %v857_v53  ;;  %826 = vst.msk [vmem:[#allocation2 + $0x50] sm:$0xff] %vm455_vm2, %v794_v51  ;;  %3741 = vmatmul.msk.bf16.gmra.mxu1 %vm313_vm1, %v4560_v45 }
 0x122   : > { %v5041_v54 = vpop.f32.mrf.mxu0  ;;  %v1211_v56 = vld [vmem:[#allocation2 + $0x40] sm:$0xff] }
 0x123   : > { %3853 = vmatmul.msk.bf16.gmra.mxu2 %vm313_vm1, %v4576_v46  ;;  %v1506_v57 = vadd.f32 %v1438_v33, %v1211_v56  ;;  %1180 = vst.msk [vmem:[#allocation2 + $0x48] sm:$0xff] %vm455_vm2, %v1148_v55 }
 0x124   : > { %3965 = vmatmul.msk.bf16.gmra.mxu3 %vm313_vm1, %v4592_v50  ;;  %v1569_v58 = vld [vmem:[#allocation2 + $0x38] sm:$0xff] }
 0x125   : > { %4077 = vmatmul.msk.bf16.gmra.mxu0 %vm313_vm1, %v4608_v52  ;;  %1538 = vst.msk [vmem:[#allocation2 + $0x40] sm:$0xff] %vm455_vm2, %v1506_v57  ;;  %v1860_v60 = vadd.f32 %v5008_v10, %v1569_v58  ;;  %v4577_v10 = vld [vmem:[%s4791_s29 + $0x80] sm:$0xff] }
 0x126   : > { %v1084_v59 = vpop.f32.mrf.mxu2  ;;  %v731_v63 = vpop.f32.mrf.mxu1 }
 0x127   : > { %v1443_v61 = vpop.f32.mrf.mxu3  ;;  %1892 = vst.msk [vmem:[#allocation2 + $0x38] sm:$0xff] %vm455_vm2, %v1860_v60  ;;  %v795_v0 = vadd.f32 %v731_v63, %v499_v62 }
 0x128   : > { %v858_v1 = vld [vmem:[#allocation2 + $0x50] sm:$0xff] }
 0x129   : > { %v1149_v3 = vadd.f32 %v1084_v59, %v858_v1  ;;  %827 = vst.msk [vmem:[#allocation2 + $0x58] sm:$0xff] %vm455_vm2, %v795_v0  ;;  %v4611_v1 = vld [vmem:[%s4791_s29 + $0x28] sm:$0xff] }
 0x12a   : > { %v5052_v2 = vpop.f32.mrf.mxu0  ;;  %v1212_v4 = vld [vmem:[#allocation2 + $0x48] sm:$0xff] }
 0x12b   : > { %v1507_v5 = vadd.f32 %v1440_v47, %v1212_v4  ;;  %1181 = vst.msk [vmem:[#allocation2 + $0x50] sm:$0xff] %vm455_vm2, %v1149_v3  ;;  %v504_v4 = vld [vmem:[#allocation2 + $0x80] sm:$0xff] }
 0x12c   : > { %v1570_v6 = vld [vmem:[#allocation2 + $0x40] sm:$0xff] }
 0x12d   : > { %1539 = vst.msk [vmem:[#allocation2 + $0x48] sm:$0xff] %vm455_vm2, %v1507_v5  ;;  %v1861_v8 = vadd.f32 %v5019_v26, %v1570_v6  ;;  %v501_v26 = vld [vmem:[#allocation2 + $0x68] sm:$0xff]  ;;  %v4643_v6 = vld [vmem:[%s4791_s29 + $0x38] sm:$0xff] }
 0x12e   : > { %v1086_v7 = vpop.f32.mrf.mxu2  ;;  %v734_v13 = vpop.f32.mrf.mxu1 }
 0x12f   : > { %v1445_v11 = vpop.f32.mrf.mxu3  ;;  %1893 = vst.msk [vmem:[#allocation2 + $0x40] sm:$0xff] %vm455_vm2, %v1861_v8  ;;  %v796_v15 = vadd.f32 %v734_v13, %v500_v12  ;;  %v4659_v8 = vld [vmem:[%s4791_s29 + $0x40] sm:$0xff] }
 0x130   : > { %v859_v17 = vld [vmem:[#allocation2 + $0x58] sm:$0xff] }
 0x131   : > { %v1150_v19 = vadd.f32 %v1086_v7, %v859_v17  ;;  %828 = vst.msk [vmem:[#allocation2 + $0x60] sm:$0xff] %vm455_vm2, %v796_v15  ;;  %3742 = vmatmul.msk.bf16.gmra.mxu1 %vm313_vm1, %v4561_v9 }
 0x132   : > { %v5063_v18 = vpop.f32.mrf.mxu0  ;;  %v1213_v20 = vld [vmem:[#allocation2 + $0x50] sm:$0xff] }
 0x133   : > { %3854 = vmatmul.msk.bf16.gmra.mxu2 %vm313_vm1, %v4577_v10  ;;  %v1508_v21 = vadd.f32 %v1443_v61, %v1213_v20  ;;  %1182 = vst.msk [vmem:[#allocation2 + $0x58] sm:$0xff] %vm455_vm2, %v1150_v19 }
 0x134   : > { %3966 = vmatmul.msk.bf16.gmra.mxu3 %vm313_vm1, %v4593_v14  ;;  %v1571_v22 = vld [vmem:[#allocation2 + $0x48] sm:$0xff] }
 0x135   : > { %4078 = vmatmul.msk.bf16.gmra.mxu0 %vm313_vm1, %v4609_v16  ;;  %1540 = vst.msk [vmem:[#allocation2 + $0x50] sm:$0xff] %vm455_vm2, %v1508_v21  ;;  %v1862_v24 = vadd.f32 %v5030_v38, %v1571_v22  ;;  %v4578_v38 = vld [vmem:[%s4791_s29 + $0x88] sm:$0xff] }
 0x136   : > { %v1089_v23 = vpop.f32.mrf.mxu2  ;;  %v736_v27 = vpop.f32.mrf.mxu1 }
 0x137   : > { %v1448_v25 = vpop.f32.mrf.mxu3  ;;  %1894 = vst.msk [vmem:[#allocation2 + $0x48] sm:$0xff] %vm455_vm2, %v1862_v24  ;;  %v797_v28 = vadd.f32 %v736_v27, %v501_v26 }
 0x138   : > { %v860_v29 = vld [vmem:[#allocation2 + $0x60] sm:$0xff] }
 0x139   : > { %v1151_v31 = vadd.f32 %v1089_v23, %v860_v29  ;;  %829 = vst.msk [vmem:[#allocation2 + $0x68] sm:$0xff] %vm455_vm2, %v797_v28  ;;  %v4612_v29 = vld [vmem:[%s4791_s29 + $0x30] sm:$0xff] }
 0x13a   : > { %v5074_v30 = vpop.f32.mrf.mxu0  ;;  %v1214_v32 = vld [vmem:[#allocation2 + $0x58] sm:$0xff] }
 0x13b   : > { %v1509_v33 = vadd.f32 %v1445_v11, %v1214_v32  ;;  %1183 = vst.msk [vmem:[#allocation2 + $0x60] sm:$0xff] %vm455_vm2, %v1151_v31  ;;  %v506_v32 = vld [vmem:[#allocation2 + $0x90] sm:$0xff] }
 0x13c   : > { %v1572_v34 = vld [vmem:[#allocation2 + $0x50] sm:$0xff] }
 0x13d   : > { %1541 = vst.msk [vmem:[#allocation2 + $0x58] sm:$0xff] %vm455_vm2, %v1509_v33  ;;  %v1863_v36 = vadd.f32 %v5041_v54, %v1572_v34  ;;  %v503_v54 = vld [vmem:[#allocation2 + $0x78] sm:$0xff]  ;;  %v4644_v34 = vld [vmem:[%s4791_s29 + $0x40] sm:$0xff] }
 0x13e   : > { %v1091_v35 = vpop.f32.mrf.mxu2  ;;  %v739_v41 = vpop.f32.mrf.mxu1 }
 0x13f   : > { %v1450_v39 = vpop.f32.mrf.mxu3  ;;  %1895 = vst.msk [vmem:[#allocation2 + $0x50] sm:$0xff] %vm455_vm2, %v1863_v36  ;;  %v798_v43 = vadd.f32 %v739_v41, %v502_v40  ;;  %v4660_v36 = vld [vmem:[%s4791_s29 + $0x48] sm:$0xff] }
 0x140   : > { %v861_v45 = vld [vmem:[#allocation2 + $0x68] sm:$0xff] }
 0x141   : > { %v1152_v47 = vadd.f32 %v1091_v35, %v861_v45  ;;  %830 = vst.msk [vmem:[#allocation2 + $0x70] sm:$0xff] %vm455_vm2, %v798_v43  ;;  %3743 = vmatmul.msk.bf16.gmra.mxu1 %vm313_vm1, %v4562_v37 }
 0x142   : > { %v5085_v46 = vpop.f32.mrf.mxu0  ;;  %v1215_v48 = vld [vmem:[#allocation2 + $0x60] sm:$0xff] }
 0x143   : > { %3855 = vmatmul.msk.bf16.gmra.mxu2 %vm313_vm1, %v4578_v38  ;;  %v1510_v49 = vadd.f32 %v1448_v25, %v1215_v48  ;;  %1184 = vst.msk [vmem:[#allocation2 + $0x68] sm:$0xff] %vm455_vm2, %v1152_v47 }
 0x144   : > { %3967 = vmatmul.msk.bf16.gmra.mxu3 %vm313_vm1, %v4594_v42  ;;  %v1573_v50 = vld [vmem:[#allocation2 + $0x58] sm:$0xff] }
 0x145   : > { %4079 = vmatmul.msk.bf16.gmra.mxu0 %vm313_vm1, %v4610_v44  ;;  %1542 = vst.msk [vmem:[#allocation2 + $0x60] sm:$0xff] %vm455_vm2, %v1510_v49  ;;  %v1864_v52 = vadd.f32 %v5052_v2, %v1573_v50  ;;  %v4627_v2 = vld [vmem:[%s4791_s29 + $0x30] sm:$0xff] }
 0x146   : > { %v1094_v51 = vpop.f32.mrf.mxu2  ;;  %v741_v55 = vpop.f32.mrf.mxu1 }
 0x147   : > { %v1453_v53 = vpop.f32.mrf.mxu3  ;;  %1896 = vst.msk [vmem:[#allocation2 + $0x58] sm:$0xff] %vm455_vm2, %v1864_v52  ;;  %v799_v56 = vadd.f32 %v741_v55, %v503_v54 }
 0x148   : > { %v862_v57 = vld [vmem:[#allocation2 + $0x70] sm:$0xff] }
 0x149   : > { %v1153_v59 = vadd.f32 %v1094_v51, %v862_v57  ;;  %831 = vst.msk [vmem:[#allocation2 + $0x78] sm:$0xff] %vm455_vm2, %v799_v56  ;;  %v4613_v57 = vld [vmem:[%s4791_s29 + $0x38] sm:$0xff] }
 0x14a   : > { %v5096_v58 = vpop.f32.mrf.mxu0  ;;  %v1216_v60 = vld [vmem:[#allocation2 + $0x68] sm:$0xff] }
 0x14b   : > { %v1511_v61 = vadd.f32 %v1450_v39, %v1216_v60  ;;  %1185 = vst.msk [vmem:[#allocation2 + $0x70] sm:$0xff] %vm455_vm2, %v1153_v59  ;;  %v508_v60 = vld [vmem:[#allocation2 + $0xa0] sm:$0xff] }
 0x14c   : > { %v1574_v62 = vld [vmem:[#allocation2 + $0x60] sm:$0xff] }
 0x14d   : > { %1543 = vst.msk [vmem:[#allocation2 + $0x68] sm:$0xff] %vm455_vm2, %v1511_v61  ;;  %v1865_v0 = vadd.f32 %v5063_v18, %v1574_v62  ;;  %v505_v18 = vld [vmem:[#allocation2 + $0x88] sm:$0xff] }
 0x14e   : > { %v1096_v63 = vpop.f32.mrf.mxu2  ;;  %v744_v5 = vpop.f32.mrf.mxu1  ;;  %v4645_v62 = vld [vmem:[%s4791_s29 + $0x48] sm:$0xff] }
 0x14f   : > { %v1455_v3 = vpop.f32.mrf.mxu3  ;;  %1897 = vst.msk [vmem:[#allocation2 + $0x60] sm:$0xff] %vm455_vm2, %v1865_v0  ;;  %v800_v7 = vadd.f32 %v744_v5, %v504_v4  ;;  %v4661_v0 = vld [vmem:[%s4791_s29 + $0x50] sm:$0xff] }
 0x150   : > { %v863_v9 = vld [vmem:[#allocation2 + $0x78] sm:$0xff] }
 0x151   : > { %v1154_v11 = vadd.f32 %v1096_v63, %v863_v9  ;;  %832 = vst.msk [vmem:[#allocation2 + $0x80] sm:$0xff] %vm455_vm2, %v800_v7  ;;  %4176 = vmatmul.msk.bf16.vlgmr.msra.gmra.mxu1 %vm313_vm1, %v4611_v1 }
 0x152   : > { %v5107_v10 = vpop.f32.mrf.mxu0  ;;  %v1217_v12 = vld [vmem:[#allocation2 + $0x70] sm:$0xff] }
 0x153   : > { %4288 = vmatmul.msk.bf16.vlgmr.msra.gmra.mxu2 %vm313_vm1, %v4627_v2  ;;  %v1512_v13 = vadd.f32 %v1453_v53, %v1217_v12  ;;  %1186 = vst.msk [vmem:[#allocation2 + $0x78] sm:$0xff] %vm455_vm2, %v1154_v11 }
 0x154   : > { %4400 = vmatmul.msk.bf16.vlgmr.msra.gmra.mxu3 %vm313_vm1, %v4643_v6  ;;  %v1575_v14 = vld [vmem:[#allocation2 + $0x68] sm:$0xff] }
 0x155   : > { %4512 = vmatmul.msk.bf16.vlgmr.msra.gmra.mxu0 %vm313_vm1, %v4659_v8  ;;  %1544 = vst.msk [vmem:[#allocation2 + $0x70] sm:$0xff] %vm455_vm2, %v1512_v13  ;;  %v1866_v16 = vadd.f32 %v5074_v30, %v1575_v14  ;;  %v4628_v30 = vld [vmem:[%s4791_s29 + $0x38] sm:$0xff] }
 0x156   : > { %v1099_v15 = vpop.f32.mrf.mxu2  ;;  %v746_v19 = vpop.f32.mrf.mxu1 }
 0x157   : > { %v1458_v17 = vpop.f32.mrf.mxu3  ;;  %1898 = vst.msk [vmem:[#allocation2 + $0x68] sm:$0xff] %vm455_vm2, %v1866_v16  ;;  %v801_v20 = vadd.f32 %v746_v19, %v505_v18 }
 0x158   : > { %v864_v21 = vld [vmem:[#allocation2 + $0x80] sm:$0xff] }
 0x159   : > { %v1155_v23 = vadd.f32 %v1099_v15, %v864_v21  ;;  %833 = vst.msk [vmem:[#allocation2 + $0x88] sm:$0xff] %vm455_vm2, %v801_v20  ;;  %v4614_v21 = vld [vmem:[%s4791_s29 + $0x40] sm:$0xff] }
 0x15a   : > { %v5118_v22 = vpop.f32.mrf.mxu0  ;;  %v1218_v24 = vld [vmem:[#allocation2 + $0x78] sm:$0xff] }
 0x15b   : > { %v1513_v25 = vadd.f32 %v1455_v3, %v1218_v24  ;;  %1187 = vst.msk [vmem:[#allocation2 + $0x80] sm:$0xff] %vm455_vm2, %v1155_v23  ;;  %v510_v24 = vld [vmem:[#allocation2 + $0xb0] sm:$0xff] }
 0x15c   : > { %v1576_v26 = vld [vmem:[#allocation2 + $0x70] sm:$0xff] }
 0x15d   : > { %1545 = vst.msk [vmem:[#allocation2 + $0x78] sm:$0xff] %vm455_vm2, %v1513_v25  ;;  %v1867_v28 = vadd.f32 %v5085_v46, %v1576_v26  ;;  %v507_v46 = vld [vmem:[#allocation2 + $0x98] sm:$0xff]  ;;  %v4646_v26 = vld [vmem:[%s4791_s29 + $0x50] sm:$0xff] }
 0x15e   : > { %v1101_v27 = vpop.f32.mrf.mxu2  ;;  %v749_v33 = vpop.f32.mrf.mxu1 }
 0x15f   : > { %v1460_v31 = vpop.f32.mrf.mxu3  ;;  %1899 = vst.msk [vmem:[#allocation2 + $0x70] sm:$0xff] %vm455_vm2, %v1867_v28  ;;  %v802_v35 = vadd.f32 %v749_v33, %v506_v32  ;;  %v4662_v28 = vld [vmem:[%s4791_s29 + $0x58] sm:$0xff] }
 0x160   : > { %v865_v37 = vld [vmem:[#allocation2 + $0x88] sm:$0xff] }
 0x161   : > { %v1156_v39 = vadd.f32 %v1101_v27, %v865_v37  ;;  %834 = vst.msk [vmem:[#allocation2 + $0x90] sm:$0xff] %vm455_vm2, %v802_v35  ;;  %4177 = vmatmul.msk.bf16.gmra.mxu1 %vm313_vm1, %v4612_v29 }
 0x162   : > { %v5129_v38 = vpop.f32.mrf.mxu0  ;;  %v1219_v40 = vld [vmem:[#allocation2 + $0x80] sm:$0xff] }
 0x163   : > { %4289 = vmatmul.msk.bf16.gmra.mxu2 %vm313_vm1, %v4628_v30  ;;  %v1514_v41 = vadd.f32 %v1458_v17, %v1219_v40  ;;  %1188 = vst.msk [vmem:[#allocation2 + $0x88] sm:$0xff] %vm455_vm2, %v1156_v39 }
 0x164   : > { %4401 = vmatmul.msk.bf16.gmra.mxu3 %vm313_vm1, %v4644_v34  ;;  %v1577_v42 = vld [vmem:[#allocation2 + $0x78] sm:$0xff] }
 0x165   : > { %4513 = vmatmul.msk.bf16.gmra.mxu0 %vm313_vm1, %v4660_v36  ;;  %1546 = vst.msk [vmem:[#allocation2 + $0x80] sm:$0xff] %vm455_vm2, %v1514_v41  ;;  %v1868_v44 = vadd.f32 %v5096_v58, %v1577_v42  ;;  %v4629_v58 = vld [vmem:[%s4791_s29 + $0x40] sm:$0xff] }
 0x166   : > { %v1104_v43 = vpop.f32.mrf.mxu2  ;;  %v751_v47 = vpop.f32.mrf.mxu1 }
 0x167   : > { %v1463_v45 = vpop.f32.mrf.mxu3  ;;  %1900 = vst.msk [vmem:[#allocation2 + $0x78] sm:$0xff] %vm455_vm2, %v1868_v44  ;;  %v803_v48 = vadd.f32 %v751_v47, %v507_v46 }
 0x168   : > { %v866_v49 = vld [vmem:[#allocation2 + $0x90] sm:$0xff] }
 0x169   : > { %v1157_v51 = vadd.f32 %v1104_v43, %v866_v49  ;;  %835 = vst.msk [vmem:[#allocation2 + $0x98] sm:$0xff] %vm455_vm2, %v803_v48  ;;  %v4615_v49 = vld [vmem:[%s4791_s29 + $0x48] sm:$0xff] }
 0x16a   : > { %v5140_v50 = vpop.f32.mrf.mxu0  ;;  %v1220_v52 = vld [vmem:[#allocation2 + $0x88] sm:$0xff] }
 0x16b   : > { %v1515_v53 = vadd.f32 %v1460_v31, %v1220_v52  ;;  %1189 = vst.msk [vmem:[#allocation2 + $0x90] sm:$0xff] %vm455_vm2, %v1157_v51  ;;  %v512_v52 = vld [vmem:[#allocation2 + $0xc0] sm:$0xff] }
 0x16c   : > { %v1578_v54 = vld [vmem:[#allocation2 + $0x80] sm:$0xff] }
 0x16d   : > { %1547 = vst.msk [vmem:[#allocation2 + $0x88] sm:$0xff] %vm455_vm2, %v1515_v53  ;;  %v1869_v56 = vadd.f32 %v5107_v10, %v1578_v54  ;;  %v509_v10 = vld [vmem:[#allocation2 + $0xa8] sm:$0xff]  ;;  %v4647_v54 = vld [vmem:[%s4791_s29 + $0x58] sm:$0xff] }
 0x16e   : > { %v1106_v55 = vpop.f32.mrf.mxu2  ;;  %v754_v61 = vpop.f32.mrf.mxu1 }
 0x16f   : > { %v1465_v59 = vpop.f32.mrf.mxu3  ;;  %1901 = vst.msk [vmem:[#allocation2 + $0x80] sm:$0xff] %vm455_vm2, %v1869_v56  ;;  %v804_v63 = vadd.f32 %v754_v61, %v508_v60  ;;  %v4663_v56 = vld [vmem:[%s4791_s29 + $0x60] sm:$0xff] }
 0x170   : > { %v867_v1 = vld [vmem:[#allocation2 + $0x98] sm:$0xff] }
 0x171   : > { %v1158_v3 = vadd.f32 %v1106_v55, %v867_v1  ;;  %836 = vst.msk [vmem:[#allocation2 + $0xa0] sm:$0xff] %vm455_vm2, %v804_v63  ;;  %4178 = vmatmul.msk.bf16.gmra.mxu1 %vm313_vm1, %v4613_v57 }
 0x172   : > { %v5151_v2 = vpop.f32.mrf.mxu0  ;;  %v1221_v4 = vld [vmem:[#allocation2 + $0x90] sm:$0xff] }
 0x173   : > { %4290 = vmatmul.msk.bf16.gmra.mxu2 %vm313_vm1, %v4629_v58  ;;  %v1516_v5 = vadd.f32 %v1463_v45, %v1221_v4  ;;  %1190 = vst.msk [vmem:[#allocation2 + $0x98] sm:$0xff] %vm455_vm2, %v1158_v3 }
 0x174   : > { %4402 = vmatmul.msk.bf16.gmra.mxu3 %vm313_vm1, %v4645_v62  ;;  %v1579_v6 = vld [vmem:[#allocation2 + $0x88] sm:$0xff] }
 0x175   : > { %4514 = vmatmul.msk.bf16.gmra.mxu0 %vm313_vm1, %v4661_v0  ;;  %1548 = vst.msk [vmem:[#allocation2 + $0x90] sm:$0xff] %vm455_vm2, %v1516_v5  ;;  %v1870_v8 = vadd.f32 %v5118_v22, %v1579_v6  ;;  %v4630_v22 = vld [vmem:[%s4791_s29 + $0x48] sm:$0xff] }
 0x176   : > { %v1109_v7 = vpop.f32.mrf.mxu2  ;;  %v756_v11 = vpop.f32.mrf.mxu1 }
 0x177   : > { %v1468_v9 = vpop.f32.mrf.mxu3  ;;  %1902 = vst.msk [vmem:[#allocation2 + $0x88] sm:$0xff] %vm455_vm2, %v1870_v8  ;;  %v805_v12 = vadd.f32 %v756_v11, %v509_v10 }
 0x178   : > { %v868_v13 = vld [vmem:[#allocation2 + $0xa0] sm:$0xff] }
 0x179   : > { %v1159_v15 = vadd.f32 %v1109_v7, %v868_v13  ;;  %837 = vst.msk [vmem:[#allocation2 + $0xa8] sm:$0xff] %vm455_vm2, %v805_v12  ;;  %v4616_v13 = vld [vmem:[%s4791_s29 + $0x50] sm:$0xff] }
 0x17a   : > { %v5162_v14 = vpop.f32.mrf.mxu0  ;;  %v1222_v16 = vld [vmem:[#allocation2 + $0x98] sm:$0xff] }
 0x17b   : > { %v1517_v17 = vadd.f32 %v1465_v59, %v1222_v16  ;;  %1191 = vst.msk [vmem:[#allocation2 + $0xa0] sm:$0xff] %vm455_vm2, %v1159_v15  ;;  %v514_v16 = vld [vmem:[#allocation2 + $0xd0] sm:$0xff] }
 0x17c   : > { %v1580_v18 = vld [vmem:[#allocation2 + $0x90] sm:$0xff] }
 0x17d   : > { %1549 = vst.msk [vmem:[#allocation2 + $0x98] sm:$0xff] %vm455_vm2, %v1517_v17  ;;  %v1871_v20 = vadd.f32 %v5129_v38, %v1580_v18  ;;  %v511_v38 = vld [vmem:[#allocation2 + $0xb8] sm:$0xff]  ;;  %v4648_v18 = vld [vmem:[%s4791_s29 + $0x60] sm:$0xff] }
 0x17e   : > { %v1111_v19 = vpop.f32.mrf.mxu2  ;;  %v759_v25 = vpop.f32.mrf.mxu1 }
 0x17f   : > { %v1470_v23 = vpop.f32.mrf.mxu3  ;;  %1903 = vst.msk [vmem:[#allocation2 + $0x90] sm:$0xff] %vm455_vm2, %v1871_v20  ;;  %v806_v27 = vadd.f32 %v759_v25, %v510_v24  ;;  %v4664_v20 = vld [vmem:[%s4791_s29 + $0x68] sm:$0xff] }
 0x180   : > { %v869_v29 = vld [vmem:[#allocation2 + $0xa8] sm:$0xff] }
 0x181   : > { %v1160_v31 = vadd.f32 %v1111_v19, %v869_v29  ;;  %838 = vst.msk [vmem:[#allocation2 + $0xb0] sm:$0xff] %vm455_vm2, %v806_v27  ;;  %4179 = vmatmul.msk.bf16.gmra.mxu1 %vm313_vm1, %v4614_v21 }
 0x182   : > { %v5173_v30 = vpop.f32.mrf.mxu0  ;;  %v1223_v32 = vld [vmem:[#allocation2 + $0xa0] sm:$0xff] }
 0x183   : > { %4291 = vmatmul.msk.bf16.gmra.mxu2 %vm313_vm1, %v4630_v22  ;;  %v1518_v33 = vadd.f32 %v1468_v9, %v1223_v32  ;;  %1192 = vst.msk [vmem:[#allocation2 + $0xa8] sm:$0xff] %vm455_vm2, %v1160_v31 }
 0x184   : > { %4403 = vmatmul.msk.bf16.gmra.mxu3 %vm313_vm1, %v4646_v26  ;;  %v1581_v34 = vld [vmem:[#allocation2 + $0x98] sm:$0xff] }
 0x185   : > { %4515 = vmatmul.msk.bf16.gmra.mxu0 %vm313_vm1, %v4662_v28  ;;  %1550 = vst.msk [vmem:[#allocation2 + $0xa0] sm:$0xff] %vm455_vm2, %v1518_v33  ;;  %v1872_v36 = vadd.f32 %v5140_v50, %v1581_v34  ;;  %v4631_v50 = vld [vmem:[%s4791_s29 + $0x50] sm:$0xff] }
 0x186   : > { %v1114_v35 = vpop.f32.mrf.mxu2  ;;  %v761_v39 = vpop.f32.mrf.mxu1 }
 0x187   : > { %v1473_v37 = vpop.f32.mrf.mxu3  ;;  %1904 = vst.msk [vmem:[#allocation2 + $0x98] sm:$0xff] %vm455_vm2, %v1872_v36  ;;  %v807_v40 = vadd.f32 %v761_v39, %v511_v38 }
 0x188   : > { %v870_v41 = vld [vmem:[#allocation2 + $0xb0] sm:$0xff] }
 0x189   : > { %v1161_v43 = vadd.f32 %v1114_v35, %v870_v41  ;;  %839 = vst.msk [vmem:[#allocation2 + $0xb8] sm:$0xff] %vm455_vm2, %v807_v40  ;;  %v4617_v41 = vld [vmem:[%s4791_s29 + $0x58] sm:$0xff] }
 0x18a   : > { %v5184_v42 = vpop.f32.mrf.mxu0  ;;  %v1224_v44 = vld [vmem:[#allocation2 + $0xa8] sm:$0xff] }
 0x18b   : > { %v1519_v45 = vadd.f32 %v1470_v23, %v1224_v44  ;;  %1193 = vst.msk [vmem:[#allocation2 + $0xb0] sm:$0xff] %vm455_vm2, %v1161_v43  ;;  %v516_v44 = vld [vmem:[#allocation2 + $0xe0] sm:$0xff] }
 0x18c   : > { %v1582_v46 = vld [vmem:[#allocation2 + $0xa0] sm:$0xff] }
 0x18d   : > { %1551 = vst.msk [vmem:[#allocation2 + $0xa8] sm:$0xff] %vm455_vm2, %v1519_v45  ;;  %v1873_v48 = vadd.f32 %v5151_v2, %v1582_v46  ;;  %v513_v2 = vld [vmem:[#allocation2 + $0xc8] sm:$0xff] }
 0x18e   : > { %v1116_v47 = vpop.f32.mrf.mxu2  ;;  %v764_v53 = vpop.f32.mrf.mxu1  ;;  %v4649_v46 = vld [vmem:[%s4791_s29 + $0x68] sm:$0xff] }
 0x18f   : > { %v1475_v51 = vpop.f32.mrf.mxu3  ;;  %1905 = vst.msk [vmem:[#allocation2 + $0xa0] sm:$0xff] %vm455_vm2, %v1873_v48  ;;  %v808_v55 = vadd.f32 %v764_v53, %v512_v52  ;;  %v4665_v48 = vld [vmem:[%s4791_s29 + $0x70] sm:$0xff] }
 0x190   : > { %v871_v57 = vld [vmem:[#allocation2 + $0xb8] sm:$0xff] }
 0x191   : > { %v1162_v59 = vadd.f32 %v1116_v47, %v871_v57  ;;  %840 = vst.msk [vmem:[#allocation2 + $0xc0] sm:$0xff] %vm455_vm2, %v808_v55  ;;  %4180 = vmatmul.msk.bf16.gmra.mxu1 %vm313_vm1, %v4615_v49 }
 0x192   : > { %v5195_v58 = vpop.f32.mrf.mxu0  ;;  %v1225_v60 = vld [vmem:[#allocation2 + $0xb0] sm:$0xff] }
 0x193   : > { %4292 = vmatmul.msk.bf16.gmra.mxu2 %vm313_vm1, %v4631_v50  ;;  %v1520_v61 = vadd.f32 %v1473_v37, %v1225_v60  ;;  %1194 = vst.msk [vmem:[#allocation2 + $0xb8] sm:$0xff] %vm455_vm2, %v1162_v59 }
 0x194   : > { %4404 = vmatmul.msk.bf16.gmra.mxu3 %vm313_vm1, %v4647_v54  ;;  %v1583_v62 = vld [vmem:[#allocation2 + $0xa8] sm:$0xff] }
 0x195   : > { %4516 = vmatmul.msk.bf16.gmra.mxu0 %vm313_vm1, %v4663_v56  ;;  %1552 = vst.msk [vmem:[#allocation2 + $0xb0] sm:$0xff] %vm455_vm2, %v1520_v61  ;;  %v1874_v0 = vadd.f32 %v5162_v14, %v1583_v62  ;;  %v4632_v14 = vld [vmem:[%s4791_s29 + $0x58] sm:$0xff] }
 0x196   : > { %v1119_v63 = vpop.f32.mrf.mxu2  ;;  %v766_v3 = vpop.f32.mrf.mxu1 }
 0x197   : > { %v1478_v1 = vpop.f32.mrf.mxu3  ;;  %1906 = vst.msk [vmem:[#allocation2 + $0xa8] sm:$0xff] %vm455_vm2, %v1874_v0  ;;  %v809_v4 = vadd.f32 %v766_v3, %v513_v2 }
 0x198   : > { %v872_v5 = vld [vmem:[#allocation2 + $0xc0] sm:$0xff] }
 0x199   : > { %v1163_v7 = vadd.f32 %v1119_v63, %v872_v5  ;;  %841 = vst.msk [vmem:[#allocation2 + $0xc8] sm:$0xff] %vm455_vm2, %v809_v4  ;;  %v4618_v5 = vld [vmem:[%s4791_s29 + $0x60] sm:$0xff] }
 0x19a   : > { %v5206_v6 = vpop.f32.mrf.mxu0  ;;  %v1226_v8 = vld [vmem:[#allocation2 + $0xb8] sm:$0xff] }
 0x19b   : > { %v1521_v9 = vadd.f32 %v1475_v51, %v1226_v8  ;;  %1195 = vst.msk [vmem:[#allocation2 + $0xc0] sm:$0xff] %vm455_vm2, %v1163_v7  ;;  %v518_v8 = vld [vmem:[#allocation2 + $0xf0] sm:$0xff] }
 0x19c   : > { %v1584_v10 = vld [vmem:[#allocation2 + $0xb0] sm:$0xff] }
 0x19d   : > { %1553 = vst.msk [vmem:[#allocation2 + $0xb8] sm:$0xff] %vm455_vm2, %v1521_v9  ;;  %v1875_v12 = vadd.f32 %v5173_v30, %v1584_v10  ;;  %v515_v30 = vld [vmem:[#allocation2 + $0xd8] sm:$0xff]  ;;  %v4650_v10 = vld [vmem:[%s4791_s29 + $0x70] sm:$0xff] }
 0x19e   : > { %v1121_v11 = vpop.f32.mrf.mxu2  ;;  %v769_v17 = vpop.f32.mrf.mxu1 }
 0x19f   : > { %v1480_v15 = vpop.f32.mrf.mxu3  ;;  %1907 = vst.msk [vmem:[#allocation2 + $0xb0] sm:$0xff] %vm455_vm2, %v1875_v12  ;;  %v810_v19 = vadd.f32 %v769_v17, %v514_v16  ;;  %v4666_v12 = vld [vmem:[%s4791_s29 + $0x78] sm:$0xff] }
 0x1a0   : > { %v873_v21 = vld [vmem:[#allocation2 + $0xc8] sm:$0xff] }
 0x1a1   : > { %v1164_v23 = vadd.f32 %v1121_v11, %v873_v21  ;;  %842 = vst.msk [vmem:[#allocation2 + $0xd0] sm:$0xff] %vm455_vm2, %v810_v19  ;;  %4181 = vmatmul.msk.bf16.gmra.mxu1 %vm313_vm1, %v4616_v13 }
 0x1a2   : > { %v5217_v22 = vpop.f32.mrf.mxu0  ;;  %v1227_v24 = vld [vmem:[#allocation2 + $0xc0] sm:$0xff] }
 0x1a3   : > { %4293 = vmatmul.msk.bf16.gmra.mxu2 %vm313_vm1, %v4632_v14  ;;  %v1522_v25 = vadd.f32 %v1478_v1, %v1227_v24  ;;  %1196 = vst.msk [vmem:[#allocation2 + $0xc8] sm:$0xff] %vm455_vm2, %v1164_v23 }
 0x1a4   : > { %4405 = vmatmul.msk.bf16.gmra.mxu3 %vm313_vm1, %v4648_v18  ;;  %v1585_v26 = vld [vmem:[#allocation2 + $0xb8] sm:$0xff] }
 0x1a5   : > { %4517 = vmatmul.msk.bf16.gmra.mxu0 %vm313_vm1, %v4664_v20  ;;  %1554 = vst.msk [vmem:[#allocation2 + $0xc0] sm:$0xff] %vm455_vm2, %v1522_v25  ;;  %v1876_v28 = vadd.f32 %v5184_v42, %v1585_v26  ;;  %v4633_v42 = vld [vmem:[%s4791_s29 + $0x60] sm:$0xff] }
 0x1a6   : > { %v1124_v27 = vpop.f32.mrf.mxu2  ;;  %v771_v31 = vpop.f32.mrf.mxu1 }
 0x1a7   : > { %v1483_v29 = vpop.f32.mrf.mxu3  ;;  %1908 = vst.msk [vmem:[#allocation2 + $0xb8] sm:$0xff] %vm455_vm2, %v1876_v28  ;;  %v811_v32 = vadd.f32 %v771_v31, %v515_v30 }
 0x1a8   : > { %v874_v33 = vld [vmem:[#allocation2 + $0xd0] sm:$0xff] }
 0x1a9   : > { %v1165_v35 = vadd.f32 %v1124_v27, %v874_v33  ;;  %843 = vst.msk [vmem:[#allocation2 + $0xd8] sm:$0xff] %vm455_vm2, %v811_v32  ;;  %v4619_v33 = vld [vmem:[%s4791_s29 + $0x68] sm:$0xff] }
 0x1aa   : > { %v5228_v34 = vpop.f32.mrf.mxu0  ;;  %v1228_v36 = vld [vmem:[#allocation2 + $0xc8] sm:$0xff] }
 0x1ab   : > { %v1523_v37 = vadd.f32 %v1480_v15, %v1228_v36  ;;  %1197 = vst.msk [vmem:[#allocation2 + $0xd0] sm:$0xff] %vm455_vm2, %v1165_v35  ;;  %v1917_v36 = vld [vmem:[#allocation2] sm:$0xff] }
 0x1ac   : > { %v1586_v38 = vld [vmem:[#allocation2 + $0xc0] sm:$0xff] }
 0x1ad   : > { %1555 = vst.msk [vmem:[#allocation2 + $0xc8] sm:$0xff] %vm455_vm2, %v1523_v37  ;;  %v1877_v40 = vadd.f32 %v5195_v58, %v1586_v38  ;;  %v517_v58 = vld [vmem:[#allocation2 + $0xe8] sm:$0xff]  ;;  %v4651_v38 = vld [vmem:[%s4791_s29 + $0x78] sm:$0xff] }
 0x1ae   : > { %v1126_v39 = vpop.f32.mrf.mxu2  ;;  %v774_v45 = vpop.f32.mrf.mxu1 }
 0x1af   : > { %v1485_v43 = vpop.f32.mrf.mxu3  ;;  %1909 = vst.msk [vmem:[#allocation2 + $0xc0] sm:$0xff] %vm455_vm2, %v1877_v40  ;;  %v812_v47 = vadd.f32 %v774_v45, %v516_v44  ;;  %v4667_v40 = vld [vmem:[%s4791_s29 + $0x80] sm:$0xff] }
 0x1b0   : > { %v875_v49 = vld [vmem:[#allocation2 + $0xd8] sm:$0xff] }
 0x1b1   : > { %v1166_v51 = vadd.f32 %v1126_v39, %v875_v49  ;;  %844 = vst.msk [vmem:[#allocation2 + $0xe0] sm:$0xff] %vm455_vm2, %v812_v47  ;;  %4182 = vmatmul.msk.bf16.gmra.mxu1 %vm313_vm1, %v4617_v41 }
 0x1b2   : > { %v5239_v50 = vpop.f32.mrf.mxu0  ;;  %v1229_v52 = vld [vmem:[#allocation2 + $0xd0] sm:$0xff] }
 0x1b3   : > { %4294 = vmatmul.msk.bf16.gmra.mxu2 %vm313_vm1, %v4633_v42  ;;  %v1524_v53 = vadd.f32 %v1483_v29, %v1229_v52  ;;  %1198 = vst.msk [vmem:[#allocation2 + $0xd8] sm:$0xff] %vm455_vm2, %v1166_v51 }
 0x1b4   : > { %4406 = vmatmul.msk.bf16.gmra.mxu3 %vm313_vm1, %v4649_v46  ;;  %v1587_v54 = vld [vmem:[#allocation2 + $0xc8] sm:$0xff] }
 0x1b5   : > { %4518 = vmatmul.msk.bf16.gmra.mxu0 %vm313_vm1, %v4665_v48  ;;  %1556 = vst.msk [vmem:[#allocation2 + $0xd0] sm:$0xff] %vm455_vm2, %v1524_v53  ;;  %v1878_v56 = vadd.f32 %v5206_v6, %v1587_v54  ;;  %v4634_v6 = vld [vmem:[%s4791_s29 + $0x68] sm:$0xff] }
 0x1b6   : > { %v1129_v55 = vpop.f32.mrf.mxu2  ;;  %v776_v59 = vpop.f32.mrf.mxu1 }
 0x1b7   : > { %v1488_v57 = vpop.f32.mrf.mxu3  ;;  %1910 = vst.msk [vmem:[#allocation2 + $0xc8] sm:$0xff] %vm455_vm2, %v1878_v56  ;;  %v813_v60 = vadd.f32 %v776_v59, %v517_v58 }
 0x1b8   : > { %v876_v61 = vld [vmem:[#allocation2 + $0xe0] sm:$0xff] }
 0x1b9   : > { %v1167_v63 = vadd.f32 %v1129_v55, %v876_v61  ;;  %845 = vst.msk [vmem:[#allocation2 + $0xe8] sm:$0xff] %vm455_vm2, %v813_v60  ;;  %v4620_v61 = vld [vmem:[%s4791_s29 + $0x70] sm:$0xff] }
 0x1ba   : > { %v5250_v62 = vpop.f32.mrf.mxu0  ;;  %v1230_v0 = vld [vmem:[#allocation2 + $0xd8] sm:$0xff] }
 0x1bb   : > { %v1525_v1 = vadd.f32 %v1485_v43, %v1230_v0  ;;  %1199 = vst.msk [vmem:[#allocation2 + $0xe0] sm:$0xff] %vm455_vm2, %v1167_v63  ;;  %v1919_v0 = vld [vmem:[#allocation2 + $0x10] sm:$0xff] }
 0x1bc   : > { %v1588_v2 = vld [vmem:[#allocation2 + $0xd0] sm:$0xff] }
 0x1bd   : > { %1557 = vst.msk [vmem:[#allocation2 + $0xd8] sm:$0xff] %vm455_vm2, %v1525_v1  ;;  %v1879_v4 = vadd.f32 %v5217_v22, %v1588_v2  ;;  %v519_v22 = vld [vmem:[#allocation2 + $0xf8] sm:$0xff]  ;;  %v4652_v2 = vld [vmem:[%s4791_s29 + $0x80] sm:$0xff] }
 0x1be   : > { %v1131_v3 = vpop.f32.mrf.mxu2  ;;  %v779_v9 = vpop.f32.mrf.mxu1 }
 0x1bf   : > { %v1490_v7 = vpop.f32.mrf.mxu3  ;;  %1911 = vst.msk [vmem:[#allocation2 + $0xd0] sm:$0xff] %vm455_vm2, %v1879_v4  ;;  %v814_v11 = vadd.f32 %v779_v9, %v518_v8  ;;  %v4668_v4 = vld [vmem:[%s4791_s29 + $0x88] sm:$0xff] }
 0x1c0   : > { %v877_v13 = vld [vmem:[#allocation2 + $0xe8] sm:$0xff] }
 0x1c1   : > { %v1168_v15 = vadd.f32 %v1131_v3, %v877_v13  ;;  %846 = vst.msk [vmem:[#allocation2 + $0xf0] sm:$0xff] %vm455_vm2, %v814_v11  ;;  %4183 = vmatmul.msk.bf16.gmra.mxu1 %vm313_vm1, %v4618_v5 }
 0x1c2   : > { %v5261_v14 = vpop.f32.mrf.mxu0  ;;  %v1231_v16 = vld [vmem:[#allocation2 + $0xe0] sm:$0xff] }
 0x1c3   : > { %4295 = vmatmul.msk.bf16.gmra.mxu2 %vm313_vm1, %v4634_v6  ;;  %v1526_v17 = vadd.f32 %v1488_v57, %v1231_v16  ;;  %1200 = vst.msk [vmem:[#allocation2 + $0xe8] sm:$0xff] %vm455_vm2, %v1168_v15 }
 0x1c4   : > { %4407 = vmatmul.msk.bf16.gmra.mxu3 %vm313_vm1, %v4650_v10  ;;  %v1589_v18 = vld [vmem:[#allocation2 + $0xd8] sm:$0xff] }
 0x1c5   : > { %4519 = vmatmul.msk.bf16.gmra.mxu0 %vm313_vm1, %v4666_v12  ;;  %1558 = vst.msk [vmem:[#allocation2 + $0xe0] sm:$0xff] %vm455_vm2, %v1526_v17  ;;  %v1880_v20 = vadd.f32 %v5228_v34, %v1589_v18  ;;  %v4635_v34 = vld [vmem:[%s4791_s29 + $0x70] sm:$0xff] }
 0x1c6   : > { %v1134_v19 = vpop.f32.mrf.mxu2  ;;  %v781_v23 = vpop.f32.mrf.mxu1 }
 0x1c7   : > { %v1493_v21 = vpop.f32.mrf.mxu3  ;;  %1912 = vst.msk [vmem:[#allocation2 + $0xd8] sm:$0xff] %vm455_vm2, %v1880_v20  ;;  %v815_v24 = vadd.f32 %v781_v23, %v519_v22 }
 0x1c8   : > { %v878_v25 = vld [vmem:[#allocation2 + $0xf0] sm:$0xff] }
 0x1c9   : > { %v1169_v27 = vadd.f32 %v1134_v19, %v878_v25  ;;  %847 = vst.msk [vmem:[#allocation2 + $0xf8] sm:$0xff] %vm455_vm2, %v815_v24  ;;  %v4621_v25 = vld [vmem:[%s4791_s29 + $0x78] sm:$0xff] }
 0x1ca   : > { %v5272_v26 = vpop.f32.mrf.mxu0  ;;  %v1232_v28 = vld [vmem:[#allocation2 + $0xe8] sm:$0xff] }
 0x1cb   : > { %v1527_v29 = vadd.f32 %v1490_v7, %v1232_v28  ;;  %1201 = vst.msk [vmem:[#allocation2 + $0xf0] sm:$0xff] %vm455_vm2, %v1169_v27  ;;  %v1921_v28 = vld [vmem:[#allocation2 + $0x20] sm:$0xff] }
 0x1cc   : > { %v1590_v30 = vld [vmem:[#allocation2 + $0xe0] sm:$0xff] }
 0x1cd   : > { %1559 = vst.msk [vmem:[#allocation2 + $0xe8] sm:$0xff] %vm455_vm2, %v1527_v29  ;;  %v1881_v32 = vadd.f32 %v5239_v50, %v1590_v30  ;;  %v1918_v50 = vld [vmem:[#allocation2 + $0x8] sm:$0xff] }
 0x1ce   : > { %v1136_v31 = vpop.f32.mrf.mxu2  ;;  %v2132_v37 = vpop.f32.mrf.mxu1  ;;  %v4653_v30 = vld [vmem:[%s4791_s29 + $0x88] sm:$0xff] }
 0x1cf   : > { %v1495_v35 = vpop.f32.mrf.mxu3  ;;  %1913 = vst.msk [vmem:[#allocation2 + $0xe0] sm:$0xff] %vm455_vm2, %v1881_v32  ;;  %v2212_v39 = vadd.f32 %v2132_v37, %v1917_v36  ;;  %v4669_v32 = vld [vmem:[%s4791_s29 + $0x90] sm:$0xff]  ;;  %v5337_v37 = vld [vmem:[%s5663_s2] ss:$0 sm:$0xff] }
 0x1d0   : > { %v879_v41 = vld [vmem:[#allocation2 + $0xf8] sm:$0xff] }
 0x1d1   : > { %v1170_v43 = vadd.f32 %v1136_v31, %v879_v41  ;;  %2244 = vst.msk [vmem:[#allocation2] sm:$0xff] %vm455_vm2, %v2212_v39  ;;  %4184 = vmatmul.msk.bf16.gmra.mxu1 %vm313_vm1, %v4619_v33 }
 0x1d2   : > { %v5283_v42 = vpop.f32.mrf.mxu0  ;;  %v1233_v44 = vld [vmem:[#allocation2 + $0xf0] sm:$0xff] }
 0x1d3   : > { %4296 = vmatmul.msk.bf16.gmra.mxu2 %vm313_vm1, %v4635_v34  ;;  %v1528_v45 = vadd.f32 %v1493_v21, %v1233_v44  ;;  %1202 = vst.msk [vmem:[#allocation2 + $0xf8] sm:$0xff] %vm455_vm2, %v1170_v43  ;;  %v1922_v44 = vld [vmem:[#allocation2 + $0x28] sm:$0xff] }
 0x1d4   : > { %4408 = vmatmul.msk.bf16.gmra.mxu3 %vm313_vm1, %v4651_v38  ;;  %v1591_v46 = vld [vmem:[#allocation2 + $0xe8] sm:$0xff] }
 0x1d5   : > { %4520 = vmatmul.msk.bf16.gmra.mxu0 %vm313_vm1, %v4667_v40  ;;  %1560 = vst.msk [vmem:[#allocation2 + $0xf0] sm:$0xff] %vm455_vm2, %v1528_v45  ;;  %v1882_v48 = vadd.f32 %v5250_v62, %v1591_v46  ;;  %v4636_v62 = vld [vmem:[%s4791_s29 + $0x78] sm:$0xff] }
 0x1d6   : > { %v2487_v47 = vpop.f32.mrf.mxu2  ;;  %v2134_v51 = vpop.f32.mrf.mxu1 }
 0x1d7   : > { %v2846_v49 = vpop.f32.mrf.mxu3  ;;  %1914 = vst.msk [vmem:[#allocation2 + $0xe8] sm:$0xff] %vm455_vm2, %v1882_v48  ;;  %v2213_v52 = vadd.f32 %v2134_v51, %v1918_v50 }
 0x1d8   : > { %v2276_v53 = vld [vmem:[#allocation2] sm:$0xff] }
 0x1d9   : > { %v2567_v55 = vadd.f32 %v2487_v47, %v2276_v53  ;;  %2245 = vst.msk [vmem:[#allocation2 + $0x8] sm:$0xff] %vm455_vm2, %v2213_v52 }
 0x1da   : > { %v5294_v54 = vpop.f32.mrf.mxu0  ;;  %v1234_v56 = vld [vmem:[#allocation2 + $0xf8] sm:$0xff] }
 0x1db   : > { %v1529_v57 = vadd.f32 %v1495_v35, %v1234_v56  ;;  %2599 = vst.msk [vmem:[#allocation2] sm:$0xff] %vm455_vm2, %v2567_v55  ;;  %v4622_v56 = vld [vmem:[%s4791_s29 + $0x80] sm:$0xff] }
 0x1dc   : > { %v1592_v58 = vld [vmem:[#allocation2 + $0xf0] sm:$0xff] }
 0x1dd   : > { %1561 = vst.msk [vmem:[#allocation2 + $0xf8] sm:$0xff] %vm455_vm2, %v1529_v57  ;;  %v1883_v60 = vadd.f32 %v5261_v14, %v1592_v58  ;;  %v1920_v14 = vld [vmem:[#allocation2 + $0x18] sm:$0xff]  ;;  %v4638_v57 = vld [vmem:[%s4791_s29 + $0x88] sm:$0xff] }
 0x1de   : > { %v2489_v59 = vpop.f32.mrf.mxu2  ;;  %v2137_v1 = vpop.f32.mrf.mxu1 }
 0x1df   : > { %v2848_v63 = vpop.f32.mrf.mxu3  ;;  %1915 = vst.msk [vmem:[#allocation2 + $0xf0] sm:$0xff] %vm455_vm2, %v1883_v60  ;;  %v2214_v3 = vadd.f32 %v2137_v1, %v1919_v0  ;;  %v1923_v60 = vld [vmem:[#allocation2 + $0x30] sm:$0xff]  ;;  %v4670_v1 = vld [vmem:[%s4791_s29 + $0x98] sm:$0xff] }
 0x1e0   : > { %v2277_v5 = vld [vmem:[#allocation2 + $0x8] sm:$0xff] }
 0x1e1   : > { %v2568_v7 = vadd.f32 %v2489_v59, %v2277_v5  ;;  %2246 = vst.msk [vmem:[#allocation2 + $0x10] sm:$0xff] %vm455_vm2, %v2214_v3  ;;  %4185 = vmatmul.msk.bf16.gmra.mxu1 %vm313_vm1, %v4620_v61 }
 0x1e2   : > { %v5305_v6 = vpop.f32.mrf.mxu0  ;;  %v2631_v8 = vld [vmem:[#allocation2] sm:$0xff] }
 0x1e3   : > { %4297 = vmatmul.msk.bf16.gmra.mxu2 %vm313_vm1, %v4636_v62  ;;  %v2926_v9 = vadd.f32 %v2846_v49, %v2631_v8  ;;  %2600 = vst.msk [vmem:[#allocation2 + $0x8] sm:$0xff] %vm455_vm2, %v2568_v7  ;;  %v4654_v62 = vld [vmem:[%s4791_s29 + $0x90] sm:$0xff] }
 0x1e4   : > { %4409 = vmatmul.msk.bf16.gmra.mxu3 %vm313_vm1, %v4652_v2  ;;  %v1593_v10 = vld [vmem:[#allocation2 + $0xf8] sm:$0xff] }
 0x1e5   : > { %4521 = vmatmul.msk.bf16.gmra.mxu0 %vm313_vm1, %v4668_v4  ;;  %2958 = vst.msk [vmem:[#allocation2] sm:$0xff] %vm455_vm2, %v2926_v9  ;;  %v1884_v12 = vadd.f32 %v5272_v26, %v1593_v10  ;;  %v4637_v26 = vld [vmem:[%s4791_s29 + $0x80] sm:$0xff] }
 0x1e6   : > { %v2492_v11 = vpop.f32.mrf.mxu2  ;;  %v2139_v15 = vpop.f32.mrf.mxu1 }
 0x1e7   : > { %v2851_v13 = vpop.f32.mrf.mxu3  ;;  %1916 = vst.msk [vmem:[#allocation2 + $0xf8] sm:$0xff] %vm455_vm2, %v1884_v12  ;;  %v2215_v16 = vadd.f32 %v2139_v15, %v1920_v14  ;;  %v1924_v12 = vld [vmem:[#allocation2 + $0x38] sm:$0xff] }
 0x1e8   : > { %v2278_v17 = vld [vmem:[#allocation2 + $0x10] sm:$0xff] }
 0x1e9   : > { %v2569_v19 = vadd.f32 %v2492_v11, %v2278_v17  ;;  %2247 = vst.msk [vmem:[#allocation2 + $0x18] sm:$0xff] %vm455_vm2, %v2215_v16 }
 0x1ea   : > { %v5316_v18 = vpop.f32.mrf.mxu0  ;;  %v2632_v20 = vld [vmem:[#allocation2 + $0x8] sm:$0xff] }
 0x1eb   : > { %v2927_v21 = vadd.f32 %v2848_v63, %v2632_v20  ;;  %2601 = vst.msk [vmem:[#allocation2 + $0x10] sm:$0xff] %vm455_vm2, %v2569_v19 }
 0x1ec   : > { %v2990_v22 = vld [vmem:[#allocation2] sm:$0xff] }
 0x1ed   : > { %2959 = vst.msk [vmem:[#allocation2 + $0x8] sm:$0xff] %vm455_vm2, %v2927_v21  ;;  %v3281_v24 = vadd.f32 %v5283_v42, %v2990_v22 }
 0x1ee   : > { %v2494_v23 = vpop.f32.mrf.mxu2  ;;  %v2142_v29 = vpop.f32.mrf.mxu1 }
 0x1ef   : > { %v2853_v27 = vpop.f32.mrf.mxu3  ;;  %3313 = vst.msk [vmem:[#allocation2] sm:$0xff] %vm455_vm2, %v3281_v24  ;;  %v2216_v31 = vadd.f32 %v2142_v29, %v1921_v28  ;;  %v4623_v24 = vld [vmem:[%s4791_s29 + $0x88] sm:$0xff]  ;;  %v1925_v28 = vld [vmem:[#allocation2 + $0x40] sm:$0xff] }
 0x1f0   : > { %v2279_v33 = vld [vmem:[#allocation2 + $0x18] sm:$0xff] }
 0x1f1   : > { %v2570_v35 = vadd.f32 %v2494_v23, %v2279_v33  ;;  %2248 = vst.msk [vmem:[#allocation2 + $0x20] sm:$0xff] %vm455_vm2, %v2216_v31  ;;  %4186 = vmatmul.msk.bf16.gmra.mxu1 %vm313_vm1, %v4621_v25  ;;  %v4639_v25 = vld [vmem:[%s4791_s29 + $0x90] sm:$0xff]  ;;  %v4671_v33 = vld [vmem:[%s4791_s29 + $0xa0] sm:$0xff] }
 0x1f2   : > { %v5327_v34 = vpop.f32.mrf.mxu0  ;;  %v2633_v36 = vld [vmem:[#allocation2 + $0x10] sm:$0xff] }
 0x1f3   : > { %4298 = vmatmul.msk.bf16.gmra.mxu2 %vm313_vm1, %v4637_v26  ;;  %v2928_v38 = vadd.f32 %v2851_v13, %v2633_v36  ;;  %2602 = vst.msk [vmem:[#allocation2 + $0x18] sm:$0xff] %vm455_vm2, %v2570_v35 }
 0x1f4   : > { %4410 = vmatmul.msk.bf16.gmra.mxu3 %vm313_vm1, %v4653_v30  ;;  %v2991_v39 = vld [vmem:[#allocation2 + $0x8] sm:$0xff]  ;;  %v4655_v30 = vld [vmem:[%s4791_s29 + $0x98] sm:$0xff] }
 0x1f5   : > { %4522 = vmatmul.msk.bf16.gmra.mxu0 %vm313_vm1, %v4669_v32  ;;  %2960 = vst.msk [vmem:[#allocation2 + $0x10] sm:$0xff] %vm455_vm2, %v2928_v38  ;;  %v3282_v41 = vadd.f32 %v5294_v54, %v2991_v39 }
 0x1f6   : > { %v2497_v40 = vpop.f32.mrf.mxu2  ;;  %v3345_v43 = vld [vmem:[#allocation2] sm:$0xff]  ;;  %v2144_v45 = vpop.f32.mrf.mxu1 }
 0x1f7   : > { %v2856_v42 = vpop.f32.mrf.mxu3  ;;  %v3381_v46 = vadd.f32 %v5337_v37, %v3345_v43  ;;  %3314 = vst.msk [vmem:[#allocation2 + $0x8] sm:$0xff] %vm455_vm2, %v3282_v41  ;;  %v2217_v47 = vadd.f32 %v2144_v45, %v1922_v44  ;;  %v1926_v45 = vld [vmem:[#allocation2 + $0x48] sm:$0xff] }
 0x1f8   : > { %v2280_v48 = vld [vmem:[#allocation2 + $0x20] sm:$0xff] }
 0x1f9   : > { %3413 = vst.msk [vmem:[%s5346_s12] sm:$0xff] %vm455_vm2, %v3381_v46  ;;  %v2571_v50 = vadd.f32 %v2497_v40, %v2280_v48 }
 0x1fa   : > { %v5350_v49 = vpop.f32.mrf.mxu0  ;;  %v2634_v51 = vld [vmem:[#allocation2 + $0x18] sm:$0xff]  ;;  %2249 = vst.msk [vmem:[#allocation2 + $0x28] sm:$0xff] %vm455_vm2, %v2217_v47 }
 0x1fb   : > { %v2929_v52 = vadd.f32 %v2853_v27, %v2634_v51  ;;  %2603 = vst.msk [vmem:[#allocation2 + $0x20] sm:$0xff] %vm455_vm2, %v2571_v50 }
 0x1fc   : > { %v2992_v53 = vld [vmem:[#allocation2 + $0x10] sm:$0xff] }
 0x1fd   : > { %2961 = vst.msk [vmem:[#allocation2 + $0x18] sm:$0xff] %vm455_vm2, %v2929_v52  ;;  %v3283_v55 = vadd.f32 %v5305_v6, %v2992_v53 }
 0x1fe   : > { %v2499_v54 = vpop.f32.mrf.mxu2  ;;  %v3346_v59 = vld [vmem:[#allocation2 + $0x8] sm:$0xff]  ;;  %v2147_v61 = vpop.f32.mrf.mxu1 }
 0x1ff   : > { %v2858_v58 = vpop.f32.mrf.mxu3  ;;  %v3382_v63 = vadd.f32 %v5337_v37, %v3346_v59  ;;  %3315 = vst.msk [vmem:[#allocation2 + $0x10] sm:$0xff] %vm455_vm2, %v3283_v55  ;;  %v2218_v0 = vadd.f32 %v2147_v61, %v1923_v60  ;;  %v1927_v60 = vld [vmem:[#allocation2 + $0x50] sm:$0xff] }
 0x201   : > { %3414 = vst.msk [vmem:[%s5346_s12 + $0x8] sm:$0xff] %vm455_vm2, %v3382_v63  ;;  %v2281_v3 = vld [vmem:[#allocation2 + $0x28] sm:$0xff]  ;;  %4187 = vmatmul.msk.bf16.gmra.mxu1 %vm313_vm1, %v4622_v56  ;;  %v4624_v56 = vld [vmem:[%s4791_s29 + $0x90] sm:$0xff] }
 0x202   : > { %v5364_v2 = vpop.f32.mrf.mxu0  ;;  %v2635_v4 = vld [vmem:[#allocation2 + $0x20] sm:$0xff]  ;;  %v2572_v5 = vadd.f32 %v2499_v54, %v2281_v3  ;;  %2250 = vst.msk [vmem:[#allocation2 + $0x30] sm:$0xff] %vm455_vm2, %v2218_v0 }
 0x203   : > { %4299 = vmatmul.msk.bf16.gmra.mxu2 %vm313_vm1, %v4638_v57  ;;  %v2930_v6 = vadd.f32 %v2856_v42, %v2635_v4  ;;  %v4640_v57 = vld [vmem:[%s4791_s29 + $0x98] sm:$0xff] }
 0x204   : > { %4411 = vmatmul.msk.bf16.gmra.mxu3 %vm313_vm1, %v4654_v62  ;;  %2604 = vst.msk [vmem:[#allocation2 + $0x28] sm:$0xff] %vm455_vm2, %v2572_v5  ;;  %v2993_v7 = vld [vmem:[#allocation2 + $0x18] sm:$0xff]  ;;  %v4656_v62 = vld [vmem:[%s4791_s29 + $0xa0] sm:$0xff] }
 0x205   : > { %4523 = vmatmul.msk.bf16.gmra.mxu0 %vm313_vm1, %v4670_v1  ;;  %2962 = vst.msk [vmem:[#allocation2 + $0x20] sm:$0xff] %vm455_vm2, %v2930_v6  ;;  %v3284_v9 = vadd.f32 %v5316_v18, %v2993_v7  ;;  %v4672_v1 = vld [vmem:[%s4791_s29 + $0xa8] sm:$0xff] }
 0x206   : > { %v2502_v8 = vpop.f32.mrf.mxu2  ;;  %v3347_v11 = vld [vmem:[#allocation2 + $0x10] sm:$0xff]  ;;  %v2149_v13 = vpop.f32.mrf.mxu1 }
 0x207   : > { %v2861_v10 = vpop.f32.mrf.mxu3  ;;  %v3383_v14 = vadd.f32 %v5337_v37, %v3347_v11  ;;  %3316 = vst.msk [vmem:[#allocation2 + $0x18] sm:$0xff] %vm455_vm2, %v3284_v9  ;;  %v2219_v15 = vadd.f32 %v2149_v13, %v1924_v12  ;;  %v1928_v12 = vld [vmem:[#allocation2 + $0x58] sm:$0xff] }
 0x209   : > { %3415 = vst.msk [vmem:[%s5346_s12 + $0x10] sm:$0xff] %vm455_vm2, %v3383_v14  ;;  %v2282_v17 = vld [vmem:[#allocation2 + $0x30] sm:$0xff] }
 0x20a   : > { %v5378_v16 = vpop.f32.mrf.mxu0  ;;  %v2573_v19 = vadd.f32 %v2502_v8, %v2282_v17  ;;  %2251 = vst.msk [vmem:[#allocation2 + $0x38] sm:$0xff] %vm455_vm2, %v2219_v15 }
 0x20b   : > { %v2636_v18 = vld [vmem:[#allocation2 + $0x28] sm:$0xff] }
 0x20c   : > { %v2931_v20 = vadd.f32 %v2858_v58, %v2636_v18  ;;  %2605 = vst.msk [vmem:[#allocation2 + $0x30] sm:$0xff] %vm455_vm2, %v2573_v19  ;;  %v2994_v21 = vld [vmem:[#allocation2 + $0x20] sm:$0xff] }
 0x20d   : > { %v3285_v23 = vadd.f32 %v5327_v34, %v2994_v21 }
 0x20e   : > { %v2504_v22 = vpop.f32.mrf.mxu2  ;;  %v3348_v27 = vld [vmem:[#allocation2 + $0x18] sm:$0xff]  ;;  %2963 = vst.msk [vmem:[#allocation2 + $0x28] sm:$0xff] %vm455_vm2, %v2931_v20  ;;  %v2152_v29 = vpop.f32.mrf.mxu1 }
 0x20f   : > { %v2863_v26 = vpop.f32.mrf.mxu3  ;;  %v3384_v31 = vadd.f32 %v5337_v37, %v3348_v27  ;;  %3317 = vst.msk [vmem:[#allocation2 + $0x20] sm:$0xff] %vm455_vm2, %v3285_v23  ;;  %v2220_v32 = vadd.f32 %v2152_v29, %v1925_v28  ;;  %v1929_v28 = vld [vmem:[#allocation2 + $0x60] sm:$0xff] }
 0x211   : > { %3416 = vst.msk [vmem:[%s5346_s12 + $0x18] sm:$0xff] %vm455_vm2, %v3384_v31  ;;  %v2283_v34 = vld [vmem:[#allocation2 + $0x38] sm:$0xff]  ;;  %4188 = vmatmul.msk.bf16.gmra.mxu1 %vm313_vm1, %v4623_v24 }
 0x212   : > { %v5392_v35 = vpop.f32.mrf.mxu0  ;;  %v2574_v36 = vadd.f32 %v2504_v22, %v2283_v34  ;;  %2252 = vst.msk [vmem:[#allocation2 + $0x40] sm:$0xff] %vm455_vm2, %v2220_v32  ;;  %v4625_v24 = vld [vmem:[%s4791_s29 + $0x98] sm:$0xff] }
 0x213   : > { %4300 = vmatmul.msk.bf16.gmra.mxu2 %vm313_vm1, %v4639_v25  ;;  %v2637_v38 = vld [vmem:[#allocation2 + $0x30] sm:$0xff]  ;;  %v4641_v25 = vld [vmem:[%s4791_s29 + $0xa0] sm:$0xff] }
 0x214   : > { %4412 = vmatmul.msk.bf16.gmra.mxu3 %vm313_vm1, %v4655_v30  ;;  %v2932_v39 = vadd.f32 %v2861_v10, %v2637_v38  ;;  %2606 = vst.msk [vmem:[#allocation2 + $0x38] sm:$0xff] %vm455_vm2, %v2574_v36  ;;  %v4657_v30 = vld [vmem:[%s4791_s29 + $0xa8] sm:$0xff] }
 0x215   : > { %4524 = vmatmul.msk.bf16.gmra.mxu0 %vm313_vm1, %v4671_v33  ;;  %v2995_v41 = vld [vmem:[#allocation2 + $0x28] sm:$0xff]  ;;  %v4673_v33 = vld [vmem:[%s4791_s29 + $0xb0] sm:$0xff] }
 0x216   : > { %v2507_v40 = vpop.f32.mrf.mxu2  ;;  %v3349_v43 = vld [vmem:[#allocation2 + $0x20] sm:$0xff]  ;;  %2964 = vst.msk [vmem:[#allocation2 + $0x30] sm:$0xff] %vm455_vm2, %v2932_v39  ;;  %v3286_v44 = vadd.f32 %v5350_v49, %v2995_v41  ;;  %v2154_v46 = vpop.f32.mrf.mxu1 }
 0x217   : > { %v2866_v42 = vpop.f32.mrf.mxu3  ;;  %v3385_v47 = vadd.f32 %v5337_v37, %v3349_v43  ;;  %v2221_v48 = vadd.f32 %v2154_v46, %v1926_v45  ;;  %v1930_v45 = vld [vmem:[#allocation2 + $0x68] sm:$0xff] }
 0x218   : > { %3318 = vst.msk [vmem:[#allocation2 + $0x28] sm:$0xff] %vm455_vm2, %v3286_v44 }
 0x219   : > { %3417 = vst.msk [vmem:[%s5346_s12 + $0x20] sm:$0xff] %vm455_vm2, %v3385_v47  ;;  %v2284_v51 = vld [vmem:[#allocation2 + $0x40] sm:$0xff] }
 0x21a   : > { %v5406_v50 = vpop.f32.mrf.mxu0  ;;  %v2575_v52 = vadd.f32 %v2507_v40, %v2284_v51  ;;  %2253 = vst.msk [vmem:[#allocation2 + $0x48] sm:$0xff] %vm455_vm2, %v2221_v48 }
 0x21b   : > { %v2638_v49 = vld [vmem:[#allocation2 + $0x38] sm:$0xff] }
 0x21c   : > { %v2933_v53 = vadd.f32 %v2863_v26, %v2638_v49  ;;  %2607 = vst.msk [vmem:[#allocation2 + $0x40] sm:$0xff] %vm455_vm2, %v2575_v52 }
 0x21d   : > { %v2996_v55 = vld [vmem:[#allocation2 + $0x30] sm:$0xff] }
 0x21e   : > { %v2509_v54 = vpop.f32.mrf.mxu2  ;;  %2965 = vst.msk [vmem:[#allocation2 + $0x38] sm:$0xff] %vm455_vm2, %v2933_v53  ;;  %v3287_v59 = vadd.f32 %v5364_v2, %v2996_v55  ;;  %v2157_v61 = vpop.f32.mrf.mxu1 }
 0x21f   : > { %v2868_v58 = vpop.f32.mrf.mxu3  ;;  %v3350_v63 = vld [vmem:[#allocation2 + $0x28] sm:$0xff]  ;;  %v2222_v0 = vadd.f32 %v2157_v61, %v1927_v60  ;;  %v1931_v61 = vld [vmem:[#allocation2 + $0x70] sm:$0xff] }
 0x220   : > { %v3386_v3 = vadd.f32 %v5337_v37, %v3350_v63  ;;  %3319 = vst.msk [vmem:[#allocation2 + $0x30] sm:$0xff] %vm455_vm2, %v3287_v59  ;;  %v4642_v59 = vld [vmem:[%s4791_s29 + $0xa8] sm:$0xff]  ;;  %v4658_v63 = vld [vmem:[%s4791_s29 + $0xb0] sm:$0xff] }
 0x221   : > { %v2285_v5 = vld [vmem:[#allocation2 + $0x48] sm:$0xff]  ;;  %2254 = vst.msk [vmem:[#allocation2 + $0x50] sm:$0xff] %vm455_vm2, %v2222_v0  ;;  %4189 = vmatmul.msk.bf16.gmra.mxu1 %vm313_vm1, %v4624_v56 }
 0x222   : > { %v5420_v4 = vpop.f32.mrf.mxu0  ;;  %3418 = vst.msk [vmem:[%s5346_s12 + $0x28] sm:$0xff] %vm455_vm2, %v3386_v3  ;;  %v2576_v2 = vadd.f32 %v2509_v54, %v2285_v5  ;;  %v4674_v3 = vld [vmem:[%s4791_s29 + $0xb8] sm:$0xff] }
 0x223   : > { %4301 = vmatmul.msk.bf16.gmra.mxu2 %vm313_vm1, %v4640_v57  ;;  %v2639_v6 = vld [vmem:[#allocation2 + $0x40] sm:$0xff] }
 0x224   : > { %4413 = vmatmul.msk.bf16.gmra.mxu3 %vm313_vm1, %v4656_v62  ;;  %v2934_v7 = vadd.f32 %v2866_v42, %v2639_v6  ;;  %2608 = vst.msk [vmem:[#allocation2 + $0x48] sm:$0xff] %vm455_vm2, %v2576_v2 }
 0x225   : > { %4525 = vmatmul.msk.bf16.gmra.mxu0 %vm313_vm1, %v4672_v1  ;;  %v2997_v9 = vld [vmem:[#allocation2 + $0x38] sm:$0xff] }
 0x226   : > { %v2512_v8 = vpop.f32.mrf.mxu2  ;;  %2966 = vst.msk [vmem:[#allocation2 + $0x40] sm:$0xff] %vm455_vm2, %v2934_v7  ;;  %v3288_v11 = vadd.f32 %v5378_v16, %v2997_v9  ;;  %v2159_v13 = vpop.f32.mrf.mxu1 }
 0x227   : > { %v2871_v10 = vpop.f32.mrf.mxu3  ;;  %v3351_v14 = vld [vmem:[#allocation2 + $0x30] sm:$0xff]  ;;  %v2223_v15 = vadd.f32 %v2159_v13, %v1928_v12 }
 0x228   : > { %v3387_v17 = vadd.f32 %v5337_v37, %v3351_v14  ;;  %3320 = vst.msk [vmem:[#allocation2 + $0x38] sm:$0xff] %vm455_vm2, %v3288_v11  ;;  %v2286_v19 = vld [vmem:[#allocation2 + $0x50] sm:$0xff]  ;;  %v1932_v14 = vld [vmem:[#allocation2 + $0x78] sm:$0xff] }
 0x229   : > { %v2577_v20 = vadd.f32 %v2512_v8, %v2286_v19  ;;  %2255 = vst.msk [vmem:[#allocation2 + $0x58] sm:$0xff] %vm455_vm2, %v2223_v15 }
 0x22a   : > { %v5434_v18 = vpop.f32.mrf.mxu0  ;;  %3419 = vst.msk [vmem:[%s5346_s12 + $0x30] sm:$0xff] %vm455_vm2, %v3387_v17 }
 0x22b   : > { %v2640_v16 = vld [vmem:[#allocation2 + $0x48] sm:$0xff]  ;;  %2609 = vst.msk [vmem:[#allocation2 + $0x50] sm:$0xff] %vm455_vm2, %v2577_v20 }
 0x22c   : > { %v2935_v21 = vadd.f32 %v2868_v58, %v2640_v16  ;;  %v4626_v58 = vld [vmem:[%s4791_s29 + $0xa0] sm:$0xff] }
 0x22d   : > { %v2998_v23 = vld [vmem:[#allocation2 + $0x40] sm:$0xff] }
 0x22e   : > { %v2514_v22 = vpop.f32.mrf.mxu2  ;;  %2967 = vst.msk [vmem:[#allocation2 + $0x48] sm:$0xff] %vm455_vm2, %v2935_v21  ;;  %v3289_v27 = vadd.f32 %v5392_v35, %v2998_v23  ;;  %v2162_v29 = vpop.f32.mrf.mxu1 }
 0x22f   : > { %v2873_v26 = vpop.f32.mrf.mxu3  ;;  %v3352_v31 = vld [vmem:[#allocation2 + $0x38] sm:$0xff]  ;;  %v2224_v32 = vadd.f32 %v2162_v29, %v1929_v28  ;;  %v1933_v28 = vld [vmem:[#allocation2 + $0x80] sm:$0xff] }
 0x230   : > { %v3388_v34 = vadd.f32 %v5337_v37, %v3352_v31  ;;  %3321 = vst.msk [vmem:[#allocation2 + $0x40] sm:$0xff] %vm455_vm2, %v3289_v27  ;;  %v2287_v36 = vld [vmem:[#allocation2 + $0x58] sm:$0xff] }
 0x231   : > { %v2578_v39 = vadd.f32 %v2514_v22, %v2287_v36  ;;  %2256 = vst.msk [vmem:[#allocation2 + $0x60] sm:$0xff] %vm455_vm2, %v2224_v32  ;;  %4190 = vmatmul.msk.bf16.gmra.mxu1 %vm313_vm1, %v4625_v24 }
 0x232   : > { %v5448_v38 = vpop.f32.mrf.mxu0  ;;  %3420 = vst.msk [vmem:[%s5346_s12 + $0x38] sm:$0xff] %vm455_vm2, %v3388_v34  ;;  %v2641_v35 = vld [vmem:[#allocation2 + $0x50] sm:$0xff] }
 0x233   : > { %4302 = vmatmul.msk.bf16.gmra.mxu2 %vm313_vm1, %v4641_v25  ;;  %v2936_v40 = vadd.f32 %v2871_v10, %v2641_v35  ;;  %2610 = vst.msk [vmem:[#allocation2 + $0x58] sm:$0xff] %vm455_vm2, %v2578_v39 }
 0x234   : > { %4414 = vmatmul.msk.bf16.gmra.mxu3 %vm313_vm1, %v4657_v30 }
 0x235   : > { %4526 = vmatmul.msk.bf16.gmra.mxu0 %vm313_vm1, %v4673_v33  ;;  %2968 = vst.msk [vmem:[#allocation2 + $0x50] sm:$0xff] %vm455_vm2, %v2936_v40  ;;  %v2999_v42 = vld [vmem:[#allocation2 + $0x48] sm:$0xff] }
 0x236   : > { %v2517_v41 = vpop.f32.mrf.mxu2  ;;  %v3290_v44 = vadd.f32 %v5406_v50, %v2999_v42  ;;  %v2164_v46 = vpop.f32.mrf.mxu1 }
 0x237   : > { %v2876_v43 = vpop.f32.mrf.mxu3  ;;  %v3353_v47 = vld [vmem:[#allocation2 + $0x40] sm:$0xff]  ;;  %v2225_v48 = vadd.f32 %v2164_v46, %v1930_v45 }
 0x238   : > { %v3389_v51 = vadd.f32 %v5337_v37, %v3353_v47  ;;  %3322 = vst.msk [vmem:[#allocation2 + $0x48] sm:$0xff] %vm455_vm2, %v3290_v44  ;;  %v2288_v52 = vld [vmem:[#allocation2 + $0x60] sm:$0xff] }
 0x239   : > { %v2579_v53 = vadd.f32 %v2517_v41, %v2288_v52  ;;  %2257 = vst.msk [vmem:[#allocation2 + $0x68] sm:$0xff] %vm455_vm2, %v2225_v48 }
 0x23a   : > { %v5462_v49 = vpop.f32.mrf.mxu0  ;;  %3421 = vst.msk [vmem:[%s5346_s12 + $0x40] sm:$0xff] %vm455_vm2, %v3389_v51  ;;  %v2642_v50 = vld [vmem:[#allocation2 + $0x58] sm:$0xff] }
 0x23b   : > { %v2937_v54 = vadd.f32 %v2873_v26, %v2642_v50  ;;  %2611 = vst.msk [vmem:[#allocation2 + $0x60] sm:$0xff] %vm455_vm2, %v2579_v53 }
 0x23c   : > { %v3000_v55 = vld [vmem:[#allocation2 + $0x50] sm:$0xff] }
 0x23d   : > { %2969 = vst.msk [vmem:[#allocation2 + $0x58] sm:$0xff] %vm455_vm2, %v2937_v54  ;;  %v3291_v57 = vadd.f32 %v5420_v4, %v3000_v55 }
 0x23e   : > { %v2519_v56 = vpop.f32.mrf.mxu2  ;;  %v2167_v62 = vpop.f32.mrf.mxu1 }
 0x23f   : > { %v2878_v60 = vpop.f32.mrf.mxu3  ;;  %v3354_v0 = vld [vmem:[#allocation2 + $0x48] sm:$0xff]  ;;  %3323 = vst.msk [vmem:[#allocation2 + $0x50] sm:$0xff] %vm455_vm2, %v3291_v57  ;;  %v2226_v1 = vadd.f32 %v2167_v62, %v1931_v61  ;;  %v1935_v57 = vld [vmem:[#allocation2 + $0x90] sm:$0xff] }
 0x240   : > { %v3390_v5 = vadd.f32 %v5337_v37, %v3354_v0  ;;  %v2289_v2 = vld [vmem:[#allocation2 + $0x68] sm:$0xff] }
 0x241   : > { %v2580_v7 = vadd.f32 %v2519_v56, %v2289_v2  ;;  %2258 = vst.msk [vmem:[#allocation2 + $0x70] sm:$0xff] %vm455_vm2, %v2226_v1  ;;  %4191 = vmatmul.msk.bf16.gmra.mxu1 %vm313_vm1, %v4626_v58 }
 0x242   : > { %v5476_v6 = vpop.f32.mrf.mxu0  ;;  %3422 = vst.msk [vmem:[%s5346_s12 + $0x48] sm:$0xff] %vm455_vm2, %v3390_v5  ;;  %v2643_v4 = vld [vmem:[#allocation2 + $0x60] sm:$0xff] }
 0x243   : > { %4303 = vmatmul.msk.bf16.gmra.mxu2 %vm313_vm1, %v4642_v59  ;;  %v2938_v8 = vadd.f32 %v2876_v43, %v2643_v4  ;;  %2612 = vst.msk [vmem:[#allocation2 + $0x68] sm:$0xff] %vm455_vm2, %v2580_v7  ;;  %v1934_v43 = vld [vmem:[#allocation2 + $0x88] sm:$0xff]  ;;  %v1936_v4 = vld [vmem:[#allocation2 + $0x98] sm:$0xff] }
 0x244   : > { %4415 = vmatmul.msk.bf16.gmra.mxu3 %vm313_vm1, %v4658_v63  ;;  %v3001_v9 = vld [vmem:[#allocation2 + $0x58] sm:$0xff] }
 0x245   : > { %4527 = vmatmul.msk.bf16.gmra.mxu0 %vm313_vm1, %v4674_v3  ;;  %2970 = vst.msk [vmem:[#allocation2 + $0x60] sm:$0xff] %vm455_vm2, %v2938_v8  ;;  %v3292_v11 = vadd.f32 %v5434_v18, %v3001_v9 }
 0x246   : > { %v2522_v10 = vpop.f32.mrf.mxu2  ;;  %v3355_v13 = vld [vmem:[#allocation2 + $0x50] sm:$0xff]  ;;  %v2169_v15 = vpop.f32.mrf.mxu1 }
 0x247   : > { %v2881_v12 = vpop.f32.mrf.mxu3  ;;  %v3391_v17 = vadd.f32 %v5337_v37, %v3355_v13  ;;  %3324 = vst.msk [vmem:[#allocation2 + $0x58] sm:$0xff] %vm455_vm2, %v3292_v11  ;;  %v2227_v19 = vadd.f32 %v2169_v15, %v1932_v14 }
 0x248   : > { %v2290_v20 = vld [vmem:[#allocation2 + $0x70] sm:$0xff] }
 0x249   : > { %3423 = vst.msk [vmem:[%s5346_s12 + $0x50] sm:$0xff] %vm455_vm2, %v3391_v17  ;;  %v2581_v21 = vadd.f32 %v2522_v10, %v2290_v20 }
 0x24a   : > { %v5490_v16 = vpop.f32.mrf.mxu0  ;;  %v2644_v22 = vld [vmem:[#allocation2 + $0x68] sm:$0xff]  ;;  %2259 = vst.msk [vmem:[#allocation2 + $0x78] sm:$0xff] %vm455_vm2, %v2227_v19 }
 0x24b   : > { %v2939_v18 = vadd.f32 %v2878_v60, %v2644_v22  ;;  %2613 = vst.msk [vmem:[#allocation2 + $0x70] sm:$0xff] %vm455_vm2, %v2581_v21  ;;  %v1937_v21 = vld [vmem:[#allocation2 + $0xa0] sm:$0xff] }
 0x24c   : > { %v3002_v23 = vld [vmem:[#allocation2 + $0x60] sm:$0xff] }
 0x24d   : > { %2971 = vst.msk [vmem:[#allocation2 + $0x68] sm:$0xff] %vm455_vm2, %v2939_v18  ;;  %v3293_v25 = vadd.f32 %v5448_v38, %v3002_v23 }
 0x24e   : > { %v2524_v24 = vpop.f32.mrf.mxu2  ;;  %v3356_v27 = vld [vmem:[#allocation2 + $0x58] sm:$0xff]  ;;  %v2172_v29 = vpop.f32.mrf.mxu1 }
 0x24f   : > { %v2883_v26 = vpop.f32.mrf.mxu3  ;;  %v3392_v30 = vadd.f32 %v5337_v37, %v3356_v27  ;;  %3325 = vst.msk [vmem:[#allocation2 + $0x60] sm:$0xff] %vm455_vm2, %v3293_v25  ;;  %v2228_v31 = vadd.f32 %v2172_v29, %v1933_v28 }
 0x251   : > { %3424 = vst.msk [vmem:[%s5346_s12 + $0x58] sm:$0xff] %vm455_vm2, %v3392_v30  ;;  %v2291_v33 = vld [vmem:[#allocation2 + $0x78] sm:$0xff] }
 0x252   : > { %v5500_v32 = vpop.f32.mrf.mxu0  ;;  %v2645_v34 = vld [vmem:[#allocation2 + $0x70] sm:$0xff]  ;;  %v2582_v36 = vadd.f32 %v2524_v24, %v2291_v33  ;;  %2260 = vst.msk [vmem:[#allocation2 + $0x80] sm:$0xff] %vm455_vm2, %v2228_v31 }
 0x253   : > { %v2940_v38 = vadd.f32 %v2881_v12, %v2645_v34  ;;  %v1938_v34 = vld [vmem:[#allocation2 + $0xa8] sm:$0xff] }
 0x254   : > { %2614 = vst.msk [vmem:[#allocation2 + $0x78] sm:$0xff] %vm455_vm2, %v2582_v36  ;;  %v3003_v39 = vld [vmem:[#allocation2 + $0x68] sm:$0xff] }
 0x255   : > { %2972 = vst.msk [vmem:[#allocation2 + $0x70] sm:$0xff] %vm455_vm2, %v2940_v38  ;;  %v3294_v40 = vadd.f32 %v5462_v49, %v3003_v39 }
 0x256   : > { %v2527_v35 = vpop.f32.mrf.mxu2  ;;  %v3357_v42 = vld [vmem:[#allocation2 + $0x60] sm:$0xff]  ;;  %v2174_v44 = vpop.f32.mrf.mxu1 }
 0x257   : > { %v2886_v41 = vpop.f32.mrf.mxu3  ;;  %v3393_v45 = vadd.f32 %v5337_v37, %v3357_v42  ;;  %3326 = vst.msk [vmem:[#allocation2 + $0x68] sm:$0xff] %vm455_vm2, %v3294_v40  ;;  %v2229_v46 = vadd.f32 %v2174_v44, %v1934_v43 }
 0x259   : > { %3425 = vst.msk [vmem:[%s5346_s12 + $0x60] sm:$0xff] %vm455_vm2, %v3393_v45  ;;  %v2292_v48 = vld [vmem:[#allocation2 + $0x80] sm:$0xff] }
 0x25a   : > { %v5510_v47 = vpop.f32.mrf.mxu0  ;;  %v2583_v51 = vadd.f32 %v2527_v35, %v2292_v48  ;;  %2261 = vst.msk [vmem:[#allocation2 + $0x88] sm:$0xff] %vm455_vm2, %v2229_v46  ;;  %v1939_v48 = vld [vmem:[#allocation2 + $0xb0] sm:$0xff] }
 0x25b   : > { %v2646_v52 = vld [vmem:[#allocation2 + $0x78] sm:$0xff] }
 0x25c   : > { %v2941_v49 = vadd.f32 %v2883_v26, %v2646_v52  ;;  %2615 = vst.msk [vmem:[#allocation2 + $0x80] sm:$0xff] %vm455_vm2, %v2583_v51  ;;  %v3004_v53 = vld [vmem:[#allocation2 + $0x70] sm:$0xff] }
 0x25d   : > { %v3295_v54 = vadd.f32 %v5476_v6, %v3004_v53 }
 0x25e   : > { %v2529_v50 = vpop.f32.mrf.mxu2  ;;  %v3358_v56 = vld [vmem:[#allocation2 + $0x68] sm:$0xff]  ;;  %2973 = vst.msk [vmem:[#allocation2 + $0x78] sm:$0xff] %vm455_vm2, %v2941_v49  ;;  %v2177_v58 = vpop.f32.mrf.mxu1 }
 0x25f   : > { %v2888_v55 = vpop.f32.mrf.mxu3  ;;  %v3394_v59 = vadd.f32 %v5337_v37, %v3358_v56  ;;  %3327 = vst.msk [vmem:[#allocation2 + $0x70] sm:$0xff] %vm455_vm2, %v3295_v54  ;;  %v2230_v60 = vadd.f32 %v2177_v58, %v1935_v57 }
 0x261   : > { %3426 = vst.msk [vmem:[%s5346_s12 + $0x68] sm:$0xff] %vm455_vm2, %v3394_v59  ;;  %v2293_v61 = vld [vmem:[#allocation2 + $0x88] sm:$0xff] }
 0x262   : > { %v5522_v62 = vpop.f32.mrf.mxu0  ;;  %v2584_v63 = vadd.f32 %v2529_v50, %v2293_v61  ;;  %2262 = vst.msk [vmem:[#allocation2 + $0x90] sm:$0xff] %vm455_vm2, %v2230_v60 }
 0x263   : > { %v2647_v0 = vld [vmem:[#allocation2 + $0x80] sm:$0xff] }
 0x264   : > { %v2942_v1 = vadd.f32 %v2886_v41, %v2647_v0  ;;  %2616 = vst.msk [vmem:[#allocation2 + $0x88] sm:$0xff] %vm455_vm2, %v2584_v63 }
 0x265   : > { %v3005_v5 = vld [vmem:[#allocation2 + $0x78] sm:$0xff] }
 0x266   : > { %v2532_v3 = vpop.f32.mrf.mxu2  ;;  %v3359_v6 = vld [vmem:[#allocation2 + $0x70] sm:$0xff]  ;;  %2974 = vst.msk [vmem:[#allocation2 + $0x80] sm:$0xff] %vm455_vm2, %v2942_v1  ;;  %v3296_v7 = vadd.f32 %v5490_v16, %v3005_v5  ;;  %v2179_v8 = vpop.f32.mrf.mxu1 }
 0x267   : > { %v2891_v2 = vpop.f32.mrf.mxu3  ;;  %v3395_v9 = vadd.f32 %v5337_v37, %v3359_v6  ;;  %v2231_v10 = vadd.f32 %v2179_v8, %v1936_v4 }
 0x268   : > { %3328 = vst.msk [vmem:[#allocation2 + $0x78] sm:$0xff] %vm455_vm2, %v3296_v7 }
 0x269   : > { %3427 = vst.msk [vmem:[%s5346_s12 + $0x70] sm:$0xff] %vm455_vm2, %v3395_v9  ;;  %v2294_v11 = vld [vmem:[#allocation2 + $0x90] sm:$0xff] }
 0x26a   : > { %v2585_v12 = vadd.f32 %v2532_v3, %v2294_v11  ;;  %2263 = vst.msk [vmem:[#allocation2 + $0x98] sm:$0xff] %vm455_vm2, %v2231_v10  ;;  %v5533_v14 = vpop.f32.mrf.mxu0 }
 0x26b   : > { %v2648_v13 = vld [vmem:[#allocation2 + $0x88] sm:$0xff] }
 0x26c   : > { %v2943_v15 = vadd.f32 %v2888_v55, %v2648_v13  ;;  %2617 = vst.msk [vmem:[#allocation2 + $0x90] sm:$0xff] %vm455_vm2, %v2585_v12  ;;  %v1941_v12 = vld [vmem:[#allocation2 + $0xc0] sm:$0xff] }
 0x26d   : > { %v3006_v19 = vld [vmem:[#allocation2 + $0x80] sm:$0xff] }
 0x26e   : > { %v2534_v17 = vpop.f32.mrf.mxu2  ;;  %2975 = vst.msk [vmem:[#allocation2 + $0x88] sm:$0xff] %vm455_vm2, %v2943_v15  ;;  %v3297_v16 = vadd.f32 %v5500_v32, %v3006_v19  ;;  %v2182_v22 = vpop.f32.mrf.mxu1 }
 0x26f   : > { %v2893_v20 = vpop.f32.mrf.mxu3  ;;  %v3360_v18 = vld [vmem:[#allocation2 + $0x78] sm:$0xff]  ;;  %v2232_v23 = vadd.f32 %v2182_v22, %v1937_v21 }
 0x270   : > { %v3396_v24 = vadd.f32 %v5337_v37, %v3360_v18  ;;  %3329 = vst.msk [vmem:[#allocation2 + $0x80] sm:$0xff] %vm455_vm2, %v3297_v16 }
 0x271   : > { %v2295_v25 = vld [vmem:[#allocation2 + $0x98] sm:$0xff]  ;;  %2264 = vst.msk [vmem:[#allocation2 + $0xa0] sm:$0xff] %vm455_vm2, %v2232_v23 }
 0x272   : > { %3428 = vst.msk [vmem:[%s5346_s12 + $0x78] sm:$0xff] %vm455_vm2, %v3396_v24  ;;  %v2586_v26 = vadd.f32 %v2534_v17, %v2295_v25  ;;  %v3251_v32 = vpop.f32.mrf.mxu0 }
 0x273   : > { %v2649_v27 = vld [vmem:[#allocation2 + $0x90] sm:$0xff] }
 0x274   : > { %v2944_v28 = vadd.f32 %v2891_v2, %v2649_v27  ;;  %2618 = vst.msk [vmem:[#allocation2 + $0x98] sm:$0xff] %vm455_vm2, %v2586_v26  ;;  %v1942_v27 = vld [vmem:[#allocation2 + $0xc8] sm:$0xff] }
 0x275   : > { %v3007_v30 = vld [vmem:[#allocation2 + $0x88] sm:$0xff] }
 0x276   : > { %v2537_v29 = vpop.f32.mrf.mxu2  ;;  %2976 = vst.msk [vmem:[#allocation2 + $0x90] sm:$0xff] %vm455_vm2, %v2944_v28  ;;  %v3298_v33 = vadd.f32 %v5510_v47, %v3007_v30  ;;  %v2184_v36 = vpop.f32.mrf.mxu1 }
 0x277   : > { %v2896_v31 = vpop.f32.mrf.mxu3  ;;  %v3361_v38 = vld [vmem:[#allocation2 + $0x80] sm:$0xff]  ;;  %v2233_v39 = vadd.f32 %v2184_v36, %v1938_v34 }
 0x278   : > { %v3397_v35 = vadd.f32 %v5337_v37, %v3361_v38  ;;  %3330 = vst.msk [vmem:[#allocation2 + $0x88] sm:$0xff] %vm455_vm2, %v3298_v33  ;;  %v2296_v40 = vld [vmem:[#allocation2 + $0xa0] sm:$0xff] }
 0x279   : > { %v2587_v41 = vadd.f32 %v2537_v29, %v2296_v40  ;;  %2265 = vst.msk [vmem:[#allocation2 + $0xa8] sm:$0xff] %vm455_vm2, %v2233_v39 }
 0x27a   : > { %3429 = vst.msk [vmem:[%s5346_s12 + $0x80] sm:$0xff] %vm455_vm2, %v3397_v35  ;;  %v3253_v53 = vpop.f32.mrf.mxu0 }
 0x27b   : > { %v2650_v42 = vld [vmem:[#allocation2 + $0x98] sm:$0xff]  ;;  %2619 = vst.msk [vmem:[#allocation2 + $0xa0] sm:$0xff] %vm455_vm2, %v2587_v41 }
 0x27c   : > { %v2945_v43 = vadd.f32 %v2893_v20, %v2650_v42  ;;  %v1943_v42 = vld [vmem:[#allocation2 + $0xd0] sm:$0xff] }
 0x27d   : > { %v3008_v45 = vld [vmem:[#allocation2 + $0x90] sm:$0xff] }
 0x27e   : > { %v2539_v44 = vpop.f32.mrf.mxu2  ;;  %2977 = vst.msk [vmem:[#allocation2 + $0x98] sm:$0xff] %vm455_vm2, %v2945_v43  ;;  %v3299_v47 = vadd.f32 %v5522_v62, %v3008_v45  ;;  %v2187_v51 = vpop.f32.mrf.mxu1  ;;  %v1940_v62 = vld [vmem:[#allocation2 + $0xb8] sm:$0xff] }
 0x27f   : > { %v2898_v46 = vpop.f32.mrf.mxu3  ;;  %v3362_v52 = vld [vmem:[#allocation2 + $0x88] sm:$0xff]  ;;  %v2234_v49 = vadd.f32 %v2187_v51, %v1939_v48 }
 0x280   : > { %v3398_v50 = vadd.f32 %v5337_v37, %v3362_v52  ;;  %3331 = vst.msk [vmem:[#allocation2 + $0x90] sm:$0xff] %vm455_vm2, %v3299_v47  ;;  %v2297_v54 = vld [vmem:[#allocation2 + $0xa8] sm:$0xff] }
 0x281   : > { %v2588_v55 = vadd.f32 %v2539_v44, %v2297_v54  ;;  %2266 = vst.msk [vmem:[#allocation2 + $0xb0] sm:$0xff] %vm455_vm2, %v2234_v49  ;;  %v1944_v54 = vld [vmem:[#allocation2 + $0xd8] sm:$0xff] }
 0x282   : > { %3430 = vst.msk [vmem:[%s5346_s12 + $0x88] sm:$0xff] %vm455_vm2, %v3398_v50  ;;  %v2651_v56 = vld [vmem:[#allocation2 + $0xa0] sm:$0xff]  ;;  %v3256_v6 = vpop.f32.mrf.mxu0 }
 0x283   : > { %v2946_v57 = vadd.f32 %v2896_v31, %v2651_v56  ;;  %2620 = vst.msk [vmem:[#allocation2 + $0xa8] sm:$0xff] %vm455_vm2, %v2588_v55 }
 0x285   : > { %2978 = vst.msk [vmem:[#allocation2 + $0xa0] sm:$0xff] %vm455_vm2, %v2946_v57  ;;  %v3009_v59 = vld [vmem:[#allocation2 + $0x98] sm:$0xff] }
 0x286   : > { %v2542_v58 = vpop.f32.mrf.mxu2  ;;  %v3300_v61 = vadd.f32 %v5533_v14, %v3009_v59  ;;  %v2189_v63 = vpop.f32.mrf.mxu1 }
 0x287   : > { %v2901_v60 = vpop.f32.mrf.mxu3  ;;  %v3363_v0 = vld [vmem:[#allocation2 + $0x90] sm:$0xff]  ;;  %v2235_v1 = vadd.f32 %v2189_v63, %v1940_v62 }
 0x288   : > { %v3399_v3 = vadd.f32 %v5337_v37, %v3363_v0  ;;  %3332 = vst.msk [vmem:[#allocation2 + $0x98] sm:$0xff] %vm455_vm2, %v3300_v61  ;;  %v2298_v5 = vld [vmem:[#allocation2 + $0xb0] sm:$0xff] }
 0x289   : > { %v2589_v2 = vadd.f32 %v2542_v58, %v2298_v5  ;;  %2267 = vst.msk [vmem:[#allocation2 + $0xb8] sm:$0xff] %vm455_vm2, %v2235_v1 }
 0x28a   : > { %3431 = vst.msk [vmem:[%s5346_s12 + $0x90] sm:$0xff] %vm455_vm2, %v3399_v3  ;;  %v2652_v7 = vld [vmem:[#allocation2 + $0xa8] sm:$0xff]  ;;  %v3258_v22 = vpop.f32.mrf.mxu0 }
 0x28b   : > { %v2947_v4 = vadd.f32 %v2898_v46, %v2652_v7  ;;  %2621 = vst.msk [vmem:[#allocation2 + $0xb0] sm:$0xff] %vm455_vm2, %v2589_v2  ;;  %v1945_v2 = vld [vmem:[#allocation2 + $0xe0] sm:$0xff] }
 0x28c   : > { %v3010_v8 = vld [vmem:[#allocation2 + $0xa0] sm:$0xff] }
 0x28d   : > { %2979 = vst.msk [vmem:[#allocation2 + $0xa8] sm:$0xff] %vm455_vm2, %v2947_v4  ;;  %v3301_v10 = vadd.f32 %v3251_v32, %v3010_v8 }
 0x28e   : > { %v2544_v9 = vpop.f32.mrf.mxu2  ;;  %v2192_v13 = vpop.f32.mrf.mxu1 }
 0x28f   : > { %v2903_v11 = vpop.f32.mrf.mxu3  ;;  %v3364_v14 = vld [vmem:[#allocation2 + $0x98] sm:$0xff]  ;;  %3333 = vst.msk [vmem:[#allocation2 + $0xa0] sm:$0xff] %vm455_vm2, %v3301_v10  ;;  %v2236_v15 = vadd.f32 %v2192_v13, %v1941_v12 }
 0x290   : > { %v3400_v17 = vadd.f32 %v5337_v37, %v3364_v14  ;;  %v2299_v19 = vld [vmem:[#allocation2 + $0xb8] sm:$0xff] }
 0x291   : > { %v2590_v20 = vadd.f32 %v2544_v9, %v2299_v19  ;;  %2268 = vst.msk [vmem:[#allocation2 + $0xc0] sm:$0xff] %vm455_vm2, %v2236_v15 }
 0x292   : > { %3432 = vst.msk [vmem:[%s5346_s12 + $0x98] sm:$0xff] %vm455_vm2, %v3400_v17  ;;  %v2653_v16 = vld [vmem:[#allocation2 + $0xb0] sm:$0xff]  ;;  %v3261_v40 = vpop.f32.mrf.mxu0 }
 0x293   : > { %v2948_v21 = vadd.f32 %v2901_v60, %v2653_v16  ;;  %2622 = vst.msk [vmem:[#allocation2 + $0xb8] sm:$0xff] %vm455_vm2, %v2590_v20  ;;  %v1946_v20 = vld [vmem:[#allocation2 + $0xe8] sm:$0xff] }
 0x294   : > { %v3011_v18 = vld [vmem:[#allocation2 + $0xa8] sm:$0xff] }
 0x295   : > { %2980 = vst.msk [vmem:[#allocation2 + $0xb0] sm:$0xff] %vm455_vm2, %v2948_v21  ;;  %v3302_v24 = vadd.f32 %v3253_v53, %v3011_v18 }
 0x296   : > { %v2547_v23 = vpop.f32.mrf.mxu2  ;;  %v3365_v26 = vld [vmem:[#allocation2 + $0xa0] sm:$0xff]  ;;  %v2194_v28 = vpop.f32.mrf.mxu1 }
 0x297   : > { %v2906_v25 = vpop.f32.mrf.mxu3  ;;  %v3401_v29 = vadd.f32 %v5337_v37, %v3365_v26  ;;  %3334 = vst.msk [vmem:[#allocation2 + $0xa8] sm:$0xff] %vm455_vm2, %v3302_v24  ;;  %v2237_v30 = vadd.f32 %v2194_v28, %v1942_v27 }
 0x298   : > { %v2300_v31 = vld [vmem:[#allocation2 + $0xc0] sm:$0xff] }
 0x299   : > { %3433 = vst.msk [vmem:[%s5346_s12 + $0xa0] sm:$0xff] %vm455_vm2, %v3401_v29  ;;  %v2591_v32 = vadd.f32 %v2547_v23, %v2300_v31 }
 0x29a   : > { %v2654_v33 = vld [vmem:[#allocation2 + $0xb8] sm:$0xff]  ;;  %2269 = vst.msk [vmem:[#allocation2 + $0xc8] sm:$0xff] %vm455_vm2, %v2237_v30  ;;  %v3263_v59 = vpop.f32.mrf.mxu0  ;;  %v1947_v30 = vld [vmem:[#allocation2 + $0xf0] sm:$0xff] }
 0x29b   : > { %v2949_v34 = vadd.f32 %v2903_v11, %v2654_v33  ;;  %2623 = vst.msk [vmem:[#allocation2 + $0xc0] sm:$0xff] %vm455_vm2, %v2591_v32 }
 0x29c   : > { %v3012_v36 = vld [vmem:[#allocation2 + $0xb0] sm:$0xff] }
 0x29d   : > { %2981 = vst.msk [vmem:[#allocation2 + $0xb8] sm:$0xff] %vm455_vm2, %v2949_v34  ;;  %v3303_v39 = vadd.f32 %v3256_v6, %v3012_v36  ;;  %v5614_v34 = vld [vmem:[%s5663_s2] ss:$0 sm:$0xff] }
 0x29e   : > { %v2549_v38 = vpop.f32.mrf.mxu2  ;;  %v3366_v41 = vld [vmem:[#allocation2 + $0xa8] sm:$0xff]  ;;  %v2197_v43 = vpop.f32.mrf.mxu1 }
 0x29f   : > { %v2908_v35 = vpop.f32.mrf.mxu3  ;;  %v3402_v44 = vadd.f32 %v5337_v37, %v3366_v41  ;;  %3335 = vst.msk [vmem:[#allocation2 + $0xb0] sm:$0xff] %vm455_vm2, %v3303_v39  ;;  %v2238_v45 = vadd.f32 %v2197_v43, %v1943_v42 }
 0x2a1   : > { %3434 = vst.msk [vmem:[%s5346_s12 + $0xa8] sm:$0xff] %vm455_vm2, %v3402_v44  ;;  %v2301_v46 = vld [vmem:[#allocation2 + $0xc8] sm:$0xff] }
 0x2a2   : > { %v2655_v47 = vld [vmem:[#allocation2 + $0xc0] sm:$0xff]  ;;  %v2592_v48 = vadd.f32 %v2549_v38, %v2301_v46  ;;  %2270 = vst.msk [vmem:[#allocation2 + $0xd0] sm:$0xff] %vm455_vm2, %v2238_v45  ;;  %v3266_v10 = vpop.f32.mrf.mxu0  ;;  %v1948_v46 = vld [vmem:[#allocation2 + $0xf8] sm:$0xff] }
 0x2a3   : > { %v2950_v51 = vadd.f32 %v2906_v25, %v2655_v47 }
 0x2a4   : > { %2624 = vst.msk [vmem:[#allocation2 + $0xc8] sm:$0xff] %vm455_vm2, %v2592_v48  ;;  %v3013_v52 = vld [vmem:[#allocation2 + $0xb8] sm:$0xff] }
 0x2a5   : > { %2982 = vst.msk [vmem:[#allocation2 + $0xc0] sm:$0xff] %vm455_vm2, %v2950_v51  ;;  %v3304_v53 = vadd.f32 %v3258_v22, %v3013_v52 }
 0x2a6   : > { %v2552_v49 = vpop.f32.mrf.mxu2  ;;  %v3367_v50 = vld [vmem:[#allocation2 + $0xb0] sm:$0xff]  ;;  %v2199_v55 = vpop.f32.mrf.mxu1 }
 0x2a7   : > { %v3403_v56 = vadd.f32 %v5337_v37, %v3367_v50  ;;  %3336 = vst.msk [vmem:[#allocation2 + $0xb8] sm:$0xff] %vm455_vm2, %v3304_v53  ;;  %v2239_v57 = vadd.f32 %v2199_v55, %v1944_v54  ;;  %v2911_v58 = vpop.f32.mrf.mxu3 }
 0x2a9   : > { %3435 = vst.msk [vmem:[%s5346_s12 + $0xb0] sm:$0xff] %vm455_vm2, %v3403_v56  ;;  %v2302_v60 = vld [vmem:[#allocation2 + $0xd0] sm:$0xff] }
 0x2aa   : > { %v2593_v61 = vadd.f32 %v2552_v49, %v2302_v60  ;;  %2271 = vst.msk [vmem:[#allocation2 + $0xd8] sm:$0xff] %vm455_vm2, %v2239_v57  ;;  %v3268_v26 = vpop.f32.mrf.mxu0 }
 0x2ab   : > { %v2656_v62 = vld [vmem:[#allocation2 + $0xc8] sm:$0xff] }
 0x2ac   : > { %v2951_v63 = vadd.f32 %v2908_v35, %v2656_v62  ;;  %2625 = vst.msk [vmem:[#allocation2 + $0xd0] sm:$0xff] %vm455_vm2, %v2593_v61  ;;  %v3014_v0 = vld [vmem:[#allocation2 + $0xc0] sm:$0xff] }
 0x2ad   : > { %v3305_v3 = vadd.f32 %v3261_v40, %v3014_v0 }
 0x2ae   : > { %v2554_v1 = vpop.f32.mrf.mxu2  ;;  %v3368_v5 = vld [vmem:[#allocation2 + $0xb8] sm:$0xff]  ;;  %2983 = vst.msk [vmem:[#allocation2 + $0xc8] sm:$0xff] %vm455_vm2, %v2951_v63  ;;  %v2202_v6 = vpop.f32.mrf.mxu1 }
 0x2af   : > { %v3404_v7 = vadd.f32 %v5337_v37, %v3368_v5  ;;  %3337 = vst.msk [vmem:[#allocation2 + $0xc0] sm:$0xff] %vm455_vm2, %v3305_v3  ;;  %v2240_v4 = vadd.f32 %v2202_v6, %v1945_v2  ;;  %v2913_v9 = vpop.f32.mrf.mxu3 }
 0x2b1   : > { %3436 = vst.msk [vmem:[%s5346_s12 + $0xb8] sm:$0xff] %vm455_vm2, %v3404_v7  ;;  %v2303_v8 = vld [vmem:[#allocation2 + $0xd8] sm:$0xff] }
 0x2b2   : > { %v2594_v11 = vadd.f32 %v2554_v1, %v2303_v8  ;;  %2272 = vst.msk [vmem:[#allocation2 + $0xe0] sm:$0xff] %vm455_vm2, %v2240_v4  ;;  %v3271_v43 = vpop.f32.mrf.mxu0 }
 0x2b3   : > { %v2657_v12 = vld [vmem:[#allocation2 + $0xd0] sm:$0xff] }
 0x2b4   : > { %v2952_v13 = vadd.f32 %v2911_v58, %v2657_v12  ;;  %2626 = vst.msk [vmem:[#allocation2 + $0xd8] sm:$0xff] %vm455_vm2, %v2594_v11 }
 0x2b5   : > { %v3015_v15 = vld [vmem:[#allocation2 + $0xc8] sm:$0xff] }
 0x2b6   : > { %v2557_v14 = vpop.f32.mrf.mxu2  ;;  %v3369_v17 = vld [vmem:[#allocation2 + $0xc0] sm:$0xff]  ;;  %2984 = vst.msk [vmem:[#allocation2 + $0xd0] sm:$0xff] %vm455_vm2, %v2952_v13  ;;  %v3306_v19 = vadd.f32 %v3263_v59, %v3015_v15  ;;  %v2204_v16 = vpop.f32.mrf.mxu1 }
 0x2b7   : > { %v3405_v21 = vadd.f32 %v5337_v37, %v3369_v17  ;;  %v2241_v22 = vadd.f32 %v2204_v16, %v1946_v20  ;;  %v2916_v25 = vpop.f32.mrf.mxu3 }
 0x2b8   : > { %3338 = vst.msk [vmem:[#allocation2 + $0xc8] sm:$0xff] %vm455_vm2, %v3306_v19 }
 0x2b9   : > { %3437 = vst.msk [vmem:[%s5346_s12 + $0xc0] sm:$0xff] %vm455_vm2, %v3405_v21  ;;  %v2304_v18 = vld [vmem:[#allocation2 + $0xe0] sm:$0xff] }
 0x2ba   : > { %v2595_v23 = vadd.f32 %v2557_v14, %v2304_v18  ;;  %2273 = vst.msk [vmem:[#allocation2 + $0xe8] sm:$0xff] %vm455_vm2, %v2241_v22  ;;  %v3273_v58 = vpop.f32.mrf.mxu0 }
 0x2bb   : > { %v2658_v24 = vld [vmem:[#allocation2 + $0xd8] sm:$0xff] }
 0x2bc   : > { %v2953_v27 = vadd.f32 %v2913_v9, %v2658_v24  ;;  %2627 = vst.msk [vmem:[#allocation2 + $0xe0] sm:$0xff] %vm455_vm2, %v2595_v23 }
 0x2bd   : > { %v3016_v29 = vld [vmem:[#allocation2 + $0xd0] sm:$0xff] }
 0x2be   : > { %v2559_v28 = vpop.f32.mrf.mxu2  ;;  %2985 = vst.msk [vmem:[#allocation2 + $0xd8] sm:$0xff] %vm455_vm2, %v2953_v27  ;;  %v3307_v37 = vadd.f32 %v3266_v10, %v3016_v29  ;;  %v2207_v31 = vpop.f32.mrf.mxu1 }
 0x2bf   : > { %v3370_v32 = vld [vmem:[#allocation2 + $0xc8] sm:$0xff]  ;;  %v2242_v33 = vadd.f32 %v2207_v31, %v1947_v30  ;;  %v2918_v42 = vpop.f32.mrf.mxu3 }
 0x2c0   : > { %v3406_v36 = vadd.f32 %v5614_v34, %v3370_v32  ;;  %3339 = vst.msk [vmem:[#allocation2 + $0xd0] sm:$0xff] %vm455_vm2, %v3307_v37 }
 0x2c1   : > { %v2305_v38 = vld [vmem:[#allocation2 + $0xe8] sm:$0xff]  ;;  %2274 = vst.msk [vmem:[#allocation2 + $0xf0] sm:$0xff] %vm455_vm2, %v2242_v33 }
 0x2c2   : > { %3438 = vst.msk [vmem:[%s5346_s12 + $0xc8] sm:$0xff] %vm455_vm2, %v3406_v36  ;;  %v2596_v39 = vadd.f32 %v2559_v28, %v2305_v38  ;;  %v3276_v8 = vpop.f32.mrf.mxu0 }
 0x2c3   : > { %v2659_v35 = vld [vmem:[#allocation2 + $0xe0] sm:$0xff] }
 0x2c4   : > { %v2954_v40 = vadd.f32 %v2916_v25, %v2659_v35  ;;  %2628 = vst.msk [vmem:[#allocation2 + $0xe8] sm:$0xff] %vm455_vm2, %v2596_v39 }
 0x2c5   : > { %v3017_v41 = vld [vmem:[#allocation2 + $0xd8] sm:$0xff] }
 0x2c6   : > { %2986 = vst.msk [vmem:[#allocation2 + $0xe0] sm:$0xff] %vm455_vm2, %v2954_v40  ;;  %v3308_v44 = vadd.f32 %v3268_v26, %v3017_v41  ;;  %v2562_v45 = vpop.f32.mrf.mxu2  ;;  %v2209_v47 = vpop.f32.mrf.mxu1 }
 0x2c7   : > { %v3371_v48 = vld [vmem:[#allocation2 + $0xd0] sm:$0xff]  ;;  %v2243_v51 = vadd.f32 %v2209_v47, %v1948_v46  ;;  %v2921_v60 = vpop.f32.mrf.mxu3 }
 0x2c8   : > { %v3407_v52 = vadd.f32 %v5614_v34, %v3371_v48  ;;  %3340 = vst.msk [vmem:[#allocation2 + $0xd8] sm:$0xff] %vm455_vm2, %v3308_v44  ;;  %v2306_v49 = vld [vmem:[#allocation2 + $0xf0] sm:$0xff] }
 0x2c9   : > { %v2597_v53 = vadd.f32 %v2562_v45, %v2306_v49  ;;  %2275 = vst.msk [vmem:[#allocation2 + $0xf8] sm:$0xff] %vm455_vm2, %v2243_v51 }
 0x2ca   : > { %3439 = vst.msk [vmem:[%s5346_s12 + $0xd0] sm:$0xff] %vm455_vm2, %v3407_v52  ;;  %v3278_v15 = vpop.f32.mrf.mxu0 }
 0x2cb   : > { %v2660_v50 = vld [vmem:[#allocation2 + $0xe8] sm:$0xff]  ;;  %2629 = vst.msk [vmem:[#allocation2 + $0xf0] sm:$0xff] %vm455_vm2, %v2597_v53 }
 0x2cc   : > { %v2955_v54 = vadd.f32 %v2918_v42, %v2660_v50 }
 0x2cd   : > { %v3018_v55 = vld [vmem:[#allocation2 + $0xe0] sm:$0xff] }
 0x2ce   : > { %2987 = vst.msk [vmem:[#allocation2 + $0xe8] sm:$0xff] %vm455_vm2, %v2955_v54  ;;  %v3309_v56 = vadd.f32 %v3271_v43, %v3018_v55  ;;  %v2564_v62 = vpop.f32.mrf.mxu2 }
 0x2cf   : > { %v3372_v57 = vld [vmem:[#allocation2 + $0xd8] sm:$0xff]  ;;  %v2923_v4 = vpop.f32.mrf.mxu3 }
 0x2d0   : > { %v3408_v59 = vadd.f32 %v5614_v34, %v3372_v57  ;;  %3341 = vst.msk [vmem:[#allocation2 + $0xe0] sm:$0xff] %vm455_vm2, %v3309_v56  ;;  %v2307_v61 = vld [vmem:[#allocation2 + $0xf8] sm:$0xff] }
 0x2d1   : > { %v2598_v63 = vadd.f32 %v2564_v62, %v2307_v61 }
 0x2d2   : > { %3440 = vst.msk [vmem:[%s5346_s12 + $0xd8] sm:$0xff] %vm455_vm2, %v3408_v59  ;;  %v2661_v0 = vld [vmem:[#allocation2 + $0xf0] sm:$0xff] }
 0x2d3   : > { %v2956_v1 = vadd.f32 %v2921_v60, %v2661_v0  ;;  %2630 = vst.msk [vmem:[#allocation2 + $0xf8] sm:$0xff] %vm455_vm2, %v2598_v63 }
 0x2d5   : > { %2988 = vst.msk [vmem:[#allocation2 + $0xf0] sm:$0xff] %vm455_vm2, %v2956_v1  ;;  %v3019_v3 = vld [vmem:[#allocation2 + $0xe8] sm:$0xff] }
 0x2d6   : > { %v3310_v5 = vadd.f32 %v3273_v58, %v3019_v3 }
 0x2d7   : > { %v3373_v2 = vld [vmem:[#allocation2 + $0xe0] sm:$0xff] }
 0x2d8   : > { %v3409_v6 = vadd.f32 %v5614_v34, %v3373_v2  ;;  %3342 = vst.msk [vmem:[#allocation2 + $0xe8] sm:$0xff] %vm455_vm2, %v3310_v5 }
 0x2da   : > { %3441 = vst.msk [vmem:[%s5346_s12 + $0xe0] sm:$0xff] %vm455_vm2, %v3409_v6  ;;  %v2662_v7 = vld [vmem:[#allocation2 + $0xf8] sm:$0xff] }
 0x2db   : > { %v2957_v9 = vadd.f32 %v2923_v4, %v2662_v7 }
 0x2dc   : > { %v3020_v10 = vld [vmem:[#allocation2 + $0xf0] sm:$0xff] }
 0x2dd   : > { %2989 = vst.msk [vmem:[#allocation2 + $0xf8] sm:$0xff] %vm455_vm2, %v2957_v9  ;;  %v3311_v11 = vadd.f32 %v3276_v8, %v3020_v10 }
 0x2df   : > { %v3374_v12 = vld [vmem:[#allocation2 + $0xe8] sm:$0xff]  ;;  %3343 = vst.msk [vmem:[#allocation2 + $0xf0] sm:$0xff] %vm455_vm2, %v3311_v11 }
 0x2e0   : > { %v3410_v13 = vadd.f32 %v5614_v34, %v3374_v12 }
 0x2e2   : > { %3442 = vst.msk [vmem:[%s5346_s12 + $0xe8] sm:$0xff] %vm455_vm2, %v3410_v13 }
 0x2e4   : > { %v3021_v14 = vld [vmem:[#allocation2 + $0xf8] sm:$0xff] }
 0x2e5   : > { %v3312_v17 = vadd.f32 %v3278_v15, %v3021_v14 }
 0x2e6   : > { %v3375_v19 = vld [vmem:[#allocation2 + $0xf0] sm:$0xff] }
 0x2e7   : > { %v3411_v20 = vadd.f32 %v5614_v34, %v3375_v19  ;;  %3344 = vst.msk [vmem:[#allocation2 + $0xf8] sm:$0xff] %vm455_vm2, %v3312_v17 }
 0x2e9   : > { %3443 = vst.msk [vmem:[%s5346_s12 + $0xf0] sm:$0xff] %vm455_vm2, %v3411_v20 }
 0x2ee   : > { %v3376_v16 = vld [vmem:[#allocation2 + $0xf8] sm:$0xff] }
 0x2ef   : > { %v3412_v21 = vadd.f32 %v5614_v34, %v3376_v16 }
 0x2f1   : > { %3444 = vst.msk [vmem:[%s5346_s12 + $0xf8] sm:$0xff] %vm455_vm2, %v3412_v21 }
 0x2f2 PF: > { %s13_s14 = sadd.s32 1, %s4727_s14   ;;  %s5665_s12 = smov %s4723_s13 }
 0x2f3   : > { %p10_p5 = scmp.ge.s32.totalorder %s13_s14, 4   ;;  %s5666_s13 = smov %s5668_s15 }
 0x2f5   :  { %12 = sbr.rel (!%p10_p5) target bundleno = 2 (0x2), region = 71 }

</bundles_post_ra>
